<compile_context>
chip_gen: v5e
topology: v5e:2x2
jax: 0.10.0
libtpu: 0.0.40
codegen_flags: <defaults>
</compile_context>

<pallas_src>
import math

import jax
import jax.numpy as jnp
from jax.experimental import pallas as pl
from jax.experimental.pallas import tpu as pltpu

LEAKY_SLOPE = 0.01   # nn.LeakyReLU default
BN_EPS = 1e-5        # nn.BatchNorm1d default
NEG_INF = -1e30


def _round_up(x, m):
    return ((x + m - 1) // m) * m


def _bias_correction_kernel(
    # graph data (edge-tiled where the E axis appears)
    x_lig, x_poc, x_edge, s_src, s_dst, g_graph,
    # fused (attention || value) projections
    w_lig, b_lig, w_poc, b_poc, w_edge, b_edge,
    # lin_att = PReLU -> Linear(H, 1); att weight passed lane-dense as [1, H]
    alpha, att_row, att_b,
    # FC head (BatchNorm folded to scale/shift; Dropout = identity in eval)
    fc1_w, fc1_b, bn1_s, bn1_t,
    fc2_w, fc2_b, bn2_s, bn2_t,
    fc3_w, fc3_b,
    # output
    out_ref,
    # scratch
    hlig_s, hpoc_s, m_s, l_s, w_s, prod_s, cstat_s, acc_s,
):
    f32, bf16 = jnp.float32, jnp.bfloat16
    dot = lambda a, b: jnp.dot(a, b, preferred_element_type=f32)

    phase = pl.program_id(0)
    t = pl.program_id(1)
    n_tiles = pl.num_programs(1)
    H = att_row.shape[1]
    TE = x_edge.shape[0]
    row0 = pl.multiple_of(t * TE, TE)

    # ---- phase 0: projections, logits, value products, online softmax stats --
    @pl.when(phase == 0)
    def _phase0():
        @pl.when(t == 0)
        def _init():
            # fused node projections (attention || value), kept bf16 for gathers
            hlig_s[...] = (dot(x_lig[...], w_lig[...]) + b_lig[...]).astype(bf16)
            hpoc_s[...] = (dot(x_poc[...], w_poc[...]) + b_poc[...]).astype(bf16)
            m_s[...] = jnp.full_like(m_s, NEG_INF)
            l_s[...] = jnp.zeros_like(l_s)

        # one fused one-hot gather per structure matrix -> [TE, 2H] (bf16 MXU)
        src_cat = dot(s_src[...], hlig_s[...])
        dst_cat = dot(s_dst[...], hpoc_s[...])
        e_cat = dot(x_edge[...], w_edge[...]) + b_edge[...]

        # attention half -> per-edge logit (VPU mul + lane reduce, no [H,1] dot)
        w_att = src_cat[:, :H] + dst_cat[:, :H] + e_cat[:, :H]
        w_att = jnp.where(w_att > 0, w_att, alpha[...] * w_att)      # PReLU
        logit = jnp.sum(w_att * att_row[...], axis=-1, keepdims=True) + att_b[...]

        # pad edges (all-zero S_dst row) forced to NEG_INF -> their exp()
        # underflows to 0 everywhere downstream.
        s_dst_f = s_dst[...].astype(f32)
        valid = jnp.sum(s_dst_f, axis=1, keepdims=True)              # [TE, 1]
        logit = jnp.where(valid > 0, logit, NEG_INF)

        logit_row = jnp.transpose(logit)                             # [1, TE]
        w_s[pl.ds(t, 1), :] = logit_row                              # lane-dense stash

        # value half -> per-edge product, stashed (bf16) for phase 1
        prod_s[pl.ds(row0, TE), :] = (
            e_cat[:, H:] * src_cat[:, H:] * dst_cat[:, H:]).astype(bf16)

        # online segment max / denominator per destination pocket node.
        # mask = S_dst^T built in-kernel (XLU transpose, no extra HBM stream).
        mask = jnp.transpose(s_dst_f)                                # [N_poc, TE]
        masked = jnp.where(mask > 0, logit_row, NEG_INF)
        m_new = jnp.maximum(m_s[...], jnp.max(masked, axis=1, keepdims=True))
        # gather m_new per edge so exp() runs over TE elements, not N_poc*TE
        m_edge = dot(s_dst_f, m_new)                                 # [TE, 1]
        p_edge = jnp.exp(logit - m_edge)                             # [TE, 1]
        l_s[...] = l_s[...] * jnp.exp(m_s[...] - m_new) + dot(mask, p_edge)
        m_s[...] = m_new

    # ---- phase 1: softmax scores, per-graph weighted edge sum, FC head -------
    @pl.when(phase == 1)
    def _phase1():
        @pl.when(t == 0)
        def _stats():
            # exact per-node log-sum-exp; isolated nodes (l == 0) are never
            # gathered (their S_dst column is all zero) but guard them anyway.
            has_edges = l_s[...] > 0
            c = m_s[...] + jnp.log(jnp.where(has_edges, l_s[...], 1.0))
            c = jnp.where(has_edges, c, 0.0)
            # hi/lo bf16 split keeps the bf16 one-hot gather ~f32 exact
            c_hi = c.astype(bf16).astype(f32)
            c_lo = c - c_hi
            cstat_s[...] = jnp.concatenate([c_hi, c_lo], axis=1).astype(bf16)
            acc_s[...] = jnp.zeros_like(acc_s)

        gath = dot(s_dst[...], cstat_s[...])                         # [TE, 2]
        c_edge = gath[:, 0:1] + gath[:, 1:2]                         # [TE, 1]
        logit_row = w_s[pl.ds(t, 1), :]                              # [1, TE]
        scores = jnp.exp(logit_row - jnp.transpose(c_edge))          # [1, TE]
        # fold scores into the 0/1 graph scatter matrix (g is one-hot)
        g_scaled = (g_graph[...] * scores).astype(bf16)              # [B, TE]
        acc_s[...] += dot(g_scaled, prod_s[pl.ds(row0, TE), :])      # [B, H]

        @pl.when(t == n_tiles - 1)
        def _finalize():
            leaky = lambda x: jnp.where(x > 0, x, LEAKY_SLOPE * x)
            h = dot(acc_s[...], fc1_w[...]) + fc1_b[...]
            h = leaky(h) * bn1_s[...] + bn1_t[...]
            h = dot(h, fc2_w[...]) + fc2_b[...]
            h = leaky(h) * bn2_s[...] + bn2_t[...]
            out_ref[...] = dot(h, fc3_w[...]) + fc3_b[...]           # [B, 1]


def bias_correction_forward(x_lig, x_poc, x_edge, src, dst, gid,
                            n_lig, n_poc, batch, params, *, edge_tile=256):
    (prj_src_w, prj_src_b, prj_dst_w, prj_dst_b, prj_edge_w, prj_edge_b,
     alpha, att_w, att_b,
     w_src_w, w_src_b, w_dst_w, w_dst_b, w_edge_w, w_edge_b,
     fc1_w, fc1_b, bn1_g, bn1_b, bn1_m, bn1_v,
     fc2_w, fc2_b, bn2_g, bn2_b, bn2_m, bn2_v,
     fc3_w, fc3_b) = params

    f32, bf16 = jnp.float32, jnp.bfloat16
    hidden = prj_src_w.shape[1]
    edge_f = x_edge.shape[1]

    # --- fuse attention-path || value-path projections
    w_lig_cat = jnp.concatenate([prj_src_w, w_src_w], axis=1)
    b_lig_cat = jnp.concatenate([prj_src_b, w_src_b], axis=1)
    w_poc_cat = jnp.concatenate([prj_dst_w, w_dst_w], axis=1)
    b_poc_cat = jnp.concatenate([prj_dst_b, w_dst_b], axis=1)
    w_edge_cat = jnp.concatenate([prj_edge_w, w_edge_w], axis=1)
    b_edge_cat = jnp.concatenate([prj_edge_b, w_edge_b], axis=1)
    att_row = att_w.T                                         # [1, H]

    # --- fold BatchNorm (eval mode) into scale/shift
    bn1_s = bn1_g * jax.lax.rsqrt(bn1_v + BN_EPS)
    bn1_t = bn1_b - bn1_m * bn1_s
    bn2_s = bn2_g * jax.lax.rsqrt(bn2_v + BN_EPS)
    bn2_t = bn2_b - bn2_m * bn2_s

    # --- pad node counts to sublane multiples (clean in-kernel transposes)
    n_lig_p = _round_up(max(n_lig, 8), 8)
    n_poc_p = _round_up(max(n_poc, 8), 8)
    x_lig_p = jnp.pad(x_lig, ((0, n_lig_p - n_lig), (0, 0)))
    x_poc_p = jnp.pad(x_poc, ((0, n_poc_p - n_poc), (0, 0)))

    # --- dense one-hot graph glue, padded over E, bf16 (exact for 0/1)
    e = src.shape[0]
    e_pad = max(edge_tile, _round_up(e, edge_tile))
    n_tiles = e_pad // edge_tile
    pad = e_pad - e
    s_src = jnp.pad(jax.nn.one_hot(src, n_lig_p, dtype=f32),
                    ((0, pad), (0, 0))).astype(bf16)          # [E_pad, N_lig]
    s_dst = jnp.pad(jax.nn.one_hot(dst, n_poc_p, dtype=f32),
                    ((0, pad), (0, 0))).astype(bf16)          # [E_pad, N_poc]
    g_mat = jnp.pad(jax.nn.one_hot(gid, batch, dtype=f32).T,
                    ((0, 0), (0, pad))).astype(bf16)          # [B, E_pad]
    x_edge_p = jnp.pad(x_edge, ((0, pad), (0, 0)))            # f32 (small stream)

    data = (x_lig_p, x_poc_p, x_edge_p, s_src, s_dst, g_mat)
    prm = (w_lig_cat, b_lig_cat, w_poc_cat, b_poc_cat, w_edge_cat, b_edge_cat,
           alpha, att_row, att_b,
           fc1_w, fc1_b, bn1_s, bn1_t,
           fc2_w, fc2_b, bn2_s, bn2_t,
           fc3_w, fc3_b)

    def full_spec(shape):
        return pl.BlockSpec(shape, lambda p, t: (0, 0))

    last = n_tiles - 1
    # Phase-aware maps: a tile only read in one phase keeps a repeated block
    # index in the other phase, so Pallas skips those DMAs entirely.
    p0_stream = lambda p, t: (t * (1 - p) + last * p, 0)      # phase-0 only
    p1_stream = lambda p, t: (t * p, 0)                       # phase-1 only
    both_stream = lambda p, t: (t, 0)                         # both phases

    in_specs = [
        full_spec(x_lig_p.shape),                             # x_lig
        full_spec(x_poc_p.shape),                             # x_poc
        pl.BlockSpec((edge_tile, edge_f), p0_stream),         # x_edge
        pl.BlockSpec((edge_tile, n_lig_p), p0_stream),        # S_src
        pl.BlockSpec((edge_tile, n_poc_p), both_stream),      # S_dst
        pl.BlockSpec((batch, edge_tile), p1_stream),          # G
    ] + [full_spec(a.shape) for a in prm]

    scratch = [
        pltpu.VMEM((n_lig_p, 2 * hidden), bf16),   # fused ligand projection
        pltpu.VMEM((n_poc_p, 2 * hidden), bf16),   # fused pocket projection
        pltpu.VMEM((n_poc_p, 1), f32),             # running per-node max
        pltpu.VMEM((n_poc_p, 1), f32),             # running per-node denom
        pltpu.VMEM((n_tiles, edge_tile), f32),     # lane-dense per-edge logits
        pltpu.VMEM((e_pad, hidden), bf16),         # per-edge value products
        pltpu.VMEM((n_poc_p, 2), bf16),            # per-node LSE (hi/lo split)
        pltpu.VMEM((batch, hidden), f32),          # per-graph accumulator
    ]

    # --- explicit VMEM budget: double-buffered streams + persistent scratch +
    #     per-tile temporaries with headroom (keeps v7x's 64 MiB honest).
    def nbytes(shape, itemsize):
        return math.prod(shape) * itemsize
    stream_bytes = 2 * (nbytes((edge_tile, edge_f), 4)
                        + nbytes((edge_tile, n_lig_p), 2)
                        + nbytes((edge_tile, n_poc_p), 2)
                        + nbytes((batch, edge_tile), 2))
    resident_bytes = (nbytes(x_lig_p.shape, 4) + nbytes(x_poc_p.shape, 4)
                      + sum(nbytes(a.shape, 4) for a in prm))
    scratch_bytes = (nbytes((n_lig_p, 2 * hidden), 2)
                     + nbytes((n_poc_p, 2 * hidden), 2)
                     + nbytes((max(n_tiles, 8), edge_tile), 4)
                     + nbytes((e_pad, hidden), 2)
                     + nbytes((batch, hidden), 4)
                     + 8 * 128 * 4 * 4)
    temp_bytes = 10 * edge_tile * max(2 * hidden, n_poc_p, 128) * 4
    vmem_limit = resident_bytes + stream_bytes + scratch_bytes + temp_bytes + (4 << 20)
    vmem_limit = int(min(max(vmem_limit, 16 << 20), 128 << 20))

    grid_spec = pltpu.PrefetchScalarGridSpec(
        num_scalar_prefetch=0,
        grid=(2, n_tiles),                 # (softmax-stats pass, score pass)
        in_specs=in_specs,
        out_specs=pl.BlockSpec((batch, 1), lambda p, t: (0, 0)),
        scratch_shapes=scratch,
    )
    return pl.pallas_call(
        _bias_correction_kernel,
        out_shape=jax.ShapeDtypeStruct((batch, 1), f32),
        grid_spec=grid_spec,
        compiler_params=pltpu.CompilerParams(
            dimension_semantics=("arbitrary", "arbitrary"),
            vmem_limit_bytes=vmem_limit,
        ),
    )(*data, *prm)


# -------------------------- parameter construction --------------------------
def init_params(key, node_f, edge_f, hidden, d_fc=200, n_tasks=1):
    ks = list(jax.random.split(key, 24))

    def lin(k, din, dout, scale=0.1):
        kw, kb = jax.random.split(k)
        w = jax.random.normal(kw, (din, dout), jnp.float32) * scale
        b = jax.random.normal(kb, (1, dout), jnp.float32) * scale
        return w, b

    def bn_params(k, dim):
        k1, k2, k3, k4 = jax.random.split(k, 4)
        g = 1.0 + 0.05 * jax.random.normal(k1, (1, dim), jnp.float32)
        b = 0.05 * jax.random.normal(k2, (1, dim), jnp.float32)
        m = 0.05 * jax.random.normal(k3, (1, dim), jnp.float32)
        v = 1.0 + 0.05 * jnp.abs(jax.random.normal(k4, (1, dim), jnp.float32))
        return g, b, m, v

    prj_src_w, prj_src_b = lin(ks[0], node_f, hidden)
    prj_dst_w, prj_dst_b = lin(ks[1], node_f, hidden)
    prj_edge_w, prj_edge_b = lin(ks[2], edge_f, hidden)
    alpha = jnp.full((1, 1), 0.25, jnp.float32)      # nn.PReLU default init
    att_w, att_b = lin(ks[3], hidden, 1)
    w_src_w, w_src_b = lin(ks[4], node_f, hidden)
    w_dst_w, w_dst_b = lin(ks[5], node_f, hidden)
    w_edge_w, w_edge_b = lin(ks[6], edge_f, hidden)
    fc1_w, fc1_b = lin(ks[7], hidden, d_fc)
    bn1 = bn_params(ks[8], d_fc)
    fc2_w, fc2_b = lin(ks[9], d_fc, d_fc)
    bn2 = bn_params(ks[10], d_fc)
    fc3_w, fc3_b = lin(ks[11], d_fc, n_tasks)

    return (
        prj_src_w, prj_src_b, prj_dst_w, prj_dst_b, prj_edge_w, prj_edge_b,
        alpha, att_w, att_b,
        w_src_w, w_src_b, w_dst_w, w_dst_b, w_edge_w, w_edge_b,
        fc1_w, fc1_b, *bn1,
        fc2_w, fc2_b, *bn2,
        fc3_w, fc3_b,
    )


# --------------------------- pure-JAX reference -----------------------------
def reference_forward(x_lig, x_poc, x_edge, src, dst, gid, n_poc, batch, p):
    (prj_src_w, prj_src_b, prj_dst_w, prj_dst_b, prj_edge_w, prj_edge_b,
     alpha, att_w, att_b,
     w_src_w, w_src_b, w_dst_w, w_dst_b, w_edge_w, w_edge_b,
     fc1_w, fc1_b, bn1_g, bn1_b, bn1_m, bn1_v,
     fc2_w, fc2_b, bn2_g, bn2_b, bn2_m, bn2_v,
     fc3_w, fc3_b) = p

    h_lig = x_lig @ prj_src_w + prj_src_b
    h_poc = x_poc @ prj_dst_w + prj_dst_b
    e_prj = x_edge @ prj_edge_w + prj_edge_b
    w = h_lig[src] + h_poc[dst] + e_prj
    w = jnp.where(w > 0, w, alpha * w)
    w = (w @ att_w + att_b)[:, 0]                              # [E]

    seg_max = jax.ops.segment_max(w, dst, num_segments=n_poc)
    exp_w = jnp.exp(w - seg_max[dst])
    denom = jax.ops.segment_sum(exp_w, dst, num_segments=n_poc)
    scores = (exp_w / denom[dst])[:, None]                     # [E, 1]

    hv_lig = x_lig @ w_src_w + w_src_b
    hv_poc = x_poc @ w_dst_w + w_dst_b
    e_val = x_edge @ w_edge_w + w_edge_b
    l = scores * e_val * hv_lig[src] * hv_poc[dst]             # [E, H]
    g_sum = jax.ops.segment_sum(l, gid, num_segments=batch)    # [B, H]

    def leaky(x):
        return jnp.where(x > 0, x, LEAKY_SLOPE * x)

    h = g_sum @ fc1_w + fc1_b
    h = bn1_g * (leaky(h) - bn1_m) * jax.lax.rsqrt(bn1_v + BN_EPS) + bn1_b
    h = h @ fc2_w + fc2_b
    h = bn2_g * (leaky(h) - bn2_m) * jax.lax.rsqrt(bn2_v + BN_EPS) + bn2_b
    return h @ fc3_w + fc3_b


# --------------------------------- main --------------------------------------
if __name__ == "__main__":
    key = jax.random.PRNGKey(0)
    k_graph, k_feat, k_params = jax.random.split(key, 3)

    # model dims
    NODE_F, EDGE_F, HIDDEN = 16, 8, 32
    # batched bipartite graph: B graphs, each with 8 ligand / 8 pocket nodes and
    # 160 cross edges -> 320 edges total -> 2 edge tiles at edge_tile=256
    # (exercises both passes, cross-tile online softmax and pad-edge guards).
    B, N_LIG_PER, N_POC_PER, E_PER = 2, 8, 8, 160
    N_LIG, N_POC, E = B * N_LIG_PER, B * N_POC_PER, B * E_PER

    k_src, k_dst = jax.random.split(k_graph)
    src = jnp.concatenate([
        jax.random.randint(jax.random.fold_in(k_src, b), (E_PER,), 0, N_LIG_PER)
        + b * N_LIG_PER for b in range(B)])
    dst = jnp.concatenate([
        jax.random.randint(jax.random.fold_in(k_dst, b), (E_PER,), 0, N_POC_PER)
        + b * N_POC_PER for b in range(B)])
    gid = jnp.repeat(jnp.arange(B), E_PER)

    k1, k2, k3 = jax.random.split(k_feat, 3)
    x_lig = jax.random.normal(k1, (N_LIG, NODE_F), jnp.float32)
    x_poc = jax.random.normal(k2, (N_POC, NODE_F), jnp.float32)
    x_edge = jax.random.normal(k3, (E, EDGE_F), jnp.float32)

    params = init_params(k_params, NODE_F, EDGE_F, HIDDEN)

    out = bias_correction_forward(x_lig, x_poc, x_edge, src, dst, gid,
                                  N_LIG, N_POC, B, params, edge_tile=256)
    out = jax.block_until_ready(out)

    ref = reference_forward(x_lig, x_poc, x_edge, src, dst, gid, N_POC, B, params)
    assert out.shape == (B, 1)
    # bf16 gather operands / value products -> small bounded drift vs f32 ref
    assert jnp.allclose(out, ref, rtol=3e-2, atol=3e-2), (out, ref)

    print("KERNEL_OK")
</pallas_src>

<mosaic_0001>
module attributes {stable_mosaic.version = 11 : i64} {
  func.func @_bias_correction_kernel(%arg0: i32, %arg1: i32, %arg2: memref<16x16xf32, #tpu.memory_space<vmem>>, %arg3: memref<16x16xf32, #tpu.memory_space<vmem>>, %arg4: memref<256x8xf32, #tpu.memory_space<vmem>>, %arg5: memref<256x16xbf16, #tpu.memory_space<vmem>>, %arg6: memref<256x16xbf16, #tpu.memory_space<vmem>>, %arg7: memref<2x256xbf16, #tpu.memory_space<vmem>>, %arg8: memref<16x64xf32, #tpu.memory_space<vmem>>, %arg9: memref<1x64xf32, #tpu.memory_space<vmem>>, %arg10: memref<16x64xf32, #tpu.memory_space<vmem>>, %arg11: memref<1x64xf32, #tpu.memory_space<vmem>>, %arg12: memref<8x64xf32, #tpu.memory_space<vmem>>, %arg13: memref<1x64xf32, #tpu.memory_space<vmem>>, %arg14: memref<1x1xf32, #tpu.memory_space<vmem>>, %arg15: memref<1x32xf32, #tpu.memory_space<vmem>>, %arg16: memref<1x1xf32, #tpu.memory_space<vmem>>, %arg17: memref<32x200xf32, #tpu.memory_space<vmem>>, %arg18: memref<1x200xf32, #tpu.memory_space<vmem>>, %arg19: memref<1x200xf32, #tpu.memory_space<vmem>>, %arg20: memref<1x200xf32, #tpu.memory_space<vmem>>, %arg21: memref<200x200xf32, #tpu.memory_space<vmem>>, %arg22: memref<1x200xf32, #tpu.memory_space<vmem>>, %arg23: memref<1x200xf32, #tpu.memory_space<vmem>>, %arg24: memref<1x200xf32, #tpu.memory_space<vmem>>, %arg25: memref<200x1xf32, #tpu.memory_space<vmem>>, %arg26: memref<1x1xf32, #tpu.memory_space<vmem>>, %arg27: memref<2x1xf32, #tpu.memory_space<vmem>>, %arg28: memref<16x64xbf16, #tpu.memory_space<vmem>>, %arg29: memref<16x64xbf16, #tpu.memory_space<vmem>>, %arg30: memref<16x1xf32, #tpu.memory_space<vmem>>, %arg31: memref<16x1xf32, #tpu.memory_space<vmem>>, %arg32: memref<2x256xf32, #tpu.memory_space<vmem>>, %arg33: memref<512x32xbf16, #tpu.memory_space<vmem>>, %arg34: memref<16x2xbf16, #tpu.memory_space<vmem>>, %arg35: memref<2x32xf32, #tpu.memory_space<vmem>>) attributes {dimension_semantics = [#tpu.dimension_semantics<arbitrary>, #tpu.dimension_semantics<arbitrary>], iteration_bounds = array<i64: 2, 2>, scalar_prefetch = 0 : i64, scratch_operands = 8 : i64, tpu.core_type = #tpu.core_type<tc>, window_params = [{pipeline_mode = #tpu.pipeline_mode<synchronous>, transform_indices = @transform_0, window_bounds = array<i64: 16, 16>}, {pipeline_mode = #tpu.pipeline_mode<synchronous>, transform_indices = @transform_1, window_bounds = array<i64: 16, 16>}, {transform_indices = @transform_2, window_bounds = array<i64: 256, 8>}, {transform_indices = @transform_3, window_bounds = array<i64: 256, 16>}, {transform_indices = @transform_4, window_bounds = array<i64: 256, 16>}, {transform_indices = @transform_5, window_bounds = array<i64: 2, 256>}, {pipeline_mode = #tpu.pipeline_mode<synchronous>, transform_indices = @transform_6, window_bounds = array<i64: 16, 64>}, {pipeline_mode = #tpu.pipeline_mode<synchronous>, transform_indices = @transform_7, window_bounds = array<i64: 1, 64>}, {pipeline_mode = #tpu.pipeline_mode<synchronous>, transform_indices = @transform_8, window_bounds = array<i64: 16, 64>}, {pipeline_mode = #tpu.pipeline_mode<synchronous>, transform_indices = @transform_9, window_bounds = array<i64: 1, 64>}, {pipeline_mode = #tpu.pipeline_mode<synchronous>, transform_indices = @transform_10, window_bounds = array<i64: 8, 64>}, {pipeline_mode = #tpu.pipeline_mode<synchronous>, transform_indices = @transform_11, window_bounds = array<i64: 1, 64>}, {pipeline_mode = #tpu.pipeline_mode<synchronous>, transform_indices = @transform_12, window_bounds = array<i64: 1, 1>}, {pipeline_mode = #tpu.pipeline_mode<synchronous>, transform_indices = @transform_13, window_bounds = array<i64: 1, 32>}, {pipeline_mode = #tpu.pipeline_mode<synchronous>, transform_indices = @transform_14, window_bounds = array<i64: 1, 1>}, {pipeline_mode = #tpu.pipeline_mode<synchronous>, transform_indices = @transform_15, window_bounds = array<i64: 32, 200>}, {pipeline_mode = #tpu.pipeline_mode<synchronous>, transform_indices = @transform_16, window_bounds = array<i64: 1, 200>}, {pipeline_mode = #tpu.pipeline_mode<synchronous>, transform_indices = @transform_17, window_bounds = array<i64: 1, 200>}, {pipeline_mode = #tpu.pipeline_mode<synchronous>, transform_indices = @transform_18, window_bounds = array<i64: 1, 200>}, {pipeline_mode = #tpu.pipeline_mode<synchronous>, transform_indices = @transform_19, window_bounds = array<i64: 200, 200>}, {pipeline_mode = #tpu.pipeline_mode<synchronous>, transform_indices = @transform_20, window_bounds = array<i64: 1, 200>}, {pipeline_mode = #tpu.pipeline_mode<synchronous>, transform_indices = @transform_21, window_bounds = array<i64: 1, 200>}, {pipeline_mode = #tpu.pipeline_mode<synchronous>, transform_indices = @transform_22, window_bounds = array<i64: 1, 200>}, {pipeline_mode = #tpu.pipeline_mode<synchronous>, transform_indices = @transform_23, window_bounds = array<i64: 200, 1>}, {pipeline_mode = #tpu.pipeline_mode<synchronous>, transform_indices = @transform_24, window_bounds = array<i64: 1, 1>}, {pipeline_mode = #tpu.pipeline_mode<synchronous>, transform_indices = @transform_25, window_bounds = array<i64: 2, 1>}]} {
    %c256_i32 = arith.constant 256 : i32
    %0 = arith.muli %arg1, %c256_i32 : i32
    %1 = tpu.assume_multiple %0, 256 : i32
    %c0_i32 = arith.constant 0 : i32
    %2 = arith.cmpi eq, %arg0, %c0_i32 : i32
    %3 = arith.extui %2 : i1 to i32
    %c0_i32_0 = arith.constant 0 : i32
    %4 = arith.cmpi ne, %3, %c0_i32_0 : i32
    scf.if %4 {
      %c0_i32_2 = arith.constant 0 : i32
      %8 = arith.cmpi eq, %arg1, %c0_i32_2 : i32
      %9 = arith.extui %8 : i1 to i32
      %c0_i32_3 = arith.constant 0 : i32
      %10 = arith.cmpi ne, %9, %c0_i32_3 : i32
      scf.if %10 {
        %c0_49 = arith.constant 0 : index
        %c0_50 = arith.constant 0 : index
        %84 = vector.load %arg2[%c0_49, %c0_50] : memref<16x16xf32, #tpu.memory_space<vmem>>, vector<16x16xf32>
        %c0_51 = arith.constant 0 : index
        %c0_52 = arith.constant 0 : index
        %85 = vector.load %arg8[%c0_51, %c0_52] : memref<16x64xf32, #tpu.memory_space<vmem>>, vector<16x64xf32>
        %cst_53 = arith.constant dense<0.000000e+00> : vector<16x64xf32>
        %86 = tpu.matmul %84, %85, %cst_53 {dimension_numbers = #tpu.dot_dimension_numbers<[1], [0], [0], [1], [0, 0, 1, 1], [], []>} : vector<16x16xf32>, vector<16x64xf32>, vector<16x64xf32> -> vector<16x64xf32>
        %c0_54 = arith.constant 0 : index
        %c0_55 = arith.constant 0 : index
        %87 = vector.load %arg9[%c0_54, %c0_55] : memref<1x64xf32, #tpu.memory_space<vmem>>, vector<1x64xf32>
        %88 = vector.broadcast %87 : vector<1x64xf32> to vector<16x64xf32>
        %89 = arith.addf %86, %88 : vector<16x64xf32>
        %90 = arith.truncf %89 : vector<16x64xf32> to vector<16x64xbf16>
        %c0_56 = arith.constant 0 : index
        %c0_57 = arith.constant 0 : index
        %91 = vector.load %arg28[%c0_56, %c0_57] : memref<16x64xbf16, #tpu.memory_space<vmem>>, vector<16x64xbf16>
        tpu.vector_store %arg28[%c0_56, %c0_57], %90 {strides = array<i32>} : memref<16x64xbf16, #tpu.memory_space<vmem>>, vector<16x64xbf16>,
        %c0_58 = arith.constant 0 : index
        %c0_59 = arith.constant 0 : index
        %92 = vector.load %arg3[%c0_58, %c0_59] : memref<16x16xf32, #tpu.memory_space<vmem>>, vector<16x16xf32>
        %c0_60 = arith.constant 0 : index
        %c0_61 = arith.constant 0 : index
        %93 = vector.load %arg10[%c0_60, %c0_61] : memref<16x64xf32, #tpu.memory_space<vmem>>, vector<16x64xf32>
        %cst_62 = arith.constant dense<0.000000e+00> : vector<16x64xf32>
        %94 = tpu.matmul %92, %93, %cst_62 {dimension_numbers = #tpu.dot_dimension_numbers<[1], [0], [0], [1], [0, 0, 1, 1], [], []>} : vector<16x16xf32>, vector<16x64xf32>, vector<16x64xf32> -> vector<16x64xf32>
        %c0_63 = arith.constant 0 : index
        %c0_64 = arith.constant 0 : index
        %95 = vector.load %arg11[%c0_63, %c0_64] : memref<1x64xf32, #tpu.memory_space<vmem>>, vector<1x64xf32>
        %96 = vector.broadcast %95 : vector<1x64xf32> to vector<16x64xf32>
        %97 = arith.addf %94, %96 : vector<16x64xf32>
        %98 = arith.truncf %97 : vector<16x64xf32> to vector<16x64xbf16>
        %c0_65 = arith.constant 0 : index
        %c0_66 = arith.constant 0 : index
        %99 = vector.load %arg29[%c0_65, %c0_66] : memref<16x64xbf16, #tpu.memory_space<vmem>>, vector<16x64xbf16>
        tpu.vector_store %arg29[%c0_65, %c0_66], %98 {strides = array<i32>} : memref<16x64xbf16, #tpu.memory_space<vmem>>, vector<16x64xbf16>,
        %cst_67 = arith.constant -1.000000e+30 : f32
        %100 = vector.broadcast %cst_67 : f32 to vector<16x1xf32>
        %c0_68 = arith.constant 0 : index
        %c0_69 = arith.constant 0 : index
        %101 = vector.load %arg30[%c0_68, %c0_69] : memref<16x1xf32, #tpu.memory_space<vmem>>, vector<16x1xf32>
        tpu.vector_store %arg30[%c0_68, %c0_69], %100 {strides = array<i32>} : memref<16x1xf32, #tpu.memory_space<vmem>>, vector<16x1xf32>,
        %cst_70 = arith.constant 0.000000e+00 : f32
        %102 = vector.broadcast %cst_70 : f32 to vector<16x1xf32>
        %c0_71 = arith.constant 0 : index
        %c0_72 = arith.constant 0 : index
        %103 = vector.load %arg31[%c0_71, %c0_72] : memref<16x1xf32, #tpu.memory_space<vmem>>, vector<16x1xf32>
        tpu.vector_store %arg31[%c0_71, %c0_72], %102 {strides = array<i32>} : memref<16x1xf32, #tpu.memory_space<vmem>>, vector<16x1xf32>,
      } else {
      }
      %c0 = arith.constant 0 : index
      %c0_4 = arith.constant 0 : index
      %11 = vector.load %arg5[%c0, %c0_4] : memref<256x16xbf16, #tpu.memory_space<vmem>>, vector<256x16xbf16>
      %c0_5 = arith.constant 0 : index
      %c0_6 = arith.constant 0 : index
      %12 = vector.load %arg28[%c0_5, %c0_6] : memref<16x64xbf16, #tpu.memory_space<vmem>>, vector<16x64xbf16>
      %cst = arith.constant dense<0.000000e+00> : vector<256x64xf32>
      %13 = tpu.matmul %11, %12, %cst {dimension_numbers = #tpu.dot_dimension_numbers<[1], [0], [0], [1], [0, 0, 1, 1], [], []>} : vector<256x16xbf16>, vector<16x64xbf16>, vector<256x64xf32> -> vector<256x64xf32>
      %c0_7 = arith.constant 0 : index
      %c0_8 = arith.constant 0 : index
      %14 = vector.load %arg6[%c0_7, %c0_8] : memref<256x16xbf16, #tpu.memory_space<vmem>>, vector<256x16xbf16>
      %c0_9 = arith.constant 0 : index
      %c0_10 = arith.constant 0 : index
      %15 = vector.load %arg29[%c0_9, %c0_10] : memref<16x64xbf16, #tpu.memory_space<vmem>>, vector<16x64xbf16>
      %cst_11 = arith.constant dense<0.000000e+00> : vector<256x64xf32>
      %16 = tpu.matmul %14, %15, %cst_11 {dimension_numbers = #tpu.dot_dimension_numbers<[1], [0], [0], [1], [0, 0, 1, 1], [], []>} : vector<256x16xbf16>, vector<16x64xbf16>, vector<256x64xf32> -> vector<256x64xf32>
      %c0_12 = arith.constant 0 : index
      %c0_13 = arith.constant 0 : index
      %17 = vector.load %arg4[%c0_12, %c0_13] : memref<256x8xf32, #tpu.memory_space<vmem>>, vector<256x8xf32>
      %c0_14 = arith.constant 0 : index
      %c0_15 = arith.constant 0 : index
      %18 = vector.load %arg12[%c0_14, %c0_15] : memref<8x64xf32, #tpu.memory_space<vmem>>, vector<8x64xf32>
      %cst_16 = arith.constant dense<0.000000e+00> : vector<256x64xf32>
      %19 = tpu.matmul %17, %18, %cst_16 {dimension_numbers = #tpu.dot_dimension_numbers<[1], [0], [0], [1], [0, 0, 1, 1], [], []>} : vector<256x8xf32>, vector<8x64xf32>, vector<256x64xf32> -> vector<256x64xf32>
      %c0_17 = arith.constant 0 : index
      %c0_18 = arith.constant 0 : index
      %20 = vector.load %arg13[%c0_17, %c0_18] : memref<1x64xf32, #tpu.memory_space<vmem>>, vector<1x64xf32>
      %21 = vector.broadcast %20 : vector<1x64xf32> to vector<256x64xf32>
      %22 = arith.addf %19, %21 : vector<256x64xf32>
      %23 = vector.extract_strided_slice %13 {offsets = [0, 0], sizes = [256, 32], strides = [1, 1]} : vector<256x64xf32> to vector<256x32xf32>
      %24 = vector.extract_strided_slice %16 {offsets = [0, 0], sizes = [256, 32], strides = [1, 1]} : vector<256x64xf32> to vector<256x32xf32>
      %25 = arith.addf %23, %24 : vector<256x32xf32>
      %26 = vector.extract_strided_slice %22 {offsets = [0, 0], sizes = [256, 32], strides = [1, 1]} : vector<256x64xf32> to vector<256x32xf32>
      %27 = arith.addf %25, %26 : vector<256x32xf32>
      %cst_19 = arith.constant 0.000000e+00 : f32
      %28 = vector.broadcast %cst_19 : f32 to vector<256x32xf32>
      %29 = arith.cmpf ogt, %27, %28 : vector<256x32xf32>
      %c0_20 = arith.constant 0 : index
      %c0_21 = arith.constant 0 : index
      %30 = vector.load %arg14[%c0_20, %c0_21] : memref<1x1xf32, #tpu.memory_space<vmem>>, vector<1x1xf32>
      %31 = vector.broadcast %30 : vector<1x1xf32> to vector<256x32xf32>
      %32 = arith.mulf %31, %27 : vector<256x32xf32>
      %33 = arith.select %29, %27, %32 : vector<256x32xi1>, vector<256x32xf32>
      %c0_22 = arith.constant 0 : index
      %c0_23 = arith.constant 0 : index
      %34 = vector.load %arg15[%c0_22, %c0_23] : memref<1x32xf32, #tpu.memory_space<vmem>>, vector<1x32xf32>
      %35 = vector.broadcast %34 : vector<1x32xf32> to vector<256x32xf32>
      %36 = arith.mulf %33, %35 : vector<256x32xf32>
      %cst_24 = arith.constant dense<0.000000e+00> : vector<256xf32>
      %37 = vector.multi_reduction <add>, %36, %cst_24 [1] : vector<256x32xf32> to vector<256xf32>
      %38 = vector.shape_cast %37 : vector<256xf32> to vector<256x1xf32>
      %c0_25 = arith.constant 0 : index
      %c0_26 = arith.constant 0 : index
      %39 = vector.load %arg16[%c0_25, %c0_26] : memref<1x1xf32, #tpu.memory_space<vmem>>, vector<1x1xf32>
      %40 = vector.broadcast %39 : vector<1x1xf32> to vector<256x1xf32>
      %41 = arith.addf %38, %40 : vector<256x1xf32>
      %c0_27 = arith.constant 0 : index
      %c0_28 = arith.constant 0 : index
      %42 = vector.load %arg6[%c0_27, %c0_28] : memref<256x16xbf16, #tpu.memory_space<vmem>>, vector<256x16xbf16>
      %43 = arith.extf %42 : vector<256x16xbf16> to vector<256x16xf32>
      %cst_29 = arith.constant dense<0.000000e+00> : vector<256xf32>
      %44 = vector.multi_reduction <add>, %43, %cst_29 [1] : vector<256x16xf32> to vector<256xf32>
      %45 = vector.shape_cast %44 : vector<256xf32> to vector<256x1xf32>
      %cst_30 = arith.constant 0.000000e+00 : f32
      %46 = vector.broadcast %cst_30 : f32 to vector<256x1xf32>
      %47 = arith.cmpf ogt, %45, %46 : vector<256x1xf32>
      %cst_31 = arith.constant -1.000000e+30 : f32
      %48 = vector.broadcast %cst_31 : f32 to vector<256x1xf32>
      %49 = arith.select %47, %41, %48 : vector<256x1xi1>, vector<256x1xf32>
      %50 = tpu.transpose %49, [1, 0] : vector<256x1xf32> -> vector<1x256xf32>
      %51 = arith.index_cast %arg1 : i32 to index
      %c0_32 = arith.constant 0 : index
      %52 = vector.load %arg32[%51, %c0_32] : memref<2x256xf32, #tpu.memory_space<vmem>>, vector<1x256xf32>
      tpu.vector_store %arg32[%51, %c0_32], %50 {strides = array<i32>} : memref<2x256xf32, #tpu.memory_space<vmem>>, vector<1x256xf32>,
      %53 = vector.extract_strided_slice %22 {offsets = [0, 32], sizes = [256, 32], strides = [1, 1]} : vector<256x64xf32> to vector<256x32xf32>
      %54 = vector.extract_strided_slice %13 {offsets = [0, 32], sizes = [256, 32], strides = [1, 1]} : vector<256x64xf32> to vector<256x32xf32>
      %55 = arith.mulf %53, %54 : vector<256x32xf32>
      %56 = vector.extract_strided_slice %16 {offsets = [0, 32], sizes = [256, 32], strides = [1, 1]} : vector<256x64xf32> to vector<256x32xf32>
      %57 = arith.mulf %55, %56 : vector<256x32xf32>
      %58 = arith.truncf %57 : vector<256x32xf32> to vector<256x32xbf16>
      %59 = arith.index_cast %1 : i32 to index
      %c0_33 = arith.constant 0 : index
      %60 = vector.load %arg33[%59, %c0_33] : memref<512x32xbf16, #tpu.memory_space<vmem>>, vector<256x32xbf16>
      tpu.vector_store %arg33[%59, %c0_33], %58 {strides = array<i32>} : memref<512x32xbf16, #tpu.memory_space<vmem>>, vector<256x32xbf16>,
      %61 = tpu.transpose %43, [1, 0] : vector<256x16xf32> -> vector<16x256xf32>
      %cst_34 = arith.constant 0.000000e+00 : f32
      %62 = vector.broadcast %cst_34 : f32 to vector<16x256xf32>
      %63 = arith.cmpf ogt, %61, %62 : vector<16x256xf32>
      %cst_35 = arith.constant -1.000000e+30 : f32
      %64 = vector.shape_cast %50 : vector<1x256xf32> to vector<1x256xf32>
      %65 = vector.broadcast %64 : vector<1x256xf32> to vector<16x256xf32>
      %66 = vector.broadcast %cst_35 : f32 to vector<16x256xf32>
      %67 = arith.select %63, %65, %66 : vector<16x256xi1>, vector<16x256xf32>
      %c0_36 = arith.constant 0 : index
      %c0_37 = arith.constant 0 : index
      %68 = vector.load %arg30[%c0_36, %c0_37] : memref<16x1xf32, #tpu.memory_space<vmem>>, vector<16x1xf32>
      %cst_38 = arith.constant dense<0xFF800000> : vector<16xf32>
      %69 = vector.multi_reduction <maximumf>, %67, %cst_38 [1] : vector<16x256xf32> to vector<16xf32>
      %70 = vector.shape_cast %69 : vector<16xf32> to vector<16x1xf32>
      %71 = arith.maximumf %68, %70 : vector<16x1xf32>
      %cst_39 = arith.constant dense<0.000000e+00> : vector<256x1xf32>
      %72 = tpu.matmul %43, %71, %cst_39 {dimension_numbers = #tpu.dot_dimension_numbers<[1], [0], [0], [1], [0, 0, 1, 1], [], []>} : vector<256x16xf32>, vector<16x1xf32>, vector<256x1xf32> -> vector<256x1xf32>
      %73 = arith.subf %49, %72 : vector<256x1xf32>
      %74 = math.exp %73 : vector<256x1xf32>
      %c0_40 = arith.constant 0 : index
      %c0_41 = arith.constant 0 : index
      %75 = vector.load %arg31[%c0_40, %c0_41] : memref<16x1xf32, #tpu.memory_space<vmem>>, vector<16x1xf32>
      %c0_42 = arith.constant 0 : index
      %c0_43 = arith.constant 0 : index
      %76 = vector.load %arg30[%c0_42, %c0_43] : memref<16x1xf32, #tpu.memory_space<vmem>>, vector<16x1xf32>
      %77 = arith.subf %76, %71 : vector<16x1xf32>
      %78 = math.exp %77 : vector<16x1xf32>
      %79 = arith.mulf %75, %78 : vector<16x1xf32>
      %cst_44 = arith.constant dense<0.000000e+00> : vector<16x1xf32>
      %80 = tpu.matmul %61, %74, %cst_44 {dimension_numbers = #tpu.dot_dimension_numbers<[1], [0], [0], [1], [0, 0, 1, 1], [], []>} : vector<16x256xf32>, vector<256x1xf32>, vector<16x1xf32> -> vector<16x1xf32>
      %81 = arith.addf %79, %80 : vector<16x1xf32>
      %c0_45 = arith.constant 0 : index
      %c0_46 = arith.constant 0 : index
      %82 = vector.load %arg31[%c0_45, %c0_46] : memref<16x1xf32, #tpu.memory_space<vmem>>, vector<16x1xf32>
      tpu.vector_store %arg31[%c0_45, %c0_46], %81 {strides = array<i32>} : memref<16x1xf32, #tpu.memory_space<vmem>>, vector<16x1xf32>,
      %c0_47 = arith.constant 0 : index
      %c0_48 = arith.constant 0 : index
      %83 = vector.load %arg30[%c0_47, %c0_48] : memref<16x1xf32, #tpu.memory_space<vmem>>, vector<16x1xf32>
      tpu.vector_store %arg30[%c0_47, %c0_48], %71 {strides = array<i32>} : memref<16x1xf32, #tpu.memory_space<vmem>>, vector<16x1xf32>,
    } else {
    }
    %c1_i32 = arith.constant 1 : i32
    %5 = arith.cmpi eq, %arg0, %c1_i32 : i32
    %6 = arith.extui %5 : i1 to i32
    %c0_i32_1 = arith.constant 0 : i32
    %7 = arith.cmpi ne, %6, %c0_i32_1 : i32
    scf.if %7 {
      %c0_i32_2 = arith.constant 0 : i32
      %8 = arith.cmpi eq, %arg1, %c0_i32_2 : i32
      %9 = arith.extui %8 : i1 to i32
      %c0_i32_3 = arith.constant 0 : i32
      %10 = arith.cmpi ne, %9, %c0_i32_3 : i32
      scf.if %10 {
        %c0_18 = arith.constant 0 : index
        %c0_19 = arith.constant 0 : index
        %36 = vector.load %arg31[%c0_18, %c0_19] : memref<16x1xf32, #tpu.memory_space<vmem>>, vector<16x1xf32>
        %cst_20 = arith.constant 0.000000e+00 : f32
        %37 = vector.broadcast %cst_20 : f32 to vector<16x1xf32>
        %38 = arith.cmpf ogt, %36, %37 : vector<16x1xf32>
        %c0_21 = arith.constant 0 : index
        %c0_22 = arith.constant 0 : index
        %39 = vector.load %arg30[%c0_21, %c0_22] : memref<16x1xf32, #tpu.memory_space<vmem>>, vector<16x1xf32>
        %c0_23 = arith.constant 0 : index
        %c0_24 = arith.constant 0 : index
        %40 = vector.load %arg31[%c0_23, %c0_24] : memref<16x1xf32, #tpu.memory_space<vmem>>, vector<16x1xf32>
        %cst_25 = arith.constant 1.000000e+00 : f32
        %41 = vector.broadcast %cst_25 : f32 to vector<16x1xf32>
        %42 = arith.select %38, %40, %41 : vector<16x1xi1>, vector<16x1xf32>
        %43 = math.log %42 : vector<16x1xf32>
        %44 = arith.addf %39, %43 : vector<16x1xf32>
        %cst_26 = arith.constant 0.000000e+00 : f32
        %45 = vector.broadcast %cst_26 : f32 to vector<16x1xf32>
        %46 = arith.select %38, %44, %45 : vector<16x1xi1>, vector<16x1xf32>
        %47 = arith.truncf %46 : vector<16x1xf32> to vector<16x1xbf16>
        %48 = arith.extf %47 : vector<16x1xbf16> to vector<16x1xf32>
        %49 = arith.subf %46, %48 : vector<16x1xf32>
        %50 = tpu.concatenate %48, %49 in 1 : vector<16x1xf32>, vector<16x1xf32> -> vector<16x2xf32>
        %51 = arith.truncf %50 : vector<16x2xf32> to vector<16x2xbf16>
        %c0_27 = arith.constant 0 : index
        %c0_28 = arith.constant 0 : index
        %52 = vector.load %arg34[%c0_27, %c0_28] : memref<16x2xbf16, #tpu.memory_space<vmem>>, vector<16x2xbf16>
        tpu.vector_store %arg34[%c0_27, %c0_28], %51 {strides = array<i32>} : memref<16x2xbf16, #tpu.memory_space<vmem>>, vector<16x2xbf16>,
        %cst_29 = arith.constant 0.000000e+00 : f32
        %53 = vector.broadcast %cst_29 : f32 to vector<2x32xf32>
        %c0_30 = arith.constant 0 : index
        %c0_31 = arith.constant 0 : index
        %54 = vector.load %arg35[%c0_30, %c0_31] : memref<2x32xf32, #tpu.memory_space<vmem>>, vector<2x32xf32>
        tpu.vector_store %arg35[%c0_30, %c0_31], %53 {strides = array<i32>} : memref<2x32xf32, #tpu.memory_space<vmem>>, vector<2x32xf32>,
      } else {
      }
      %c0 = arith.constant 0 : index
      %c0_4 = arith.constant 0 : index
      %11 = vector.load %arg6[%c0, %c0_4] : memref<256x16xbf16, #tpu.memory_space<vmem>>, vector<256x16xbf16>
      %c0_5 = arith.constant 0 : index
      %c0_6 = arith.constant 0 : index
      %12 = vector.load %arg34[%c0_5, %c0_6] : memref<16x2xbf16, #tpu.memory_space<vmem>>, vector<16x2xbf16>
      %cst = arith.constant dense<0.000000e+00> : vector<256x2xf32>
      %13 = tpu.matmul %11, %12, %cst {dimension_numbers = #tpu.dot_dimension_numbers<[1], [0], [0], [1], [0, 0, 1, 1], [], []>} : vector<256x16xbf16>, vector<16x2xbf16>, vector<256x2xf32> -> vector<256x2xf32>
      %14 = vector.extract_strided_slice %13 {offsets = [0, 0], sizes = [256, 1], strides = [1, 1]} : vector<256x2xf32> to vector<256x1xf32>
      %15 = vector.extract_strided_slice %13 {offsets = [0, 1], sizes = [256, 1], strides = [1, 1]} : vector<256x2xf32> to vector<256x1xf32>
      %16 = arith.addf %14, %15 : vector<256x1xf32>
      %17 = arith.index_cast %arg1 : i32 to index
      %c0_7 = arith.constant 0 : index
      %18 = vector.load %arg32[%17, %c0_7] : memref<2x256xf32, #tpu.memory_space<vmem>>, vector<1x256xf32>
      %19 = tpu.transpose %16, [1, 0] : vector<256x1xf32> -> vector<1x256xf32>
      %20 = arith.subf %18, %19 : vector<1x256xf32>
      %21 = math.exp %20 : vector<1x256xf32>
      %c0_8 = arith.constant 0 : index
      %c0_9 = arith.constant 0 : index
      %22 = vector.load %arg7[%c0_8, %c0_9] : memref<2x256xbf16, #tpu.memory_space<vmem>>, vector<2x256xbf16>
      %23 = arith.extf %22 : vector<2x256xbf16> to vector<2x256xf32>
      %24 = vector.broadcast %21 : vector<1x256xf32> to vector<2x256xf32>
      %25 = arith.mulf %23, %24 : vector<2x256xf32>
      %26 = arith.truncf %25 : vector<2x256xf32> to vector<2x256xbf16>
      %c0_10 = arith.constant 0 : index
      %c0_11 = arith.constant 0 : index
      %27 = vector.load %arg35[%c0_10, %c0_11] : memref<2x32xf32, #tpu.memory_space<vmem>>, vector<2x32xf32>
      %28 = arith.index_cast %1 : i32 to index
      %c0_12 = arith.constant 0 : index
      %29 = vector.load %arg33[%28, %c0_12] : memref<512x32xbf16, #tpu.memory_space<vmem>>, vector<256x32xbf16>
      %cst_13 = arith.constant dense<0.000000e+00> : vector<2x32xf32>
      %30 = tpu.matmul %26, %29, %cst_13 {dimension_numbers = #tpu.dot_dimension_numbers<[1], [0], [0], [1], [0, 0, 1, 1], [], []>} : vector<2x256xbf16>, vector<256x32xbf16>, vector<2x32xf32> -> vector<2x32xf32>
      %31 = arith.addf %27, %30 : vector<2x32xf32>
      %c0_14 = arith.constant 0 : index
      %c0_15 = arith.constant 0 : index
      %32 = vector.load %arg35[%c0_14, %c0_15] : memref<2x32xf32, #tpu.memory_space<vmem>>, vector<2x32xf32>
      tpu.vector_store %arg35[%c0_14, %c0_15], %31 {strides = array<i32>} : memref<2x32xf32, #tpu.memory_space<vmem>>, vector<2x32xf32>,
      %c1_i32_16 = arith.constant 1 : i32
      %33 = arith.cmpi eq, %arg1, %c1_i32_16 : i32
      %34 = arith.extui %33 : i1 to i32
      %c0_i32_17 = arith.constant 0 : i32
      %35 = arith.cmpi ne, %34, %c0_i32_17 : i32
      scf.if %35 {
        %c0_18 = arith.constant 0 : index
        %c0_19 = arith.constant 0 : index
        %36 = vector.load %arg35[%c0_18, %c0_19] : memref<2x32xf32, #tpu.memory_space<vmem>>, vector<2x32xf32>
        %c0_20 = arith.constant 0 : index
        %c0_21 = arith.constant 0 : index
        %37 = vector.load %arg17[%c0_20, %c0_21] : memref<32x200xf32, #tpu.memory_space<vmem>>, vector<32x200xf32>
        %cst_22 = arith.constant dense<0.000000e+00> : vector<2x200xf32>
        %38 = tpu.matmul %36, %37, %cst_22 {dimension_numbers = #tpu.dot_dimension_numbers<[1], [0], [0], [1], [0, 0, 1, 1], [], []>} : vector<2x32xf32>, vector<32x200xf32>, vector<2x200xf32> -> vector<2x200xf32>
        %c0_23 = arith.constant 0 : index
        %c0_24 = arith.constant 0 : index
        %39 = vector.load %arg18[%c0_23, %c0_24] : memref<1x200xf32, #tpu.memory_space<vmem>>, vector<1x200xf32>
        %40 = vector.broadcast %39 : vector<1x200xf32> to vector<2x200xf32>
        %41 = arith.addf %38, %40 : vector<2x200xf32>
        %cst_25 = arith.constant 0.000000e+00 : f32
        %42 = vector.broadcast %cst_25 : f32 to vector<2x200xf32>
        %43 = arith.cmpf ogt, %41, %42 : vector<2x200xf32>
        %cst_26 = arith.constant 0.00999999977 : f32
        %44 = vector.broadcast %cst_26 : f32 to vector<2x200xf32>
        %45 = arith.mulf %44, %41 : vector<2x200xf32>
        %46 = arith.select %43, %41, %45 : vector<2x200xi1>, vector<2x200xf32>
        %c0_27 = arith.constant 0 : index
        %c0_28 = arith.constant 0 : index
        %47 = vector.load %arg19[%c0_27, %c0_28] : memref<1x200xf32, #tpu.memory_space<vmem>>, vector<1x200xf32>
        %48 = vector.broadcast %47 : vector<1x200xf32> to vector<2x200xf32>
        %49 = arith.mulf %46, %48 : vector<2x200xf32>
        %c0_29 = arith.constant 0 : index
        %c0_30 = arith.constant 0 : index
        %50 = vector.load %arg20[%c0_29, %c0_30] : memref<1x200xf32, #tpu.memory_space<vmem>>, vector<1x200xf32>
        %51 = vector.broadcast %50 : vector<1x200xf32> to vector<2x200xf32>
        %52 = arith.addf %49, %51 : vector<2x200xf32>
        %c0_31 = arith.constant 0 : index
        %c0_32 = arith.constant 0 : index
        %53 = vector.load %arg21[%c0_31, %c0_32] : memref<200x200xf32, #tpu.memory_space<vmem>>, vector<200x200xf32>
        %cst_33 = arith.constant dense<0.000000e+00> : vector<2x200xf32>
        %54 = tpu.matmul %52, %53, %cst_33 {dimension_numbers = #tpu.dot_dimension_numbers<[1], [0], [0], [1], [0, 0, 1, 1], [], []>} : vector<2x200xf32>, vector<200x200xf32>, vector<2x200xf32> -> vector<2x200xf32>
        %c0_34 = arith.constant 0 : index
        %c0_35 = arith.constant 0 : index
        %55 = vector.load %arg22[%c0_34, %c0_35] : memref<1x200xf32, #tpu.memory_space<vmem>>, vector<1x200xf32>
        %56 = vector.broadcast %55 : vector<1x200xf32> to vector<2x200xf32>
        %57 = arith.addf %54, %56 : vector<2x200xf32>
        %cst_36 = arith.constant 0.000000e+00 : f32
        %58 = vector.broadcast %cst_36 : f32 to vector<2x200xf32>
        %59 = arith.cmpf ogt, %57, %58 : vector<2x200xf32>
        %cst_37 = arith.constant 0.00999999977 : f32
        %60 = vector.broadcast %cst_37 : f32 to vector<2x200xf32>
        %61 = arith.mulf %60, %57 : vector<2x200xf32>
        %62 = arith.select %59, %57, %61 : vector<2x200xi1>, vector<2x200xf32>
        %c0_38 = arith.constant 0 : index
        %c0_39 = arith.constant 0 : index
        %63 = vector.load %arg23[%c0_38, %c0_39] : memref<1x200xf32, #tpu.memory_space<vmem>>, vector<1x200xf32>
        %64 = vector.broadcast %63 : vector<1x200xf32> to vector<2x200xf32>
        %65 = arith.mulf %62, %64 : vector<2x200xf32>
        %c0_40 = arith.constant 0 : index
        %c0_41 = arith.constant 0 : index
        %66 = vector.load %arg24[%c0_40, %c0_41] : memref<1x200xf32, #tpu.memory_space<vmem>>, vector<1x200xf32>
        %67 = vector.broadcast %66 : vector<1x200xf32> to vector<2x200xf32>
        %68 = arith.addf %65, %67 : vector<2x200xf32>
        %c0_42 = arith.constant 0 : index
        %c0_43 = arith.constant 0 : index
        %69 = vector.load %arg25[%c0_42, %c0_43] : memref<200x1xf32, #tpu.memory_space<vmem>>, vector<200x1xf32>
        %cst_44 = arith.constant dense<0.000000e+00> : vector<2x1xf32>
        %70 = tpu.matmul %68, %69, %cst_44 {dimension_numbers = #tpu.dot_dimension_numbers<[1], [0], [0], [1], [0, 0, 1, 1], [], []>} : vector<2x200xf32>, vector<200x1xf32>, vector<2x1xf32> -> vector<2x1xf32>
        %c0_45 = arith.constant 0 : index
        %c0_46 = arith.constant 0 : index
        %71 = vector.load %arg26[%c0_45, %c0_46] : memref<1x1xf32, #tpu.memory_space<vmem>>, vector<1x1xf32>
        %72 = vector.broadcast %71 : vector<1x1xf32> to vector<2x1xf32>
        %73 = arith.addf %70, %72 : vector<2x1xf32>
        %c0_47 = arith.constant 0 : index
        %c0_48 = arith.constant 0 : index
        %74 = vector.load %arg27[%c0_47, %c0_48] : memref<2x1xf32, #tpu.memory_space<vmem>>, vector<2x1xf32>
        tpu.vector_store %arg27[%c0_47, %c0_48], %73 {strides = array<i32>} : memref<2x1xf32, #tpu.memory_space<vmem>>, vector<2x1xf32>,
      } else {
      }
    } else {
    }
    return
  }
  func.func @transform_0(%arg0: i32, %arg1: i32) -> (i32, i32) {
    %c0_i32 = arith.constant 0 : i32
    %c0_i32_0 = arith.constant 0 : i32
    %c0_i32_1 = arith.constant 0 : i32
    return %c0_i32, %c0_i32_0 : i32, i32
  }
  func.func @transform_1(%arg0: i32, %arg1: i32) -> (i32, i32) {
    %c0_i32 = arith.constant 0 : i32
    %c0_i32_0 = arith.constant 0 : i32
    %c0_i32_1 = arith.constant 0 : i32
    return %c0_i32, %c0_i32_0 : i32, i32
  }
  func.func @transform_2(%arg0: i32, %arg1: i32) -> (i32, i32) {
    %c1_i32 = arith.constant 1 : i32
    %0 = arith.subi %c1_i32, %arg0 : i32
    %1 = arith.muli %arg1, %0 : i32
    %c1_i32_0 = arith.constant 1 : i32
    %2 = arith.muli %c1_i32_0, %arg0 : i32
    %3 = arith.addi %1, %2 : i32
    %c0_i32 = arith.constant 0 : i32
    %c0_i32_1 = arith.constant 0 : i32
    return %3, %c0_i32 : i32, i32
  }
  func.func @transform_3(%arg0: i32, %arg1: i32) -> (i32, i32) {
    %c1_i32 = arith.constant 1 : i32
    %0 = arith.subi %c1_i32, %arg0 : i32
    %1 = arith.muli %arg1, %0 : i32
    %c1_i32_0 = arith.constant 1 : i32
    %2 = arith.muli %c1_i32_0, %arg0 : i32
    %3 = arith.addi %1, %2 : i32
    %c0_i32 = arith.constant 0 : i32
    %c0_i32_1 = arith.constant 0 : i32
    return %3, %c0_i32 : i32, i32
  }
  func.func @transform_4(%arg0: i32, %arg1: i32) -> (i32, i32) {
    %c0_i32 = arith.constant 0 : i32
    %c0_i32_0 = arith.constant 0 : i32
    return %arg1, %c0_i32 : i32, i32
  }
  func.func @transform_5(%arg0: i32, %arg1: i32) -> (i32, i32) {
    %0 = arith.muli %arg1, %arg0 : i32
    %c0_i32 = arith.constant 0 : i32
    %c0_i32_0 = arith.constant 0 : i32
    return %0, %c0_i32 : i32, i32
  }
  func.func @transform_6(%arg0: i32, %arg1: i32) -> (i32, i32) {
    %c0_i32 = arith.constant 0 : i32
    %c0_i32_0 = arith.constant 0 : i32
    %c0_i32_1 = arith.constant 0 : i32
    return %c0_i32, %c0_i32_0 : i32, i32
  }
  func.func @transform_7(%arg0: i32, %arg1: i32) -> (i32, i32) {
    %c0_i32 = arith.constant 0 : i32
    %c0_i32_0 = arith.constant 0 : i32
    %c0_i32_1 = arith.constant 0 : i32
    return %c0_i32, %c0_i32_0 : i32, i32
  }
  func.func @transform_8(%arg0: i32, %arg1: i32) -> (i32, i32) {
    %c0_i32 = arith.constant 0 : i32
    %c0_i32_0 = arith.constant 0 : i32
    %c0_i32_1 = arith.constant 0 : i32
    return %c0_i32, %c0_i32_0 : i32, i32
  }
  func.func @transform_9(%arg0: i32, %arg1: i32) -> (i32, i32) {
    %c0_i32 = arith.constant 0 : i32
    %c0_i32_0 = arith.constant 0 : i32
    %c0_i32_1 = arith.constant 0 : i32
    return %c0_i32, %c0_i32_0 : i32, i32
  }
  func.func @transform_10(%arg0: i32, %arg1: i32) -> (i32, i32) {
    %c0_i32 = arith.constant 0 : i32
    %c0_i32_0 = arith.constant 0 : i32
    %c0_i32_1 = arith.constant 0 : i32
    return %c0_i32, %c0_i32_0 : i32, i32
  }
  func.func @transform_11(%arg0: i32, %arg1: i32) -> (i32, i32) {
    %c0_i32 = arith.constant 0 : i32
    %c0_i32_0 = arith.constant 0 : i32
    %c0_i32_1 = arith.constant 0 : i32
    return %c0_i32, %c0_i32_0 : i32, i32
  }
  func.func @transform_12(%arg0: i32, %arg1: i32) -> (i32, i32) {
    %c0_i32 = arith.constant 0 : i32
    %c0_i32_0 = arith.constant 0 : i32
    %c0_i32_1 = arith.constant 0 : i32
    return %c0_i32, %c0_i32_0 : i32, i32
  }
  func.func @transform_13(%arg0: i32, %arg1: i32) -> (i32, i32) {
    %c0_i32 = arith.constant 0 : i32
    %c0_i32_0 = arith.constant 0 : i32
    %c0_i32_1 = arith.constant 0 : i32
    return %c0_i32, %c0_i32_0 : i32, i32
  }
  func.func @transform_14(%arg0: i32, %arg1: i32) -> (i32, i32) {
    %c0_i32 = arith.constant 0 : i32
    %c0_i32_0 = arith.constant 0 : i32
    %c0_i32_1 = arith.constant 0 : i32
    return %c0_i32, %c0_i32_0 : i32, i32
  }
  func.func @transform_15(%arg0: i32, %arg1: i32) -> (i32, i32) {
    %c0_i32 = arith.constant 0 : i32
    %c0_i32_0 = arith.constant 0 : i32
    %c0_i32_1 = arith.constant 0 : i32
    return %c0_i32, %c0_i32_0 : i32, i32
  }
  func.func @transform_16(%arg0: i32, %arg1: i32) -> (i32, i32) {
    %c0_i32 = arith.constant 0 : i32
    %c0_i32_0 = arith.constant 0 : i32
    %c0_i32_1 = arith.constant 0 : i32
    return %c0_i32, %c0_i32_0 : i32, i32
  }
  func.func @transform_17(%arg0: i32, %arg1: i32) -> (i32, i32) {
    %c0_i32 = arith.constant 0 : i32
    %c0_i32_0 = arith.constant 0 : i32
    %c0_i32_1 = arith.constant 0 : i32
    return %c0_i32, %c0_i32_0 : i32, i32
  }
  func.func @transform_18(%arg0: i32, %arg1: i32) -> (i32, i32) {
    %c0_i32 = arith.constant 0 : i32
    %c0_i32_0 = arith.constant 0 : i32
    %c0_i32_1 = arith.constant 0 : i32
    return %c0_i32, %c0_i32_0 : i32, i32
  }
  func.func @transform_19(%arg0: i32, %arg1: i32) -> (i32, i32) {
    %c0_i32 = arith.constant 0 : i32
    %c0_i32_0 = arith.constant 0 : i32
    %c0_i32_1 = arith.constant 0 : i32
    return %c0_i32, %c0_i32_0 : i32, i32
  }
  func.func @transform_20(%arg0: i32, %arg1: i32) -> (i32, i32) {
    %c0_i32 = arith.constant 0 : i32
    %c0_i32_0 = arith.constant 0 : i32
    %c0_i32_1 = arith.constant 0 : i32
    return %c0_i32, %c0_i32_0 : i32, i32
  }
  func.func @transform_21(%arg0: i32, %arg1: i32) -> (i32, i32) {
    %c0_i32 = arith.constant 0 : i32
    %c0_i32_0 = arith.constant 0 : i32
    %c0_i32_1 = arith.constant 0 : i32
    return %c0_i32, %c0_i32_0 : i32, i32
  }
  func.func @transform_22(%arg0: i32, %arg1: i32) -> (i32, i32) {
    %c0_i32 = arith.constant 0 : i32
    %c0_i32_0 = arith.constant 0 : i32
    %c0_i32_1 = arith.constant 0 : i32
    return %c0_i32, %c0_i32_0 : i32, i32
  }
  func.func @transform_23(%arg0: i32, %arg1: i32) -> (i32, i32) {
    %c0_i32 = arith.constant 0 : i32
    %c0_i32_0 = arith.constant 0 : i32
    %c0_i32_1 = arith.constant 0 : i32
    return %c0_i32, %c0_i32_0 : i32, i32
  }
  func.func @transform_24(%arg0: i32, %arg1: i32) -> (i32, i32) {
    %c0_i32 = arith.constant 0 : i32
    %c0_i32_0 = arith.constant 0 : i32
    %c0_i32_1 = arith.constant 0 : i32
    return %c0_i32, %c0_i32_0 : i32, i32
  }
  func.func @transform_25(%arg0: i32, %arg1: i32) -> (i32, i32) {
    %c0_i32 = arith.constant 0 : i32
    %c0_i32_0 = arith.constant 0 : i32
    %c0_i32_1 = arith.constant 0 : i32
    return %c0_i32, %c0_i32_0 : i32, i32
  }
}

</mosaic_0001>

<bundles_post_ra>
// kernel: tpu_custom_call.1
= control target key start
LH: loop header
LB: loop body
LE: loop exit
PB: predicated region body
PF: predicated region fallthrough
CT: control target
= control target key end

     0   :  { %s5084_s26 = smov 0   ;;  %s5090_s27 = smov 0   ;;  %s6838_s0 = inlined_call_operand.vmem [shape: f32[16,16], index: 0, kind: input, shape index: {}]   ;;  %s6839_s1 = inlined_call_operand.vmem [shape: f32[16,16], index: 1, kind: input, shape index: {}]   ;;  %s6840_s2 = inlined_call_operand.vmem [shape: f32[512,8], index: 2, kind: input, shape index: {}]   ;;  %s6841_s3 = inlined_call_operand.vmem [shape: bf16[512,16], index: 3, kind: input, shape index: {}]   ;;  %s6842_s4 = inlined_call_operand.vmem [shape: bf16[512,16], index: 4, kind: input, shape index: {}]   ;;  %s6843_s5 = inlined_call_operand.vmem [shape: bf16[2,512], index: 5, kind: input, shape index: {}]   ;;  %s6844_s6 = inlined_call_operand.vmem [shape: f32[16,64], index: 6, kind: input, shape index: {}]   ;;  %s6845_s7 = inlined_call_operand.vmem [shape: f32[1,64], index: 7, kind: input, shape index: {}]   ;;  %s6846_s8 = inlined_call_operand.vmem [shape: f32[16,64], index: 8, kind: input, shape index: {}]   ;;  %s6847_s9 = inlined_call_operand.vmem [shape: f32[1,64], index: 9, kind: input, shape index: {}]   ;;  %s6848_s10 = inlined_call_operand.vmem [shape: f32[8,64], index: 10, kind: input, shape index: {}]   ;;  %s6849_s11 = inlined_call_operand.vmem [shape: f32[1,64], index: 11, kind: input, shape index: {}]   ;;  %s6850_s12 = inlined_call_operand.<no memory space> [shape: f32[1,1], index: 12, kind: input, shape index: {}]   ;;  %s6851_s13 = inlined_call_operand.vmem [shape: f32[1,32], index: 13, kind: input, shape index: {}]   ;;  %s6852_s15 = inlined_call_operand.vmem [shape: f32[32,200], index: 15, kind: input, shape index: {}]   ;;  %s6853_s16 = inlined_call_operand.vmem [shape: f32[1,200], index: 16, kind: input, shape index: {}]   ;;  %s6854_s17 = inlined_call_operand.vmem [shape: f32[1,200], index: 17, kind: input, shape index: {}]   ;;  %s6855_s18 = inlined_call_operand.vmem [shape: f32[1,200], index: 18, kind: input, shape index: {}]   ;;  %s6856_s19 = inlined_call_operand.vmem [shape: f32[200,200], index: 19, kind: input, shape index: {}]   ;;  %s6857_s20 = inlined_call_operand.vmem [shape: f32[1,200], index: 20, kind: input, shape index: {}]   ;;  %s6858_s21 = inlined_call_operand.vmem [shape: f32[1,200], index: 21, kind: input, shape index: {}]   ;;  %s6859_s22 = inlined_call_operand.vmem [shape: f32[1,200], index: 22, kind: input, shape index: {}]   ;;  %s6860_s23 = inlined_call_operand.vmem [shape: f32[200,1], index: 23, kind: input, shape index: {}]   ;;  %s6861_s25 = inlined_call_operand.vmem [shape: f32[2,1], index: 25, kind: output, shape index: {}]   ;;  %s6862_s14 = inlined_call_operand.<no memory space> [shape: f32[1,1], index: 14, kind: input, shape index: {}]   ;;  %s6863_s24 = inlined_call_operand.<no memory space> [shape: f32[1,1], index: 24, kind: input, shape index: {}]  }
   0x1   :  { %6944 = sst [smem:[#allocation91_spill]] %s6838_s0  ;;  %v30_v0 = vstv %s6850_s12  ;;  %v32_v1 = vstv %s6862_s14  ;;  %v34_v2 = vstv %s6863_s24  ;;  %s5092_s12 = smov 0  }
   0x2   :  { %6945 = sst [smem:[#allocation92_spill]] %s6839_s1  ;;  %31 = vst [vmem:[#allocation10] sm:$0x1] %v30_v0  ;;  %s5086_s1 = smov 0  }
   0x3   :  { %6946 = sst [smem:[#allocation93_spill]] %s6840_s2  ;;  %33 = vst [vmem:[#allocation11] sm:$0x1] %v32_v1 }
   0x4   :  { %6947 = sst [smem:[#allocation94_spill]] %s6841_s3  ;;  %35 = vst [vmem:[#allocation12] sm:$0x1] %v34_v2 }
   0x5   :  { %6948 = sst [smem:[#allocation95_spill]] %s6842_s4 }
   0x6   :  { %6949 = sst [smem:[#allocation96_spill]] %s6843_s5 }
   0x7   :  { %6950 = sst [smem:[#allocation97_spill]] %s6844_s6 }
   0x8   :  { %6951 = sst [smem:[#allocation98_spill]] %s6845_s7 }
   0x9   :  { %6952 = sst [smem:[#allocation99_spill]] %s6846_s8  ;;  %s5088_s8 = smov 0  }
   0xa   :  { %6953 = sst [smem:[#allocation100_spill]] %s6847_s9 }
   0xb   :  { %6954 = sst [smem:[#allocation101_spill]] %s6855_s18 }
   0xc   :  { %6955 = sst [smem:[#allocation102_spill]] %s6857_s20 }
   0xd   :  { %6956 = sst [smem:[#allocation103_spill]] %s6858_s21 }
   0xe   :  { %6957 = sst [smem:[#allocation104_spill]] %s6859_s22 }
   0xf   :  { %6958 = sst [smem:[#allocation105_spill]] %s6861_s25 }
  0x10 LB: > { %6959 = sst [smem:[#allocation13_spill]] %s4928_s8  ;;  %s50_s14 = sadd.s32 1, %s4928_s8  ;;  %s4936_s12 = sphi %s5092_s12, %s41_s12   ;;  %s4932_s27 = sphi %s5090_s27, %s7154_s27   ;;  %s4928_s8 = sphi %s5088_s8, %s7153_s8   ;;  %s4924_s1 = sphi %s5086_s1, %s7152_s1   ;;  %s4920_s26 = sphi %s5084_s26, %s7151_s26  }
  0x11   : > { %6960 = sst [smem:[#allocation14_spill]] %s4932_s27  ;;  %s53_s24 = sadd.s32 1, %s4932_s27 }
  0x12   : > { %6961 = sst [smem:[#allocation15_spill]] %s4936_s12  ;;  %p51_p0 = scmp.ge.s32.totalorder %s50_s14, 2 }
  0x13   : > { %p4202_p1 = scmp.ge.s32.totalorder %s4936_s12, 1  ;;  %p760_p2 = scmp.lt.s32.totalorder %s4936_s12, 5 }
  0x14   : > { %s7156_s14 = smov (%p51_p0, %s50_s14), 0  ;;  %s7158_s24 = smov (!%p51_p0, %s53_s24), %s4932_s27 }
  0x15   : > { %6962 = sst [smem:[#allocation16_spill]] %s7156_s14  ;;  %p761_p3 = pnand %p4202_p1, %p760_p2 }
  0x16   : > { %p55_p4 = scmp.ge.s32.totalorder %s7158_s24, 2  ;;  %s844_s4 = ssub.s32 (!%p761_p3), 1, %s4924_s1 }
  0x17   : > { %764 = sbr.rel (%p761_p3) target bundleno = 2721 (0xaa1), region = 120  ;;  %s4207_s28 = sshll.u32 (!%p761_p3), %s4920_s26, 5 }
  0x18   : > { %s7160_s24 = smov (%p55_p4, %s7158_s24), 0  ;;  %s845_s9 = smul.u32 (!%p761_p3), %s4920_s26, %s844_s4 }
  0x19   : > { %6963 = sst [smem:[#allocation17_spill]] %s7160_s24  ;;  %p869_p5 = scmp.lt.s32.totalorder (!%p761_p3), %s4207_s28, 63 }
  0x1a   : > { %s846_s0 = sadd.s32 (!%p761_p3), %s4924_s1, %s845_s9  ;;  %s874_s2 = smul.u32 (!%p761_p3), %s4920_s26, %s4924_s1 }
  0x1b   : > { %s4203_s29 = sshll.u32 (!%p761_p3), %s846_s0, 5  ;;  %s6964_s14 = sld [smem:[#allocation93_spill]] (!%p761_p3) }
  0x1c   : > { %p848_p6 = scmp.lt.s32.totalorder %s4203_s29, 63  ;;  %s7162_s28 = smov (!%p869_p5, %s4207_s28), 63 }
  0x1d   : > { %s4208_s6 = sshll.u32 %s7162_s28, 2  ;;  %p875_p7 = scmp.lt.s32.totalorder %s874_s2, 0 }
  0x1e   : > { %s7164_s29 = smov (!%p848_p6, %s4203_s29), 63  ;;  %s6965_s4 = sld [smem:[#allocation94_spill]] }
  0x1f   : > { %s4204_s30 = sshll.u32 %s7164_s29, 3  ;;  %s4206_s7 = sshll.u32 %s7164_s29, 2 }
  0x20   : > { %s6966_s5 = sld [smem:[#allocation95_spill]]  ;;  %s7166_s2 = smov (!%p875_p7, %s874_s2), 0 }
  0x21   : > { %s5128_s27 = scalar_lea.vmem %s6964_s14, %s4204_s30  ;;  %s4209_s28 = sshll.u32 %s7166_s2, 2 }
  0x22   : > { %s6967_s29 = sld [smem:[#allocation96_spill]]  ;;  %p4211_p8 = scmp.ne.s32.totalorder %s4924_s1, 0 }
  0x24   : > { %s5133_s25 = scalar_lea.vmem %s6965_s4, %s4206_s7  ;;  %885 = sbr.rel (%p4211_p8) target bundleno = 1523 (0x5f3), region = 124 }
  0x26   : > { %s5138_s22 = scalar_lea.vmem %s6966_s5, %s4208_s6 }
  0x28   : > { %s5143_s18 = scalar_lea.vmem %s6967_s29, %s4209_s28 }
  0x29   : > { %p4212_p9 = scmp.ne.s32.totalorder %s4920_s26, 0 }
  0x2a   : > { %s6968_s14 = sld [smem:[#allocation97_spill]] (!%p4212_p9) }
  0x2b   : > { %889 = sbr.rel (%p4212_p9) target bundleno = 190 (0xbe), region = 128  ;;  %s6969_s6 = sld [smem:[#allocation99_spill]] (!%p4212_p9) }
  0x2c   : > { %s6970_s4 = sld [smem:[#allocation91_spill]] (!%p4212_p9) }
  0x2d   : > { %s6971_s28 = sld [smem:[#allocation92_spill]] (!%p4212_p9) }
  0x2e   : > { %s6972_s30 = sld [smem:[#allocation98_spill]] (!%p4212_p9) }
  0x2f   : > { %s6973_s7 = sld [smem:[#allocation100_spill]] (!%p4212_p9) }
  0x30   : > { %v893_v3 = vld [vmem:[%s6968_s14 + $0x8] sm:$0xff]  ;;  %v892_v5 = vld [vmem:[%s6968_s14] sm:$0xff]  ;;  %vm898_vm0 = vcmask 130048   ;;  %vm974_vm1 = vcmask 7168   ;;  %v4938_v11 = vmov -1e+30  }
  0x31   : > { %v936_v4 = vld [vmem:[%s6969_s6 + $0x8] sm:$0xff]  ;;  %4682 = vmatpush.msra.mxu2 %v893_v3  ;;  %v935_v6 = vld [vmem:[%s6969_s6] sm:$0xff]  ;;  %919 = vmatpush.msra.mxu0 %v893_v3  ;;  %975 = vst.msk [vmem:[#allocation4] sm:$0xff] %vm974_vm1, %v4938_v11  ;;  %v4939_v12 = vmov 0.0   ;;  %vm930_vm2 = vcmask 519168  }
  0x32   : > { %4684 = vmatpush.msra.mxu3 %v936_v4  ;;  %v891_v7 = vld [vmem:[%s6970_s4 + $0x8] sm:$0xff]  ;;  %961 = vmatpush.msra.mxu1 %v936_v4  ;;  %v890_v9 = vld [vmem:[%s6970_s4] sm:$0xff]  ;;  %976 = vst.msk [vmem:[#allocation4 + $0x8] sm:$0xff] %vm974_vm1, %v4938_v11 }
  0x33   : > { %v934_v8 = vld [vmem:[%s6971_s28 + $0x8] sm:$0xff]  ;;  %4683 = vmatpush.msra.mxu2 %v892_v5  ;;  %v933_v10 = vld [vmem:[%s6971_s28] sm:$0xff]  ;;  %920 = vmatpush.msra.mxu0 %v892_v5  ;;  %977 = vst.msk [vmem:[#allocation5] sm:$0xff] %vm974_vm1, %v4939_v12 }
  0x34   : > { %4685 = vmatpush.msra.mxu3 %v935_v6  ;;  %4214 = vmatmul.msk.f32.vlgmr.msra.gmra.mxu2 %vm898_vm0, %v891_v7  ;;  %978 = vst.msk [vmem:[#allocation5 + $0x8] sm:$0xff] %vm974_vm1, %v4939_v12  ;;  %v4767_v13 = vld [vmem:[%s6972_s30] ss:$0 sm:$0xff] }
  0x35   : > { %4216 = vmatmul.msk.f32.vlgmr.msra.gmra.mxu3 %vm898_vm0, %v934_v8  ;;  %962 = vmatpush.msra.mxu1 %v935_v6  ;;  %v4768_v14 = vld [vmem:[%s6973_s7] ss:$0 sm:$0xff] }
  0x36   : > { %4213 = vmatmul.msk.f32.vlgmr.msra.gmra.mxu0 %vm898_vm0, %v890_v9  ;;  %4215 = vmatmul.msk.f32.vlgmr.msra.gmra.mxu1 %vm898_vm0, %v933_v10 }
  0xb3   : > { %v922_v15 = vpop.f32.mrf.mxu0  ;;  %v964_v16 = vpop.f32.mrf.mxu1 }
  0xb4   : > { %v923_v17 = vadd.f32 %v4767_v13, %v922_v15  ;;  %v965_v18 = vadd.f32 %v4768_v14, %v964_v16 }
  0xb6   : > { %v928_v19 = vpack.c.bf16 %v923_v17, %v923_v17  ;;  %v970_v20 = vpack.c.bf16 %v965_v18, %v965_v18 }
  0xb7   : > { %v925_v21 = vpop.f32.mrf.mxu2 }
  0xb8   : > { %v967_v22 = vpop.f32.mrf.mxu3  ;;  %931 = vst.msk [vmem:[#allocation2] sm:$0xf] %vm930_vm2, %v928_v19  ;;  %v926_v23 = vadd.f32 %v4767_v13, %v925_v21 }
  0xb9   : > { %v968_v24 = vadd.f32 %v4768_v14, %v967_v22  ;;  %972 = vst.msk [vmem:[#allocation3] sm:$0xf] %vm930_vm2, %v970_v20 }
  0xba   : > { %v929_v25 = vpack.c.bf16 %v926_v23, %v926_v23 }
  0xbb   : > { %v971_v26 = vpack.c.bf16 %v968_v24, %v968_v24 }
  0xbc   : > { %932 = vst.msk [vmem:[#allocation2 + $0x4] sm:$0xf] %vm930_vm2, %v929_v25 }
  0xbd   : > { %973 = vst.msk [vmem:[#allocation3 + $0x4] sm:$0xf] %vm930_vm2, %v971_v26 }
  0xbe PF: > { %v1526_v27 = vld [vmem:[%s6848_s10] sm:$0xff]  ;;  %vm1531_vm3 = vcmask 64512   ;;  %v4940_v32 = vmov 0   ;;  %vm1099_vm4 = vcmask 130048   ;;  %v1495_v35 = vld [vmem:[%s5128_s27 + $0x8] sm:$0xff]  ;;  %v1496_v36 = vld [vmem:[%s5128_s27 + $0x10] sm:$0xff] }
  0xbf   : > { %v1494_v28 = vld [vmem:[%s5128_s27] sm:$0xff]  ;;  %1643 = vmatpush.msra.mxu2 %v1526_v27  ;;  %4769 = vset.pattern.permute.xlu0 %v4940_v32  ;;  %v4614_v37 = vld [vmem:[%s5133_s25 + $0x8] sm:$0xff]  ;;  %v1497_v41 = vld [vmem:[%s5128_s27 + $0x18] sm:$0xff]  ;;  %vm1944_vm6 = vcmask 261120   ;;  %s2343_s2 = sshra.s32 %s4920_s26, 1  ;;  %s2346_s30 = sand.u32 1, %s4920_s26 }
  0xc0   : > { %v4613_v31 = vld [vmem:[%s5133_s25] sm:$0xff]  ;;  %4385 = vmatmul.msk.f32.vlgmr.msra.gmra.mxu2 %vm1531_vm3, %v1494_v28  ;;  %v4631_v38 = vld [vmem:[%s5138_s22 + $0x8] sm:$0xff]  ;;  %v4615_v47 = vld [vmem:[%s5133_s25 + $0x10] sm:$0xff]  ;;  %s4647_s20 = sshll.u32 %s2343_s2, 2  ;;  %s4941_s3 = smov 96  }
  0xc1   : > { %v4630_v33 = vld [vmem:[%s5138_s22] sm:$0xff]  ;;  %v4632_v48 = vld [vmem:[%s5138_s22 + $0x10] sm:$0xff]  ;;  %v1499_v51 = vld [vmem:[%s5128_s27 + $0x28] sm:$0xff]  ;;  %s2349_s21 = sadd.s32 %s4647_s20, %s2346_s30  ;;  %s7119_s9 = sshll.u32 %s4920_s26, 8 }
  0xc2   : > { %v4812_v34 = vld [vmem:[#allocation10] ss:$0 sm:$0xff]  ;;  %v5212_v49 = vld [vmem:[%s5138_s22 + $0x4c] sm:$0xff]   ;;  %v4616_v61 = vld [vmem:[%s5133_s25 + $0x18] sm:$0xff]  ;;  %s2350_s7 = scalar_lea.vmem [#allocation6], %s2349_s21  ;;  %s2576_s0 = sshra.s32 %s7119_s9, 3 }
  0xc3   : > { %v4629_v29 = vld [vmem:[#allocation2] sm:$0xff]  ;;  %1841 = vperm.xlu0 %4769, %v4812_v34   ;;  %v1253_v39 = vld [vmem:[%s5138_s22 + $0x40] sm:$0xff]   ;;  %v5219_v52 = vunpack.c.l.bf16 %v5212_v49  ;;  %v5230_v57 = vld [vmem:[%s5138_s22 + $0x10] sm:$0xff]   ;;  %s4419_s29 = sshll.u32 %s2576_s0, 2 }
  0xc4   : > { %v4646_v30 = vld [vmem:[#allocation3] sm:$0xff]  ;;  %1155 = vmatpush.bf16.msra.mxu0 %v4629_v29  ;;  %v5195_v40 = vunpack.c.l.bf16 %v1253_v39  ;;  %v1238_v43 = vld [vmem:[%s5138_s22 + $0x4] sm:$0xff]   ;;  %v1240_v54 = vld [vmem:[%s5138_s22 + $0xc] sm:$0xf]  ;;  %v5236_v60 = vunpack.c.l.bf16 %v5230_v57  ;;  %v5264_v10 = vunpack.c.h.bf16 %v1253_v39  ;;  %s6112_s8 = scalar_lea.vmem [#allocation7], %s4419_s29 }
  0xc5   : > { %1412 = vmatpush.bf16.msra.mxu1 %v4646_v30  ;;  %v5202_v44 = vunpack.c.l.bf16 %v1238_v43  ;;  %v1498_v46 = vld [vmem:[%s5128_s27 + $0x20] sm:$0xff]  ;;  %v5215_v50 = vunpack.c.h.bf16 %v1238_v43  ;;  %v5225_v55 = vunpack.c.l.bf16 %v1240_v54  ;;  %v2166_v56 = vsel %vm1099_vm4, %v5219_v52, 0.0  ;;  %v1500_v59 = vld [vmem:[%s5128_s27 + $0x30] sm:$0xff]  ;;  %v4633_v62 = vld [vmem:[%s5138_s22 + $0x18] sm:$0xff] }
  0xc6   : > { %v2157_v42 = vsel %vm1099_vm4, %v5195_v40, 0.0  ;;  %v2121_v63 = vsel %vm1099_vm4, %v5236_v60, 0.0  ;;  %v5245_v0 = vld [vmem:[%s5138_s22 + $0x58] sm:$0xff]   ;;  %v1258_v1 = vld [vmem:[%s5138_s22 + $0x54] sm:$0xf]  ;;  %v2160_v15 = vsel %vm1099_vm4, %v5264_v10, 0.0 }
  0xc7   : > { %4285 = vmatmul.msk.bf16.vlgmr.msra.gmra.mxu0 %vm1099_vm4, %v4613_v31  ;;  %2158 = vadd.xlane.f32.xlu2 %v2157_v42  ;;  %v2112_v45 = vsel %vm1099_vm4, %v5202_v44, 0.0  ;;  %v2115_v53 = vsel %vm1099_vm4, %v5215_v50, 0.0  ;;  %v2118_v58 = vsel %vm1099_vm4, %v5225_v55, 0.0  ;;  %v1237_v2 = vld [vmem:[%s5138_s22] sm:$0xf]  ;;  %v5250_v3 = vunpack.c.l.bf16 %v1258_v1  ;;  %v1501_v5 = vld [vmem:[%s5128_s27 + $0x38] sm:$0xff] }
  0xc8   : > { %4369 = vmatmul.msk.bf16.vlgmr.msra.gmra.mxu1 %vm1099_vm4, %v4630_v33  ;;  %4386 = vmatmul.msk.f32.gmra.mxu2 %vm1531_vm3, %v1495_v35  ;;  %v5252_v4 = vunpack.c.l.bf16 %v1237_v2  ;;  %v5256_v6 = vunpack.c.l.bf16 %v5245_v0  ;;  %v1243_v9 = vld [vmem:[%s5138_s22 + $0x18] sm:$0xf]  ;;  %v5271_v13 = vld [vmem:[%s5138_s22 + $0x1c] sm:$0xff]   ;;  %v5288_v21 = vld [vmem:[%s5138_s22 + $0x64] sm:$0xff]   ;;  %v5308_v31 = vunpack.c.h.bf16 %v5212_v49 }
  0xc9   : > { %6974 = vst [vmem:[#allocation18_spill] sm:$0xff] %v5250_v3  ;;  %v2172_v7 = vsel %vm1099_vm4, %v5250_v3, 0.0  ;;  %v5266_v11 = vunpack.c.l.bf16 %v1243_v9  ;;  %v1502_v16 = vld [vmem:[%s5128_s27 + $0x40] sm:$0xff]  ;;  %v5279_v17 = vunpack.c.l.bf16 %v5271_v13  ;;  %v1255_v23 = vld [vmem:[%s5138_s22 + $0x48] sm:$0xf]  ;;  %v5299_v27 = vunpack.c.l.bf16 %v5288_v21  ;;  %v1265_v43 = vld [vmem:[%s5138_s22 + $0x70] sm:$0xff]  }
  0xca   : > { %6975 = vst [vmem:[#allocation19_spill] sm:$0xff] %v5256_v6  ;;  %v2109_v8 = vsel %vm1099_vm4, %v5252_v4, 0.0  ;;  %v2175_v12 = vsel %vm1099_vm4, %v5256_v6, 0.0  ;;  %v4617_v18 = vld [vmem:[%s5133_s25 + $0x20] sm:$0xff]  ;;  %v5295_v25 = vunpack.c.l.bf16 %v1255_v23  ;;  %v1503_v26 = vld [vmem:[%s5128_s27 + $0x48] sm:$0xff]  ;;  %v5340_v49 = vunpack.c.l.bf16 %v1265_v43  ;;  %v4636_v2 = vld [vmem:[%s5138_s22 + $0x30] sm:$0xff] }
  0xcb   : > { %2110 = vadd.xlane.f32.xlu1 %v2109_v8  ;;  %6976 = vst [vmem:[#allocation20_spill] sm:$0xff] %v5266_v11  ;;  %v2127_v14 = vsel %vm1099_vm4, %v5266_v11, 0.0  ;;  %v4634_v19 = vld [vmem:[%s5138_s22 + $0x20] sm:$0xff]  ;;  %v2130_v20 = vsel %vm1099_vm4, %v5279_v17, 0.0  ;;  %v2184_v33 = vsel %vm1099_vm4, %v5299_v27, 0.0  ;;  %v5315_v34 = vld [vmem:[%s5138_s22 + $0x28] sm:$0xff]   ;;  %v5374_v9 = vunpack.c.h.bf16 %v5271_v13 }
  0xcc   : > { %6977 = vst [vmem:[#allocation21_spill] sm:$0xff] %v5279_v17  ;;  %v1261_v22 = vld [vmem:[%s5138_s22 + $0x60] sm:$0xf]  ;;  %v2163_v29 = vsel %vm1099_vm4, %v5295_v25, 0.0  ;;  %v1246_v30 = vld [vmem:[%s5138_s22 + $0x24] sm:$0xf] }
  0xcd   : > { %v5293_v24 = vunpack.c.l.bf16 %v1261_v22  ;;  %6979 = vst [vmem:[#allocation23_spill] sm:$0xff] %v5299_v27  ;;  %v5310_v32 = vunpack.c.l.bf16 %v1246_v30  ;;  %v4618_v39 = vld [vmem:[%s5133_s25 + $0x28] sm:$0xff]  ;;  %v1249_v54 = vld [vmem:[%s5138_s22 + $0x30] sm:$0xf]  ;;  %v1509_v30 = vld [vmem:[%s5128_s27 + $0x78] sm:$0xff] }
  0xce   : > { %6983 = vst [vmem:[#allocation27_spill] sm:$0xff] %v5340_v49  ;;  %v1508_v22 = vld [vmem:[%s5128_s27 + $0x70] sm:$0xff] }
  0xcf   : > { %2113 = vadd.xlane.f32.xlu2 %v2112_v45  ;;  %6978 = vst [vmem:[#allocation22_spill] sm:$0xff] %v5293_v24  ;;  %v2181_v28 = vsel %vm1099_vm4, %v5293_v24, 0.0  ;;  %v2136_v35 = vsel %vm1099_vm4, %v5310_v32, 0.0  ;;  %v1264_v45 = vld [vmem:[%s5138_s22 + $0x6c] sm:$0xf] }
  0xd0   : > { %4387 = vmatmul.msk.f32.gmra.mxu2 %vm1531_vm3, %v1496_v36  ;;  %6980 = vst [vmem:[#allocation24_spill] sm:$0xff] %v5310_v32  ;;  %v2169_v36 = vsel %vm1099_vm4, %v5308_v31, 0.0 }
  0xd1   : > { %6988 = vst [vmem:[#allocation32_spill] sm:$0xff] %v5374_v9 }
  0xd3   : > { %2161 = vadd.xlane.f32.xlu1 %v2160_v15 }
  0xd7   : > { %4286 = vmatmul.msk.bf16.gmra.mxu0 %vm1099_vm4, %v4614_v37  ;;  %2116 = vadd.xlane.f32.xlu2 %v2115_v53  ;;  %v1504_v37 = vld [vmem:[%s5128_s27 + $0x50] sm:$0xff] }
  0xd8   : > { %4370 = vmatmul.msk.bf16.gmra.mxu1 %vm1099_vm4, %v4631_v38  ;;  %4388 = vmatmul.msk.f32.gmra.mxu2 %vm1531_vm3, %v1497_v41  ;;  %v5323_v38 = vunpack.c.l.bf16 %v5315_v34  ;;  %v4635_v41 = vld [vmem:[%s5138_s22 + $0x28] sm:$0xff] }
  0xda   : > { %6981 = vst [vmem:[#allocation25_spill] sm:$0xff] %v5323_v38  ;;  %v2139_v42 = vsel %vm1099_vm4, %v5323_v38, 0.0 }
  0xdb   : > { %2164 = vadd.xlane.f32.xlu1 %v2163_v29  ;;  %v4637_v29 = vld [vmem:[%s5138_s22 + $0x38] sm:$0xff] }
  0xdf   : > { %2119 = vadd.xlane.f32.xlu2 %v2118_v58  ;;  %v2193_v58 = vsel %vm1099_vm4, %v5340_v49, 0.0 }
  0xe0   : > { %4389 = vmatmul.msk.f32.gmra.mxu2 %vm1531_vm3, %v1498_v46  ;;  %v5334_v46 = vunpack.c.l.bf16 %v1264_v45 }
  0xe2   : > { %6982 = vst [vmem:[#allocation26_spill] sm:$0xff] %v5334_v46 }
  0xe3   : > { %2170 = vadd.xlane.f32.xlu1 %v2169_v36  ;;  %v1510_v36 = vld [vmem:[%s5128_s27 + $0x80] sm:$0xff] }
  0xe7   : > { %4287 = vmatmul.msk.bf16.gmra.mxu0 %vm1099_vm4, %v4615_v47  ;;  %2173 = vadd.xlane.f32.xlu2 %v2172_v7  ;;  %v5337_v47 = vunpack.c.h.bf16 %v5230_v57  ;;  %v5351_v57 = vunpack.c.l.bf16 %v1249_v54  ;;  %v1268_v7 = vld [vmem:[%s5138_s22 + $0x78] sm:$0xff]  }
  0xe8   : > { %4371 = vmatmul.msk.bf16.gmra.mxu1 %vm1099_vm4, %v4632_v48  ;;  %4390 = vmatmul.msk.f32.gmra.mxu2 %vm1531_vm3, %v1499_v51  ;;  %v1505_v48 = vld [vmem:[%s5128_s27 + $0x58] sm:$0xff]  ;;  %v2190_v51 = vsel %vm1099_vm4, %v5334_v46, 0.0  ;;  %v5371_v8 = vunpack.c.l.bf16 %v1268_v7 }
  0xe9   : > { %v2124_v53 = vsel %vm1099_vm4, %v5337_v47, 0.0  ;;  %6985 = vst [vmem:[#allocation29_spill] sm:$0xff] %v5351_v57 }
  0xea   : > { %6987 = vst [vmem:[#allocation31_spill] sm:$0xff] %v5371_v8  ;;  %v2199_v15 = vsel %vm1099_vm4, %v5371_v8, 0.0 }
  0xeb   : > { %2125 = vadd.xlane.f32.xlu1 %v2124_v53 }
  0xed   : > { %2167 = vadd.xlane.f32.xlu0 %v2166_v56  ;;  %v5349_v56 = vunpack.c.h.bf16 %v5245_v0  ;;  %v4619_v0 = vld [vmem:[%s5133_s25 + $0x30] sm:$0xff] }
  0xef   : > { %2128 = vadd.xlane.f32.xlu2 %v2127_v14  ;;  %6984 = vst [vmem:[#allocation28_spill] sm:$0xff] %v5349_v56  ;;  %v5377_v14 = vunpack.c.h.bf16 %v1268_v7 }
  0xf0   : > { %4391 = vmatmul.msk.f32.gmra.mxu2 %vm1531_vm3, %v1500_v59  ;;  %v1250_v59 = vld [vmem:[%s5138_s22 + $0x34] sm:$0xff]  }
  0xf1   : > { %v5361_v1 = vunpack.c.l.bf16 %v1250_v59  ;;  %6989 = vst [vmem:[#allocation33_spill] sm:$0xff] %v5377_v14  ;;  %v2202_v13 = vsel %vm1099_vm4, %v5377_v14, 0.0  ;;  %v5425_v53 = vunpack.c.h.bf16 %v1250_v59 }
  0xf3   : > { %6986 = vst [vmem:[#allocation30_spill] sm:$0xff] %v5361_v1 }
  0xf4   : > { %6994 = vst [vmem:[#allocation38_spill] sm:$0xff] %v5425_v53 }
  0xf5   : > { %2122 = vadd.xlane.f32.xlu0 %v2121_v63  ;;  %v1506_v63 = vld [vmem:[%s5128_s27 + $0x60] sm:$0xff] }
  0xf7   : > { %4288 = vmatmul.msk.bf16.gmra.mxu0 %vm1099_vm4, %v4616_v61  ;;  %2182 = vadd.xlane.f32.xlu2 %v2181_v28  ;;  %v2145_v61 = vsel %vm1099_vm4, %v5351_v57, 0.0  ;;  %v4620_v28 = vld [vmem:[%s5133_s25 + $0x38] sm:$0xff] }
  0xf8   : > { %4372 = vmatmul.msk.bf16.gmra.mxu1 %vm1099_vm4, %v4633_v62  ;;  %4392 = vmatmul.msk.f32.gmra.mxu2 %vm1531_vm3, %v1501_v5  ;;  %v2178_v62 = vsel %vm1099_vm4, %v5349_v56, 0.0  ;;  %v2148_v5 = vsel %vm1099_vm4, %v5361_v1, 0.0 }
  0xf9   : > { %2179 = vadd.xlane.f32.xlu1 %v2178_v62 }
  0xfd   : > { %2176 = vadd.xlane.f32.xlu0 %v2175_v12  ;;  %v1507_v12 = vld [vmem:[%s5128_s27 + $0x68] sm:$0xff] }
  0xff   : > { %2137 = vadd.xlane.f32.xlu2 %v2136_v35  ;;  %v5409_v35 = vunpack.c.h.bf16 %v1265_v43 }
 0x100   : > { %4393 = vmatmul.msk.f32.gmra.mxu2 %vm1531_vm3, %v1502_v16  ;;  %v2133_v16 = vsel %vm1099_vm4, %v5374_v9, 0.0 }
 0x101   : > { %2134 = vadd.xlane.f32.xlu1 %v2133_v16  ;;  %6993 = vst [vmem:[#allocation37_spill] sm:$0xff] %v5409_v35 }
 0x105   : > { %2131 = vadd.xlane.f32.xlu0 %v2130_v20  ;;  %v5390_v20 = vunpack.c.h.bf16 %v5288_v21  ;;  %v5403_v21 = vunpack.c.h.bf16 %v5315_v34 }
 0x107   : > { %4289 = vmatmul.msk.bf16.gmra.mxu0 %vm1099_vm4, %v4617_v18  ;;  %2191 = vadd.xlane.f32.xlu2 %v2190_v51  ;;  %v1252_v18 = vld [vmem:[%s5138_s22 + $0x3c] sm:$0xf]  ;;  %6991 = vst [vmem:[#allocation35_spill] sm:$0xff] %v5390_v20 }
 0x108   : > { %4373 = vmatmul.msk.bf16.gmra.mxu1 %vm1099_vm4, %v4634_v19  ;;  %4394 = vmatmul.msk.f32.gmra.mxu2 %vm1531_vm3, %v1503_v26  ;;  %v5387_v19 = vunpack.c.l.bf16 %v1252_v18  ;;  %v2187_v26 = vsel %vm1099_vm4, %v5390_v20, 0.0  ;;  %6992 = vst [vmem:[#allocation36_spill] sm:$0xff] %v5403_v21 }
 0x109   : > { %2188 = vadd.xlane.f32.xlu1 %v2187_v26 }
 0x10a   : > { %6990 = vst [vmem:[#allocation34_spill] sm:$0xff] %v5387_v19  ;;  %v2154_v23 = vsel %vm1099_vm4, %v5387_v19, 0.0 }
 0x10d   : > { %2185 = vadd.xlane.f32.xlu0 %v2184_v33  ;;  %v2142_v33 = vsel %vm1099_vm4, %v5403_v21, 0.0 }
 0x10f   : > { %2146 = vadd.xlane.f32.xlu2 %v2145_v61 }
 0x110   : > { %4395 = vmatmul.msk.f32.gmra.mxu2 %vm1531_vm3, %v1504_v37  ;;  %v2196_v37 = vsel %vm1099_vm4, %v5409_v35, 0.0 }
 0x111   : > { %2143 = vadd.xlane.f32.xlu1 %v2142_v33  ;;  %v4639_v33 = vld [vmem:[%s5138_s22 + $0x48] sm:$0xff] }
 0x115   : > { %2140 = vadd.xlane.f32.xlu0 %v2139_v42  ;;  %v4638_v42 = vld [vmem:[%s5138_s22 + $0x40] sm:$0xff] }
 0x117   : > { %4290 = vmatmul.msk.bf16.gmra.mxu0 %vm1099_vm4, %v4618_v39  ;;  %2200 = vadd.xlane.f32.xlu2 %v2199_v15  ;;  %v4621_v39 = vld [vmem:[%s5133_s25 + $0x40] sm:$0xff] }
 0x118   : > { %4374 = vmatmul.msk.bf16.gmra.mxu1 %vm1099_vm4, %v4635_v41  ;;  %4396 = vmatmul.msk.f32.gmra.mxu2 %vm1531_vm3, %v1505_v48  ;;  %v5419_v41 = vld [vmem:[%s6849_s11] ss:$0 sm:$0xff] }
 0x119   : > { %2197 = vadd.xlane.f32.xlu1 %v2196_v37 }
 0x11d   : > { %2194 = vadd.xlane.f32.xlu0 %v2193_v58  ;;  %v1511_v58 = vld [vmem:[%s5128_s27 + $0x88] sm:$0xff] }
 0x11f   : > { %2155 = vadd.xlane.f32.xlu2 %v2154_v23  ;;  %v1512_v23 = vld [vmem:[%s5128_s27 + $0x90] sm:$0xff] }
 0x120   : > { %4397 = vmatmul.msk.f32.gmra.mxu2 %vm1531_vm3, %v1506_v63  ;;  %v2151_v63 = vsel %vm1099_vm4, %v5425_v53, 0.0 }
 0x121   : > { %2152 = vadd.xlane.f32.xlu1 %v2151_v63 }
 0x125   : > { %2149 = vadd.xlane.f32.xlu0 %v2148_v5 }
 0x127   : > { %4291 = vmatmul.msk.bf16.gmra.mxu0 %vm1099_vm4, %v4619_v0  ;;  %v5435_v0 = vld [vmem:[%s6851_s13] ss:$0 sm:$0xff] }
 0x128   : > { %4375 = vmatmul.msk.bf16.gmra.mxu1 %vm1099_vm4, %v4636_v2  ;;  %4398 = vmatmul.msk.f32.gmra.mxu2 %vm1531_vm3, %v1507_v12 }
 0x12d   : > { %2203 = vadd.xlane.f32.xlu0 %v2202_v13 }
 0x130   : > { %4399 = vmatmul.msk.f32.gmra.mxu2 %vm1531_vm3, %v1508_v22 }
 0x135   : > { %v5427_v54 = vpop.permute.xlu0 %1841 }
 0x137   : > { %4292 = vmatmul.msk.bf16.gmra.mxu0 %vm1099_vm4, %v4620_v28 }
 0x138   : > { %4376 = vmatmul.msk.bf16.gmra.mxu1 %vm1099_vm4, %v4637_v29  ;;  %4400 = vmatmul.msk.f32.gmra.mxu2 %vm1531_vm3, %v1509_v30  ;;  %v4622_v29 = vld [vmem:[%s5133_s25 + $0x48] sm:$0xff] }
 0x140   : > { %4401 = vmatmul.msk.f32.gmra.mxu2 %vm1531_vm3, %v1510_v36 }
 0x143   : > { %v1645_v43 = vpop.f32.mrf.mxu2 }
 0x144   : > { %v1157_v34 = vpop.f32.mrf.mxu0  ;;  %v1646_v51 = vadd.f32 %v5419_v41, %v1645_v43 }
 0x145   : > { %v1414_v45 = vpop.f32.mrf.mxu1 }
 0x146   : > { %v1741_v48 = vadd.f32 %v1414_v45, %v1157_v34  ;;  %v2352_v62 = vmul.f32 %v1646_v51, %v1157_v34 }
 0x147   : > { %4293 = vmatmul.msk.bf16.gmra.mxu0 %vm1099_vm4, %v4621_v39 }
 0x148   : > { %4377 = vmatmul.msk.bf16.gmra.mxu1 %vm1099_vm4, %v4638_v42  ;;  %v1773_v61 = vadd.f32 %v1741_v48, %v1646_v51  ;;  %4402 = vmatmul.msk.f32.gmra.mxu2 %vm1531_vm3, %v1511_v58  ;;  %v5439_v5 = vmul.f32 %v2352_v62, %v1414_v45  ;;  %v1513_v58 = vld [vmem:[%s5128_s27 + $0x98] sm:$0xff] }
 0x14a   : > { %vm1805_vm5 = vcmp.gt.f32.partialorder %v1773_v61, 0.0  ;;  %v1844_v59 = vmul.f32 %v5427_v54, %v1773_v61  ;;  %6995 = vst [vmem:[#allocation39_spill] sm:$0xff] %v5439_v5 }
 0x14b   : > { %v1648_v15 = vpop.f32.mrf.mxu2 }
 0x14c   : > { %v1159_v2 = vpop.f32.mrf.mxu0  ;;  %v1876_v12 = vsel %vm1805_vm5, %v1773_v61, %v1844_v59  ;;  %v1649_v18 = vadd.f32 %v5419_v41, %v1648_v15 }
 0x14d   : > { %v1416_v7 = vpop.f32.mrf.mxu1  ;;  %v1912_v16 = vmul.f32 %v5435_v0, %v1876_v12 }
 0x14e   : > { %v1742_v13 = vadd.f32 %v1416_v7, %v1159_v2  ;;  %v2353_v28 = vmul.f32 %v1649_v18, %v1159_v2 }
 0x14f   : > { %v1945_v22 = vsel %vm1944_vm6, %v1912_v16, 0.0 }
 0x150   : > { %v1774_v26 = vadd.f32 %v1742_v13, %v1649_v18  ;;  %1946 = vadd.xlane.f32.xlu0 %v1945_v22  ;;  %4403 = vmatmul.msk.f32.gmra.mxu2 %vm1531_vm3, %v1512_v23  ;;  %v5449_v37 = vmul.f32 %v2353_v28, %v1416_v7  ;;  %v1514_v23 = vld [vmem:[%s5128_s27 + $0xa0] sm:$0xff] }
 0x152   : > { %vm1806_vm7 = vcmp.gt.f32.partialorder %v1774_v26, 0.0  ;;  %v1845_v36 = vmul.f32 %v5427_v54, %v1774_v26  ;;  %6996 = vst [vmem:[#allocation40_spill] sm:$0xff] %v5449_v37 }
 0x153   : > { %v1651_v45 = vpop.f32.mrf.mxu2 }
 0x154   : > { %v1162_v30 = vpop.f32.mrf.mxu0  ;;  %v1877_v42 = vsel %vm1806_vm7, %v1774_v26, %v1845_v36  ;;  %v1652_v43 = vadd.f32 %v5419_v41, %v1651_v45 }
 0x155   : > { %v1419_v39 = vpop.f32.mrf.mxu1  ;;  %v1913_v48 = vmul.f32 %v5435_v0, %v1877_v42 }
 0x156   : > { %v1743_v34 = vadd.f32 %v1419_v39, %v1162_v30  ;;  %v2354_v62 = vmul.f32 %v1652_v43, %v1162_v30 }
 0x157   : > { %4294 = vmatmul.msk.bf16.gmra.mxu0 %vm1099_vm4, %v4622_v29  ;;  %v1948_v51 = vsel %vm1944_vm6, %v1913_v48, 0.0  ;;  %v4623_v29 = vld [vmem:[%s5133_s25 + $0x50] sm:$0xff] }
 0x158   : > { %4378 = vmatmul.msk.bf16.gmra.mxu1 %vm1099_vm4, %v4639_v33  ;;  %v1775_v61 = vadd.f32 %v1743_v34, %v1652_v43  ;;  %1949 = vadd.xlane.f32.xlu2 %v1948_v51  ;;  %v5459_v59 = vmul.f32 %v2354_v62, %v1419_v39  ;;  %v4640_v33 = vld [vmem:[%s5138_s22 + $0x50] sm:$0xff] }
 0x159   : > { %4404 = vmatmul.msk.f32.gmra.mxu2 %vm1531_vm3, %v1513_v58 }
 0x15a   : > { %vm1807_vm8 = vcmp.gt.f32.partialorder %v1775_v61, 0.0  ;;  %v1846_v2 = vmul.f32 %v5427_v54, %v1775_v61  ;;  %6997 = vst [vmem:[#allocation41_spill] sm:$0xff] %v5459_v59  ;;  %v4627_v59 = vld [vmem:[%s5133_s25 + $0x70] sm:$0xff] }
 0x15b   : > { %v1654_v15 = vpop.f32.mrf.mxu2 }
 0x15c   : > { %v1164_v63 = vpop.f32.mrf.mxu0  ;;  %v1878_v12 = vsel %vm1807_vm8, %v1775_v61, %v1846_v2  ;;  %v1655_v18 = vadd.f32 %v5419_v41, %v1654_v15  ;;  %v1515_v61 = vld [vmem:[%s5128_s27 + $0xa8] sm:$0xff] }
 0x15d   : > { %v1421_v7 = vpop.f32.mrf.mxu1  ;;  %v1914_v16 = vmul.f32 %v5435_v0, %v1878_v12 }
 0x15e   : > { %v1744_v13 = vadd.f32 %v1421_v7, %v1164_v63  ;;  %v2355_v28 = vmul.f32 %v1655_v18, %v1164_v63 }
 0x15f   : > { %v1951_v22 = vsel %vm1944_vm6, %v1914_v16, 0.0 }
 0x160   : > { %v1776_v26 = vadd.f32 %v1744_v13, %v1655_v18  ;;  %1952 = vadd.xlane.f32.xlu2 %v1951_v22  ;;  %v5469_v39 = vmul.f32 %v2355_v28, %v1421_v7  ;;  %v1516_v28 = vld [vmem:[%s5128_s27 + $0xb0] sm:$0xff] }
 0x161   : > { %4405 = vmatmul.msk.f32.gmra.mxu2 %vm1531_vm3, %v1514_v23 }
 0x162   : > { %vm1808_vm9 = vcmp.gt.f32.partialorder %v1776_v26, 0.0  ;;  %v1847_v36 = vmul.f32 %v5427_v54, %v1776_v26  ;;  %6998 = vst [vmem:[#allocation42_spill] sm:$0xff] %v5469_v39 }
 0x163   : > { %v1657_v48 = vpop.f32.mrf.mxu2 }
 0x164   : > { %v1167_v30 = vpop.f32.mrf.mxu0  ;;  %v1879_v45 = vsel %vm1808_vm9, %v1776_v26, %v1847_v36  ;;  %v1658_v51 = vadd.f32 %v5419_v41, %v1657_v48 }
 0x165   : > { %v1424_v34 = vpop.f32.mrf.mxu1  ;;  %v1915_v43 = vmul.f32 %v5435_v0, %v1879_v45 }
 0x166   : > { %v1745_v42 = vadd.f32 %v1424_v34, %v1167_v30  ;;  %v2356_v63 = vmul.f32 %v1658_v51, %v1167_v30 }
 0x167   : > { %4295 = vmatmul.msk.bf16.gmra.mxu0 %vm1099_vm4, %v4623_v29  ;;  %v1954_v58 = vsel %vm1944_vm6, %v1915_v43, 0.0 }
 0x168   : > { %4379 = vmatmul.msk.bf16.gmra.mxu1 %vm1099_vm4, %v4640_v33  ;;  %v1777_v62 = vadd.f32 %v1745_v42, %v1658_v51  ;;  %1955 = vadd.xlane.f32.xlu2 %v1954_v58  ;;  %v5479_v12 = vmul.f32 %v2356_v63, %v1424_v34  ;;  %v4624_v33 = vld [vmem:[%s5133_s25 + $0x58] sm:$0xff] }
 0x169   : > { %4406 = vmatmul.msk.f32.gmra.mxu2 %vm1531_vm3, %v1515_v61  ;;  %v4641_v34 = vld [vmem:[%s5138_s22 + $0x58] sm:$0xff] }
 0x16a   : > { %vm1809_vm10 = vcmp.gt.f32.partialorder %v1777_v62, 0.0  ;;  %v1848_v7 = vmul.f32 %v5427_v54, %v1777_v62  ;;  %6999 = vst [vmem:[#allocation43_spill] sm:$0xff] %v5479_v12 }
 0x16b   : > { %v1660_v13 = vpop.f32.mrf.mxu2 }
 0x16c   : > { %v1169_v2 = vpop.f32.mrf.mxu0  ;;  %v1880_v16 = vsel %vm1809_vm10, %v1777_v62, %v1848_v7  ;;  %v1661_v23 = vadd.f32 %v5419_v41, %v1660_v13  ;;  %v5493_v62 = vpop.xlane.xlu2 %2158  ;;  %v1517_v7 = vld [vmem:[%s5128_s27 + $0xb8] sm:$0xff] }
 0x16d   : > { %v1426_v15 = vpop.f32.mrf.mxu1  ;;  %v1916_v18 = vmul.f32 %v5435_v0, %v1880_v16 }
 0x16e   : > { %v1746_v22 = vadd.f32 %v1426_v15, %v1169_v2  ;;  %v2357_v30 = vmul.f32 %v1661_v23, %v1169_v2 }
 0x16f   : > { %v1957_v26 = vsel %vm1944_vm6, %v1916_v18, 0.0 }
 0x170   : > { %v1778_v29 = vadd.f32 %v1746_v22, %v1661_v23  ;;  %1958 = vadd.xlane.f32.xlu1 %v1957_v26  ;;  %v5489_v45 = vmul.f32 %v2357_v30, %v1426_v15 }
 0x171   : > { %4407 = vmatmul.msk.f32.gmra.mxu2 %vm1531_vm3, %v1516_v28 }
 0x172   : > { %vm1810_vm11 = vcmp.gt.f32.partialorder %v1778_v29, 0.0  ;;  %v1849_v42 = vmul.f32 %v5427_v54, %v1778_v29  ;;  %7000 = vst [vmem:[#allocation44_spill] sm:$0xff] %v5489_v45 }
 0x173   : > { %v1663_v58 = vpop.f32.mrf.mxu2 }
 0x174   : > { %v1172_v36 = vpop.f32.mrf.mxu0  ;;  %v1881_v51 = vsel %vm1810_vm11, %v1778_v29, %v1849_v42  ;;  %v1664_v63 = vadd.f32 %v5419_v41, %v1663_v58  ;;  %v5507_v42 = vpop.xlane.xlu2 %2113  ;;  %v4625_v58 = vld [vmem:[%s5133_s25 + $0x60] sm:$0xff] }
 0x175   : > { %v1429_v48 = vpop.f32.mrf.mxu1  ;;  %v1917_v61 = vmul.f32 %v5435_v0, %v1881_v51 }
 0x176   : > { %v1747_v43 = vadd.f32 %v1429_v48, %v1172_v36  ;;  %v2358_v16 = vmul.f32 %v1664_v63, %v1172_v36 }
 0x177   : > { %4296 = vmatmul.msk.bf16.gmra.mxu0 %vm1099_vm4, %v4624_v33  ;;  %v1960_v2 = vsel %vm1944_vm6, %v1917_v61, 0.0  ;;  %v4642_v61 = vld [vmem:[%s5138_s22 + $0x60] sm:$0xff] }
 0x178   : > { %4380 = vmatmul.msk.bf16.gmra.mxu1 %vm1099_vm4, %v4641_v34  ;;  %v1779_v15 = vadd.f32 %v1747_v43, %v1664_v63  ;;  %1961 = vadd.xlane.f32.xlu2 %v1960_v2  ;;  %v5501_v22 = vmul.f32 %v2358_v16, %v1429_v48  ;;  %v1518_v34 = vld [vmem:[%s5128_s27 + $0xc0] sm:$0xff] }
 0x179   : > { %4408 = vmatmul.msk.f32.gmra.mxu2 %vm1531_vm3, %v1517_v7 }
 0x17a   : > { %vm1811_vm12 = vcmp.gt.f32.partialorder %v1779_v15, 0.0  ;;  %v1850_v18 = vmul.f32 %v5427_v54, %v1779_v15  ;;  %7001 = vst [vmem:[#allocation45_spill] sm:$0xff] %v5501_v22  ;;  %v4626_v22 = vld [vmem:[%s5133_s25 + $0x68] sm:$0xff] }
 0x17b   : > { %v1666_v28 = vpop.f32.mrf.mxu2 }
 0x17c   : > { %v1174_v13 = vpop.f32.mrf.mxu0  ;;  %v1882_v26 = vsel %vm1811_vm12, %v1779_v15, %v1850_v18  ;;  %v1667_v33 = vadd.f32 %v5419_v41, %v1666_v28 }
 0x17d   : > { %v1431_v23 = vpop.f32.mrf.mxu1  ;;  %v1918_v29 = vmul.f32 %v5435_v0, %v1882_v26  ;;  %v5523_v26 = vpop.xlane.xlu1 %2110 }
 0x17e   : > { %v1748_v30 = vadd.f32 %v1431_v23, %v1174_v13  ;;  %v2359_v51 = vmul.f32 %v1667_v33, %v1174_v13 }
 0x17f   : > { %v1963_v36 = vsel %vm1944_vm6, %v1918_v29, 0.0  ;;  %v1519_v29 = vld [vmem:[%s5128_s27 + $0xc8] sm:$0xff] }
 0x180   : > { %v1780_v43 = vadd.f32 %v1748_v30, %v1667_v33  ;;  %1964 = vadd.xlane.f32.xlu0 %v1963_v36  ;;  %v5515_v2 = vmul.f32 %v2359_v51, %v1431_v23  ;;  %v5532_v33 = vpop.xlane.xlu2 %2116 }
 0x181   : > { %4409 = vmatmul.msk.f32.gmra.mxu2 %vm1531_vm3, %v1518_v34 }
 0x182   : > { %vm1812_vm13 = vcmp.gt.f32.partialorder %v1780_v43, 0.0  ;;  %v1851_v63 = vmul.f32 %v5427_v54, %v1780_v43  ;;  %7003 = vst [vmem:[#allocation47_spill] sm:$0xff] %v5515_v2 }
 0x183   : > { %v1669_v13 = vpop.f32.mrf.mxu2 }
 0x184   : > { %v5511_v48 = vpop.f32.mrf.mxu0  ;;  %v1883_v16 = vsel %vm1812_vm13, %v1780_v43, %v1851_v63  ;;  %v5526_v28 = vadd.f32 %v5419_v41, %v1669_v13  ;;  %v1520_v13 = vld [vmem:[%s5128_s27 + $0xd0] sm:$0xff] }
 0x185   : > { %7002 = vst [vmem:[#allocation46_spill] sm:$0xff] %v5511_v48  ;;  %v5517_v7 = vpop.f32.mrf.mxu1  ;;  %v1919_v18 = vmul.f32 %v5435_v0, %v1883_v16 }
 0x186   : > { %7004 = vst [vmem:[#allocation48_spill] sm:$0xff] %v5517_v7  ;;  %v1749_v15 = vadd.f32 %v5517_v7, %v5511_v48 }
 0x187   : > { %4297 = vmatmul.msk.bf16.gmra.mxu0 %vm1099_vm4, %v4625_v58  ;;  %7005 = vst [vmem:[#allocation49_spill] sm:$0xff] %v5526_v28  ;;  %v1966_v23 = vsel %vm1944_vm6, %v1919_v18, 0.0  ;;  %v5540_v18 = vpop.xlane.xlu1 %2161 }
 0x188   : > { %4381 = vmatmul.msk.bf16.gmra.mxu1 %vm1099_vm4, %v4642_v61  ;;  %v1781_v30 = vadd.f32 %v1749_v15, %v5526_v28  ;;  %1967 = vadd.xlane.f32.xlu1 %v1966_v23  ;;  %v5548_v45 = vpop.xlane.xlu2 %2119 }
 0x189   : > { %4410 = vmatmul.msk.f32.gmra.mxu2 %vm1531_vm3, %v1519_v29 }
 0x18a   : > { %vm1813_vm14 = vcmp.gt.f32.partialorder %v1781_v30, 0.0  ;;  %v1852_v34 = vmul.f32 %v5427_v54, %v1781_v30 }
 0x18b   : > { %v1672_v58 = vpop.f32.mrf.mxu2 }
 0x18c   : > { %v1179_v36 = vpop.f32.mrf.mxu0  ;;  %v1884_v51 = vsel %vm1813_vm14, %v1781_v30, %v1852_v34  ;;  %v1673_v16 = vadd.f32 %v5419_v41, %v1672_v58  ;;  %v4643_v34 = vld [vmem:[%s5138_s22 + $0x68] sm:$0xff] }
 0x18d   : > { %v1436_v43 = vpop.f32.mrf.mxu1  ;;  %v1920_v61 = vmul.f32 %v5435_v0, %v1884_v51 }
 0x18e   : > { %v1750_v63 = vadd.f32 %v1436_v43, %v1179_v36  ;;  %v2361_v29 = vmul.f32 %v1673_v16, %v1179_v36 }
 0x18f   : > { %v1969_v15 = vsel %vm1944_vm6, %v1920_v61, 0.0 }
 0x190   : > { %v1782_v23 = vadd.f32 %v1750_v63, %v1673_v16  ;;  %1970 = vadd.xlane.f32.xlu2 %v1969_v15  ;;  %v5546_v51 = vmul.f32 %v2361_v29, %v1436_v43  ;;  %v1521_v15 = vld [vmem:[%s5128_s27 + $0xd8] sm:$0xff]  ;;  %v5556_v29 = vpop.xlane.xlu1 %2164 }
 0x191   : > { %4411 = vmatmul.msk.f32.gmra.mxu2 %vm1531_vm3, %v1520_v13 }
 0x192   : > { %v1853_v2 = vmul.f32 %v5427_v54, %v1782_v23  ;;  %vm1814_vm15 = vcmp.gt.f32.partialorder %v1782_v23, 0.0  ;;  %7006 = vst [vmem:[#allocation50_spill] sm:$0xff] %v5546_v51  ;;  %v1522_v51 = vld [vmem:[%s5128_s27 + $0xe0] sm:$0xff] }
 0x193   : > { %v1675_v39 = vpop.f32.mrf.mxu2 }
 0x194   : > { %v1182_v30 = vpop.f32.mrf.mxu0  ;;  %v1885_v7 = vsel %vm1814_vm15, %v1782_v23, %v1853_v2  ;;  %v1676_v63 = vadd.f32 %v5419_v41, %v1675_v39 }
 0x195   : > { %v1439_v58 = vpop.f32.mrf.mxu1  ;;  %v1921_v36 = vmul.f32 %v5435_v0, %v1885_v7 }
 0x196   : > { %v1751_v61 = vadd.f32 %v1439_v58, %v1182_v30  ;;  %v2362_v43 = vmul.f32 %v1676_v63, %v1182_v30  ;;  %v5563_v30 = vpop.xlane.xlu2 %2173 }
 0x197   : > { %4298 = vmatmul.msk.bf16.gmra.mxu0 %vm1099_vm4, %v4626_v22  ;;  %v1972_v16 = vsel %vm1944_vm6, %v1921_v36, 0.0 }
 0x198   : > { %4382 = vmatmul.msk.bf16.gmra.mxu1 %vm1099_vm4, %v4643_v34  ;;  %v1783_v13 = vadd.f32 %v1751_v61, %v1676_v63  ;;  %1973 = vadd.xlane.f32.xlu0 %v1972_v16  ;;  %v5560_v7 = vmul.f32 %v2362_v43, %v1439_v58  ;;  %v4644_v43 = vld [vmem:[%s5138_s22 + $0x70] sm:$0xff] }
 0x199   : > { %4412 = vmatmul.msk.f32.gmra.mxu2 %vm1531_vm3, %v1521_v15 }
 0x19a   : > { %v1854_v2 = vmul.f32 %v5427_v54, %v1783_v13  ;;  %vm1815_vm0 = vcmp.gt.f32.partialorder %v1783_v13, 0.0  ;;  %7007 = vst [vmem:[#allocation51_spill] sm:$0xff] %v5560_v7 }
 0x19b   : > { %v1678_v34 = vpop.f32.mrf.mxu2 }
 0x19c   : > { %v1184_v22 = vpop.f32.mrf.mxu0  ;;  %v1886_v23 = vsel %vm1815_vm0, %v1783_v13, %v1854_v2  ;;  %v1679_v63 = vadd.f32 %v5419_v41, %v1678_v34 }
 0x19d   : > { %v1441_v39 = vpop.f32.mrf.mxu1  ;;  %v1922_v61 = vmul.f32 %v5435_v0, %v1886_v23  ;;  %v5574_v23 = vpop.xlane.xlu1 %2170 }
 0x19e   : > { %v1752_v36 = vadd.f32 %v1441_v39, %v1184_v22  ;;  %v2363_v12 = vmul.f32 %v1679_v63, %v1184_v22 }
 0x19f   : > { %v1975_v16 = vsel %vm1944_vm6, %v1922_v61, 0.0 }
 0x1a0   : > { %v1784_v15 = vadd.f32 %v1752_v36, %v1679_v63  ;;  %1976 = vadd.xlane.f32.xlu1 %v1975_v16  ;;  %v5572_v2 = vmul.f32 %v2363_v12, %v1441_v39  ;;  %v1523_v63 = vld [vmem:[%s5128_s27 + $0xe8] sm:$0xff]  ;;  %v5582_v16 = vpop.xlane.xlu2 %2128 }
 0x1a1   : > { %4413 = vmatmul.msk.f32.gmra.mxu2 %vm1531_vm3, %v1522_v51 }
 0x1a2   : > { %v1855_v58 = vmul.f32 %v5427_v54, %v1784_v15  ;;  %vm1816_vm1 = vcmp.gt.f32.partialorder %v1784_v15, 0.0  ;;  %7008 = vst [vmem:[#allocation52_spill] sm:$0xff] %v5572_v2  ;;  %v1524_v2 = vld [vmem:[%s5128_s27 + $0xf0] sm:$0xff] }
 0x1a3   : > { %v1681_v28 = vpop.f32.mrf.mxu2 }
 0x1a4   : > { %v1187_v13 = vpop.f32.mrf.mxu0  ;;  %v1887_v61 = vsel %vm1816_vm1, %v1784_v15, %v1855_v58  ;;  %v1682_v36 = vadd.f32 %v5419_v41, %v1681_v28 }
 0x1a5   : > { %v1444_v34 = vpop.f32.mrf.mxu1  ;;  %v1923_v22 = vmul.f32 %v5435_v0, %v1887_v61  ;;  %v5588_v61 = vpop.xlane.xlu1 %2125 }
 0x1a6   : > { %v1753_v7 = vadd.f32 %v1444_v34, %v1187_v13  ;;  %v2364_v39 = vmul.f32 %v1682_v36, %v1187_v13 }
 0x1a7   : > { %4299 = vmatmul.msk.bf16.gmra.mxu0 %vm1099_vm4, %v4627_v59  ;;  %v1978_v51 = vsel %vm1944_vm6, %v1923_v22, 0.0 }
 0x1a8   : > { %4383 = vmatmul.msk.bf16.gmra.mxu1 %vm1099_vm4, %v4644_v43  ;;  %v1785_v12 = vadd.f32 %v1753_v7, %v1682_v36  ;;  %1979 = vadd.xlane.f32.xlu2 %v1978_v51  ;;  %v5586_v58 = vmul.f32 %v2364_v39, %v1444_v34  ;;  %v5592_v51 = vpop.xlane.xlu0 %2167  ;;  %v4628_v34 = vld [vmem:[%s5133_s25 + $0x78] sm:$0xff]  ;;  %v5597_v39 = vpop.xlane.xlu2 %2182 }
 0x1a9   : > { %4414 = vmatmul.msk.f32.gmra.mxu2 %vm1531_vm3, %v1523_v63  ;;  %7010 = vst [vmem:[#allocation54_spill] sm:$0xff] %v5597_v39 }
 0x1aa   : > { %v1856_v15 = vmul.f32 %v5427_v54, %v1785_v12  ;;  %vm1817_vm2 = vcmp.gt.f32.partialorder %v1785_v12, 0.0  ;;  %7009 = vst [vmem:[#allocation53_spill] sm:$0xff] %v5586_v58 }
 0x1ab   : > { %v1684_v22 = vpop.f32.mrf.mxu2 }
 0x1ac   : > { %v1189_v59 = vpop.f32.mrf.mxu0  ;;  %v1888_v43 = vsel %vm1817_vm2, %v1785_v12, %v1856_v15  ;;  %v1685_v36 = vadd.f32 %v5419_v41, %v1684_v22 }
 0x1ad   : > { %v1446_v28 = vpop.f32.mrf.mxu1  ;;  %v1924_v7 = vmul.f32 %v5435_v0, %v1888_v43  ;;  %v4645_v43 = vld [vmem:[%s5138_s22 + $0x78] sm:$0xff] }
 0x1ae   : > { %v1754_v13 = vadd.f32 %v1446_v28, %v1189_v59  ;;  %v2365_v37 = vmul.f32 %v1685_v36, %v1189_v59 }
 0x1af   : > { %v1981_v63 = vsel %vm1944_vm6, %v1924_v7, 0.0 }
 0x1b0   : > { %v1786_v48 = vadd.f32 %v1754_v13, %v1685_v36  ;;  %1982 = vadd.xlane.f32.xlu0 %v1981_v63  ;;  %v5602_v22 = vmul.f32 %v2365_v37, %v1446_v28  ;;  %v5608_v36 = vpop.xlane.xlu1 %2179  ;;  %v1525_v63 = vld [vmem:[%s5128_s27 + $0xf8] sm:$0xff]  ;;  %v5612_v28 = vpop.xlane.xlu0 %2122 }
 0x1b1   : > { %4415 = vmatmul.msk.f32.gmra.mxu2 %vm1531_vm3, %v1524_v2 }
 0x1b2   : > { %v1857_v12 = vmul.f32 %v5427_v54, %v1786_v48  ;;  %vm1818_vm5 = vcmp.gt.f32.partialorder %v1786_v48, 0.0  ;;  %7011 = vst [vmem:[#allocation55_spill] sm:$0xff] %v5602_v22 }
 0x1b3   : > { %v1687_v14 = vpop.f32.mrf.mxu2 }
 0x1b4   : > { %v1192_v15 = vpop.f32.mrf.mxu0  ;;  %v1889_v7 = vsel %vm1818_vm5, %v1786_v48, %v1857_v12  ;;  %v1688_v13 = vadd.f32 %v5419_v41, %v1687_v14 }
 0x1b5   : > { %v1449_v58 = vpop.f32.mrf.mxu1  ;;  %v1925_v59 = vmul.f32 %v5435_v0, %v1889_v7 }
 0x1b6   : > { %v1755_v5 = vadd.f32 %v1449_v58, %v1192_v15  ;;  %v2366_v37 = vmul.f32 %v1688_v13, %v1192_v15 }
 0x1b7   : > { %4300 = vmatmul.msk.bf16.gmra.mxu0 %vm1099_vm4, %v4628_v34  ;;  %v1984_v2 = vsel %vm1944_vm6, %v1925_v59, 0.0 }
 0x1b8   : > { %4384 = vmatmul.msk.bf16.gmra.mxu1 %vm1099_vm4, %v4645_v43  ;;  %v1787_v19 = vadd.f32 %v1755_v5, %v1688_v13  ;;  %1985 = vadd.xlane.f32.xlu1 %v1984_v2  ;;  %v5616_v12 = vmul.f32 %v2366_v37, %v1449_v58  ;;  %v5618_v43 = vpop.xlane.xlu2 %2137 }
 0x1b9   : > { %4416 = vmatmul.msk.f32.gmra.mxu2 %vm1531_vm3, %v1525_v63  ;;  %v5623_v63 = vpop.xlane.xlu1 %2134 }
 0x1ba   : > { %v1858_v48 = vmul.f32 %v5427_v54, %v1787_v19  ;;  %vm1819_vm7 = vcmp.gt.f32.partialorder %v1787_v19, 0.0  ;;  %7012 = vst [vmem:[#allocation56_spill] sm:$0xff] %v5616_v12 }
 0x1bb   : > { %v1690_v22 = vpop.f32.mrf.mxu2 }
 0x1bc   : > { %v1194_v34 = vpop.f32.mrf.mxu0  ;;  %v1890_v7 = vsel %vm1819_vm7, %v1787_v19, %v1858_v48  ;;  %v1691_v15 = vadd.f32 %v5419_v41, %v1690_v22  ;;  %v5628_v19 = vpop.xlane.xlu0 %2176 }
 0x1bd   : > { %v1451_v14 = vpop.f32.mrf.mxu1  ;;  %v1926_v59 = vmul.f32 %v5435_v0, %v1890_v7 }
 0x1be   : > { %v1756_v5 = vadd.f32 %v1451_v14, %v1194_v34  ;;  %v2367_v8 = vmul.f32 %v1691_v15, %v1194_v34 }
 0x1bf   : > { %v1987_v13 = vsel %vm1944_vm6, %v1926_v59, 0.0 }
 0x1c0   : > { %v1788_v2 = vadd.f32 %v1756_v5, %v1691_v15  ;;  %1988 = vadd.xlane.f32.xlu2 %v1987_v13  ;;  %v5626_v12 = vmul.f32 %v2367_v8, %v1451_v14  ;;  %v5631_v59 = vpop.xlane.xlu2 %2191 }
 0x1c1   : > { %7014 = vst [vmem:[#allocation58_spill] sm:$0xff] %v5631_v59  ;;  %v5638_v1 = vpop.xlane.xlu1 %2188 }
 0x1c2   : > { %v1859_v58 = vmul.f32 %v5427_v54, %v1788_v2  ;;  %vm1820_vm3 = vcmp.gt.f32.partialorder %v1788_v2, 0.0  ;;  %7013 = vst [vmem:[#allocation57_spill] sm:$0xff] %v5626_v12 }
 0x1c3   : > { %v1693_v35 = vpop.f32.mrf.mxu2  ;;  %7016 = vst [vmem:[#allocation60_spill] sm:$0xff] %v5638_v1 }
 0x1c4   : > { %v1197_v37 = vpop.f32.mrf.mxu0  ;;  %v1891_v53 = vsel %vm1820_vm3, %v1788_v2, %v1859_v58  ;;  %v1694_v34 = vadd.f32 %v5419_v41, %v1693_v35 }
 0x1c5   : > { %v1454_v48 = vpop.f32.mrf.mxu1  ;;  %v1927_v22 = vmul.f32 %v5435_v0, %v1891_v53  ;;  %v5640_v53 = vpop.xlane.xlu0 %2131 }
 0x1c6   : > { %v1757_v7 = vadd.f32 %v1454_v48, %v1197_v37  ;;  %v2368_v13 = vmul.f32 %v1694_v34, %v1197_v37  ;;  %vm2212_vm15 = vcmp.gt.f32.partialorder %v5640_v53, 0.0 }
 0x1c7   : > { %v1990_v5 = vsel %vm1944_vm6, %v1927_v22, 0.0 }
 0x1c8   : > { %v1789_v15 = vadd.f32 %v1757_v7, %v1694_v34  ;;  %1991 = vadd.xlane.f32.xlu0 %v1990_v5  ;;  %v5636_v12 = vmul.f32 %v2368_v13, %v1454_v48  ;;  %v5645_v22 = vpop.xlane.xlu2 %2146 }
 0x1ca   : > { %v1860_v8 = vmul.f32 %v5427_v54, %v1789_v15  ;;  %vm1821_vm8 = vcmp.gt.f32.partialorder %v1789_v15, 0.0  ;;  %7015 = vst [vmem:[#allocation59_spill] sm:$0xff] %v5636_v12 }
 0x1cb   : > { %v1696_v49 = vpop.f32.mrf.mxu2 }
 0x1cc   : > { %v1199_v14 = vpop.f32.mrf.mxu0  ;;  %v1892_v58 = vsel %vm1821_vm8, %v1789_v15, %v1860_v8  ;;  %v1697_v7 = vadd.f32 %v5419_v41, %v1696_v49 }
 0x1cd   : > { %v1456_v2 = vpop.f32.mrf.mxu1  ;;  %v1928_v35 = vmul.f32 %v5435_v0, %v1892_v58  ;;  %v5650_v58 = vpop.xlane.xlu1 %2143 }
 0x1ce   : > { %v1758_v57 = vadd.f32 %v1456_v2, %v1199_v14  ;;  %v2369_v5 = vmul.f32 %v1697_v7, %v1199_v14  ;;  %v5654_v20 = vpop.xlane.xlu0 %2185  ;;  %vm2216_vm3 = vcmp.gt.f32.partialorder %v5650_v58, 0.0 }
 0x1cf   : > { %v1993_v37 = vsel %vm1944_vm6, %v1928_v35, 0.0  ;;  %7018 = vst [vmem:[#allocation62_spill] sm:$0xff] %v5654_v20 }
 0x1d0   : > { %v1790_v34 = vadd.f32 %v1758_v57, %v1697_v7  ;;  %1994 = vadd.xlane.f32.xlu1 %v1993_v37  ;;  %v5648_v15 = vmul.f32 %v2369_v5, %v1456_v2  ;;  %v5657_v37 = vpop.xlane.xlu2 %2200 }
 0x1d1   : > { %7019 = vst [vmem:[#allocation63_spill] sm:$0xff] %v5657_v37 }
 0x1d2   : > { %v1861_v48 = vmul.f32 %v5427_v54, %v1790_v34  ;;  %vm1822_vm9 = vcmp.gt.f32.partialorder %v1790_v34, 0.0  ;;  %7017 = vst [vmem:[#allocation61_spill] sm:$0xff] %v5648_v15 }
 0x1d3   : > { %v1699_v21 = vpop.f32.mrf.mxu2 }
 0x1d4   : > { %v1202_v13 = vpop.f32.mrf.mxu0  ;;  %v1893_v46 = vsel %vm1822_vm9, %v1790_v34, %v1861_v48  ;;  %v1700_v35 = vadd.f32 %v5419_v41, %v1699_v21  ;;  %vm2217_vm9 = vcmp.gt.f32.partialorder %v5645_v22, 0.0 }
 0x1d5   : > { %v1459_v8 = vpop.f32.mrf.mxu1  ;;  %v1929_v49 = vmul.f32 %v5435_v0, %v1893_v46 }
 0x1d6   : > { %v1759_v12 = vadd.f32 %v1459_v8, %v1202_v13  ;;  %v2370_v7 = vmul.f32 %v1700_v35, %v1202_v13 }
 0x1d7   : > { %v1996_v57 = vsel %vm1944_vm6, %v1929_v49, 0.0  ;;  %v5664_v49 = vpop.xlane.xlu1 %2197 }
 0x1d8   : > { %v1791_v14 = vadd.f32 %v1759_v12, %v1700_v35  ;;  %1997 = vadd.xlane.f32.xlu1 %v1996_v57  ;;  %v5660_v34 = vmul.f32 %v2370_v7, %v1459_v8  ;;  %7021 = vst [vmem:[#allocation65_spill] sm:$0xff] %v5664_v49  ;;  %v5667_v57 = vpop.xlane.xlu0 %2140 }
 0x1d9   : > { %vm2215_vm5 = vcmp.gt.f32.partialorder %v5667_v57, 0.0 }
 0x1da   : > { %v1862_v2 = vmul.f32 %v5427_v54, %v1791_v14  ;;  %vm1823_vm10 = vcmp.gt.f32.partialorder %v1791_v14, 0.0  ;;  %7020 = vst [vmem:[#allocation64_spill] sm:$0xff] %v5660_v34 }
 0x1dc   : > { %v1204_v5 = vpop.f32.mrf.mxu0  ;;  %v1894_v15 = vsel %vm1823_vm10, %v1791_v14, %v1862_v2  ;;  %v1702_v46 = vpop.f32.mrf.mxu2 }
 0x1dd   : > { %v1461_v48 = vpop.f32.mrf.mxu1  ;;  %v1930_v21 = vmul.f32 %v5435_v0, %v1894_v15  ;;  %v1703_v27 = vadd.f32 %v5419_v41, %v1702_v46  ;;  %v5672_v15 = vpop.xlane.xlu2 %2155 }
 0x1de   : > { %v1760_v38 = vadd.f32 %v1461_v48, %v1204_v5 }
 0x1df   : > { %v1999_v12 = vsel %vm1944_vm6, %v1930_v21, 0.0  ;;  %v2371_v35 = vmul.f32 %v1703_v27, %v1204_v5 }
 0x1e0   : > { %v1792_v13 = vadd.f32 %v1760_v38, %v1703_v27  ;;  %2000 = vadd.xlane.f32.xlu1 %v1999_v12  ;;  %v5677_v12 = vpop.xlane.xlu1 %2152  ;;  %v5682_v32 = vpop.xlane.xlu0 %2194 }
 0x1e1   : > { %v5670_v14 = vmul.f32 %v2371_v35, %v1461_v48  ;;  %7024 = vst [vmem:[#allocation68_spill] sm:$0xff] %v5682_v32 }
 0x1e2   : > { %v1863_v8 = vmul.f32 %v5427_v54, %v1792_v13  ;;  %vm1824_vm11 = vcmp.gt.f32.partialorder %v1792_v13, 0.0 }
 0x1e3   : > { %7022 = vst [vmem:[#allocation66_spill] sm:$0xff] %v5670_v14 }
 0x1e4   : > { %v1207_v7 = vpop.f32.mrf.mxu0  ;;  %v1895_v46 = vsel %vm1824_vm11, %v1792_v13, %v1863_v8  ;;  %v1705_v37 = vpop.f32.mrf.mxu2 }
 0x1e5   : > { %v1464_v2 = vpop.f32.mrf.mxu1  ;;  %v1931_v49 = vmul.f32 %v5435_v0, %v1895_v46  ;;  %v1706_v38 = vadd.f32 %v5419_v41, %v1705_v37  ;;  %v5685_v59 = vpop.xlane.xlu2 %1949 }
 0x1e6   : > { %v1761_v34 = vadd.f32 %v1464_v2, %v1207_v7 }
 0x1e7   : > { %v2002_v27 = vsel %vm1944_vm6, %v1931_v49, 0.0  ;;  %v2372_v21 = vmul.f32 %v1706_v38, %v1207_v7 }
 0x1e8   : > { %v1793_v5 = vadd.f32 %v1761_v34, %v1706_v38  ;;  %2003 = vadd.xlane.f32.xlu1 %v2002_v27  ;;  %v5694_v24 = vpop.xlane.xlu0 %2149 }
 0x1e9   : > { %v5680_v14 = vmul.f32 %v2372_v21, %v1464_v2  ;;  %vm2218_vm11 = vcmp.gt.f32.partialorder %v5694_v24, 0.0 }
 0x1ea   : > { %v1864_v48 = vmul.f32 %v5427_v54, %v1793_v5  ;;  %vm1825_vm12 = vcmp.gt.f32.partialorder %v1793_v5, 0.0 }
 0x1eb   : > { %7023 = vst [vmem:[#allocation67_spill] sm:$0xff] %v5680_v14 }
 0x1ec   : > { %v1209_v35 = vpop.f32.mrf.mxu0  ;;  %v1896_v8 = vsel %vm1825_vm12, %v1793_v5, %v1864_v48  ;;  %v1708_v46 = vpop.f32.mrf.mxu2 }
 0x1ed   : > { %v1466_v13 = vpop.f32.mrf.mxu1  ;;  %v1932_v37 = vmul.f32 %v5435_v0, %v1896_v8  ;;  %v1709_v49 = vadd.f32 %v5419_v41, %v1708_v46  ;;  %v5692_v5 = vpop.xlane.xlu1 %1958 }
 0x1ee   : > { %v1762_v34 = vadd.f32 %v1466_v13, %v1209_v35 }
 0x1ef   : > { %v2005_v7 = vsel %vm1944_vm6, %v1932_v37, 0.0  ;;  %v2373_v27 = vmul.f32 %v1709_v49, %v1209_v35 }
 0x1f0   : > { %v1794_v38 = vadd.f32 %v1762_v34, %v1709_v49  ;;  %2006 = vadd.xlane.f32.xlu2 %v2005_v7  ;;  %v5699_v34 = vpop.xlane.xlu2 %1952  ;;  %v5712_v56 = vpop.xlane.xlu0 %2203 }
 0x1f1   : > { %v5690_v14 = vmul.f32 %v2373_v27, %v1466_v13  ;;  %v5701_v13 = vld [vmem:[#allocation11] ss:$0 sm:$0xff]  ;;  %7027 = vst [vmem:[#allocation71_spill] sm:$0xff] %v5712_v56 }
 0x1f2   : > { %v1865_v2 = vmul.f32 %v5427_v54, %v1794_v38  ;;  %vm1826_vm13 = vcmp.gt.f32.partialorder %v1794_v38, 0.0 }
 0x1f3   : > { %7025 = vst [vmem:[#allocation69_spill] sm:$0xff] %v5690_v14 }
 0x1f4   : > { %v1212_v21 = vpop.f32.mrf.mxu0  ;;  %v1897_v32 = vsel %vm1826_vm13, %v1794_v38, %v1865_v2  ;;  %v1711_v9 = vpop.f32.mrf.mxu2  ;;  %vm2219_vm13 = vcmp.gt.f32.partialorder %v5677_v12, 0.0 }
 0x1f5   : > { %v1469_v48 = vpop.f32.mrf.mxu1  ;;  %v1933_v46 = vmul.f32 %v5435_v0, %v1897_v32  ;;  %v1712_v37 = vadd.f32 %v5419_v41, %v1711_v9 }
 0x1f6   : > { %v1763_v8 = vadd.f32 %v1469_v48, %v1212_v21 }
 0x1f7   : > { %v2008_v35 = vsel %vm1944_vm6, %v1933_v46, 0.0  ;;  %v2374_v7 = vmul.f32 %v1712_v37, %v1212_v21 }
 0x1f8   : > { %v1795_v49 = vadd.f32 %v1763_v8, %v1712_v37  ;;  %2009 = vadd.xlane.f32.xlu0 %v2008_v35  ;;  %v5715_v53 = vpop.xlane.xlu2 %1955 }
 0x1f9   : > { %v5704_v38 = vmul.f32 %v2374_v7, %v1469_v48 }
 0x1fa   : > { %v1866_v27 = vmul.f32 %v5427_v54, %v1795_v49  ;;  %vm1827_vm14 = vcmp.gt.f32.partialorder %v1795_v49, 0.0 }
 0x1fb   : > { %7026 = vst [vmem:[#allocation70_spill] sm:$0xff] %v5704_v38  ;;  %v1968_v2 = vpop.xlane.xlu1 %1967 }
 0x1fc   : > { %v1214_v14 = vpop.f32.mrf.mxu0  ;;  %v2052_v9 = vadd.f32 %v5701_v13, %v1968_v2  ;;  %v1898_v46 = vsel %vm1827_vm14, %v1795_v49, %v1866_v27  ;;  %v1714_v1 = vpop.f32.mrf.mxu2 }
 0x1fd   : > { %v1471_v32 = vpop.f32.mrf.mxu1  ;;  %v1934_v8 = vmul.f32 %v5435_v0, %v1898_v46  ;;  %v1715_v37 = vadd.f32 %v5419_v41, %v1714_v1 }
 0x1fe   : > { %v1764_v21 = vadd.f32 %v1471_v32, %v1214_v14  ;;  %v5710_v35 = vsel %vm2212_vm15, %v2052_v9, -1e+30  ;;  %vm2220_vm15 = vcmp.gt.f32.partialorder %v5672_v15, 0.0 }
 0x1ff   : > { %v2011_v48 = vsel %vm1944_vm6, %v1934_v8, 0.0  ;;  %v2375_v38 = vmul.f32 %v1715_v37, %v1214_v14 }
 0x200   : > { %v1796_v7 = vadd.f32 %v1764_v21, %v1715_v37  ;;  %2012 = vadd.xlane.f32.xlu1 %v2011_v48  ;;  %v5723_v37 = vpop.xlane.xlu0 %1946  ;;  %v5725_v48 = vpop.xlane.xlu2 %1961 }
 0x201   : > { %v5718_v27 = vmul.f32 %v2375_v38, %v1471_v32 }
 0x202   : > { %v1867_v2 = vmul.f32 %v5427_v54, %v1796_v7  ;;  %vm1828_vm0 = vcmp.gt.f32.partialorder %v1796_v7, 0.0 }
 0x203   : > { %7028 = vst [vmem:[#allocation72_spill] sm:$0xff] %v5718_v27 }
 0x204   : > { %v1217_v49 = vpop.f32.mrf.mxu0  ;;  %v1899_v1 = vsel %vm1828_vm0, %v1796_v7, %v1867_v2  ;;  %v1717_v9 = vpop.f32.mrf.mxu2 }
 0x205   : > { %v1474_v46 = vpop.f32.mrf.mxu1  ;;  %v1935_v20 = vmul.f32 %v5435_v0, %v1899_v1  ;;  %v1718_v56 = vadd.f32 %v5419_v41, %v1717_v9 }
 0x206   : > { %v1765_v17 = vadd.f32 %v1474_v46, %v1217_v49 }
 0x207   : > { %v2014_v8 = vsel %vm1944_vm6, %v1935_v20, 0.0  ;;  %v2376_v21 = vmul.f32 %v1718_v56, %v1217_v49 }
 0x208   : > { %v1797_v14 = vadd.f32 %v1765_v17, %v1718_v56  ;;  %2015 = vadd.xlane.f32.xlu2 %v2014_v8  ;;  %v5733_v8 = vpop.xlane.xlu0 %1964  ;;  %v5735_v11 = vpop.xlane.xlu2 %1970 }
 0x209   : > { %v5728_v27 = vmul.f32 %v2376_v21, %v1474_v46 }
 0x20a   : > { %v1868_v38 = vmul.f32 %v5427_v54, %v1797_v14  ;;  %vm1829_vm1 = vcmp.gt.f32.partialorder %v1797_v14, 0.0 }
 0x20b   : > { %7029 = vst [vmem:[#allocation73_spill] sm:$0xff] %v5728_v27 }
 0x20c   : > { %v1219_v32 = vpop.f32.mrf.mxu0  ;;  %v1900_v2 = vsel %vm1829_vm1, %v1797_v14, %v1868_v38  ;;  %v1720_v1 = vpop.f32.mrf.mxu2  ;;  %vm2205_vm1 = vcmp.gt.f32.partialorder %v5523_v26, 0.0  ;;  %v2047_v26 = vadd.f32 %v5701_v13, %v5699_v34 }
 0x20d   : > { %v1476_v7 = vpop.f32.mrf.mxu1  ;;  %v1936_v9 = vmul.f32 %v5435_v0, %v1900_v2  ;;  %v1721_v17 = vadd.f32 %v5419_v41, %v1720_v1 }
 0x20e   : > { %v1766_v6 = vadd.f32 %v1476_v7, %v1219_v32 }
 0x20f   : > { %v2017_v56 = vsel %vm1944_vm6, %v1936_v9, 0.0  ;;  %v2377_v49 = vmul.f32 %v1721_v17, %v1219_v32 }
 0x210   : > { %v1798_v20 = vadd.f32 %v1766_v6, %v1721_v17  ;;  %2018 = vadd.xlane.f32.xlu0 %v2017_v56 }
 0x211   : > { %v5738_v14 = vmul.f32 %v2377_v49, %v1476_v7  ;;  %v5747_v49 = vpop.xlane.xlu0 %1973 }
 0x212   : > { %v1869_v46 = vmul.f32 %v5427_v54, %v1798_v20  ;;  %vm1830_vm2 = vcmp.gt.f32.partialorder %v1798_v20, 0.0 }
 0x213   : > { %7030 = vst [vmem:[#allocation74_spill] sm:$0xff] %v5738_v14  ;;  %v1977_v2 = vpop.xlane.xlu1 %1976 }
 0x214   : > { %v1222_v21 = vpop.f32.mrf.mxu0  ;;  %v2055_v1 = vadd.f32 %v5701_v13, %v1977_v2  ;;  %v1901_v6 = vsel %vm1830_vm2, %v1798_v20, %v1869_v46  ;;  %v1723_v32 = vpop.f32.mrf.mxu2  ;;  %vm2206_vm2 = vcmp.gt.f32.partialorder %v5507_v42, 0.0 }
 0x215   : > { %v1479_v38 = vpop.f32.mrf.mxu1  ;;  %v1937_v17 = vmul.f32 %v5435_v0, %v1901_v6  ;;  %v1724_v56 = vadd.f32 %v5419_v41, %v1723_v32 }
 0x216   : > { %v1767_v9 = vadd.f32 %v1479_v38, %v1222_v21  ;;  %v5744_v27 = vsel %vm2215_vm5, %v2055_v1, -1e+30  ;;  %vm2207_vm5 = vcmp.gt.f32.partialorder %v5532_v33, 0.0 }
 0x217   : > { %7031 = vst [vmem:[#allocation75_spill] sm:$0xff] %v5744_v27  ;;  %v2020_v39 = vsel %vm1944_vm6, %v1937_v17, 0.0  ;;  %v2378_v7 = vmul.f32 %v1724_v56, %v1222_v21 }
 0x218   : > { %v1799_v3 = vadd.f32 %v1767_v9, %v1724_v56  ;;  %2021 = vadd.xlane.f32.xlu1 %v2020_v39 }
 0x219   : > { %v5750_v2 = vmul.f32 %v2378_v7, %v1479_v38 }
 0x21a   : > { %v1870_v57 = vmul.f32 %v5427_v54, %v1799_v3  ;;  %vm1831_vm7 = vcmp.gt.f32.partialorder %v1799_v3, 0.0 }
 0x21b   : > { %7032 = vst [vmem:[#allocation76_spill] sm:$0xff] %v5750_v2  ;;  %v1980_v46 = vpop.xlane.xlu2 %1979 }
 0x21c   : > { %v1224_v14 = vpop.f32.mrf.mxu0  ;;  %v2056_v1 = vadd.f32 %v5701_v13, %v1980_v46  ;;  %v1902_v6 = vsel %vm1831_vm7, %v1799_v3, %v1870_v57  ;;  %v1726_v32 = vpop.f32.mrf.mxu2  ;;  %vm2222_vm7 = vcmp.gt.f32.partialorder %v5540_v18, 0.0 }
 0x21d   : > { %v1481_v20 = vpop.f32.mrf.mxu1  ;;  %v1938_v9 = vmul.f32 %v5435_v0, %v1902_v6  ;;  %v1727_v39 = vadd.f32 %v5419_v41, %v1726_v32 }
 0x21e   : > { %v1768_v21 = vadd.f32 %v1481_v20, %v1224_v14  ;;  %v5756_v17 = vsel %vm2216_vm3, %v2056_v1, -1e+30  ;;  %vm2208_vm3 = vcmp.gt.f32.partialorder %v5548_v45, 0.0  ;;  %v4770_v45 = vpack.i.bf16 %v5195_v40, %v5252_v4 }
 0x21f   : > { %v2023_v56 = vsel %vm1944_vm6, %v1938_v9, 0.0  ;;  %v2379_v38 = vmul.f32 %v1727_v39, %v1224_v14  ;;  %v4884_v14 = vld [vmem:[%s6849_s11] ss:$0 sm:$0xff] }
 0x220   : > { %v1800_v27 = vadd.f32 %v1768_v21, %v1727_v39  ;;  %2024 = vadd.xlane.f32.xlu2 %v2023_v56 }
 0x221   : > { %v5760_v2 = vmul.f32 %v2379_v38, %v1481_v20 }
 0x222   : > { %v1871_v58 = vmul.f32 %v5427_v54, %v1800_v27  ;;  %vm1832_vm8 = vcmp.gt.f32.partialorder %v1800_v27, 0.0 }
 0x223   : > { %7033 = vst [vmem:[#allocation77_spill] sm:$0xff] %v5760_v2  ;;  %v1983_v57 = vpop.xlane.xlu0 %1982 }
 0x224   : > { %v1227_v7 = vpop.f32.mrf.mxu0  ;;  %v2057_v46 = vadd.f32 %v5701_v13, %v1983_v57  ;;  %v1903_v1 = vsel %vm1832_vm8, %v1800_v27, %v1871_v58  ;;  %v1729_v6 = vpop.f32.mrf.mxu2  ;;  %vm2223_vm8 = vcmp.gt.f32.partialorder %v5556_v29, 0.0 }
 0x225   : > { %v1484_v3 = vpop.f32.mrf.mxu1  ;;  %v1939_v32 = vmul.f32 %v5435_v0, %v1903_v1  ;;  %v1730_v9 = vadd.f32 %v4884_v14, %v1729_v6 }
 0x226   : > { %v1769_v41 = vadd.f32 %v1484_v3, %v1227_v7  ;;  %v5768_v21 = vsel %vm2217_vm9, %v2057_v46, -1e+30  ;;  %vm2209_vm9 = vcmp.gt.f32.partialorder %v5612_v28, 0.0 }
 0x227   : > { %v2026_v20 = vsel %vm1944_vm6, %v1939_v32, 0.0  ;;  %v2380_v22 = vmul.f32 %v1730_v9, %v1227_v7 }
 0x228   : > { %v1801_v39 = vadd.f32 %v1769_v41, %v1730_v9  ;;  %2027 = vadd.xlane.f32.xlu0 %v2026_v20  ;;  %v4885_v41 = vld [vmem:[%s6851_s13] ss:$0 sm:$0xff] }
 0x229   : > { %v5772_v27 = vmul.f32 %v2380_v22, %v1484_v3 }
 0x22a   : > { %v1872_v56 = vmul.f32 %v5427_v54, %v1801_v39  ;;  %vm1833_vm10 = vcmp.gt.f32.partialorder %v1801_v39, 0.0 }
 0x22b   : > { %7034 = vst [vmem:[#allocation78_spill] sm:$0xff] %v5772_v27  ;;  %v1986_v58 = vpop.xlane.xlu1 %1985 }
 0x22c   : > { %v1229_v38 = vpop.f32.mrf.mxu0  ;;  %v2058_v57 = vadd.f32 %v5701_v13, %v1986_v58  ;;  %v1904_v1 = vsel %vm1833_vm10, %v1801_v39, %v1872_v56  ;;  %v1732_v46 = vpop.f32.mrf.mxu2  ;;  %vm2224_vm10 = vcmp.gt.f32.partialorder %v5592_v51, 0.0  ;;  %v4772_v51 = vpack.i.bf16 %v5264_v10, %v5202_v44 }
 0x22d   : > { %v1486_v0 = vpop.f32.mrf.mxu1  ;;  %v1940_v7 = vmul.f32 %v4885_v41, %v1904_v1  ;;  %v1733_v32 = vadd.f32 %v4884_v14, %v1732_v46 }
 0x22e   : > { %v1770_v6 = vadd.f32 %v1486_v0, %v1229_v38  ;;  %v5779_v9 = vsel %vm2218_vm11, %v2058_v57, -1e+30  ;;  %vm2210_vm11 = vcmp.gt.f32.partialorder %v5588_v61, 0.0 }
 0x22f   : > { %7035 = vst [vmem:[#allocation79_spill] sm:$0xff] %v5779_v9  ;;  %v2029_v3 = vsel %vm1944_vm6, %v1940_v7, 0.0  ;;  %v2381_v22 = vmul.f32 %v1733_v32, %v1229_v38 }
 0x230   : > { %v1802_v20 = vadd.f32 %v1770_v6, %v1733_v32  ;;  %2030 = vadd.xlane.f32.xlu1 %v2029_v3 }
 0x231   : > { %v5783_v39 = vmul.f32 %v2381_v22, %v1486_v0 }
 0x232   : > { %v1873_v24 = vmul.f32 %v5427_v54, %v1802_v20  ;;  %vm1834_vm12 = vcmp.gt.f32.partialorder %v1802_v20, 0.0 }
 0x233   : > { %v1989_v58 = vpop.xlane.xlu2 %1988 }
 0x234   : > { %v1232_v2 = vpop.f32.mrf.mxu0  ;;  %v2059_v1 = vadd.f32 %v5701_v13, %v1989_v58  ;;  %v1905_v57 = vsel %vm1834_vm12, %v1802_v20, %v1873_v24  ;;  %v1735_v27 = vpop.f32.mrf.mxu2  ;;  %vm2225_vm12 = vcmp.gt.f32.partialorder %v5574_v23, 0.0  ;;  %v4774_v23 = vpack.i.bf16 %v5295_v25, %v5215_v50 }
 0x235   : > { %v1489_v56 = vpop.f32.mrf.mxu1  ;;  %v1941_v9 = vmul.f32 %v4885_v41, %v1905_v57  ;;  %v1736_v7 = vadd.f32 %v4884_v14, %v1735_v27 }
 0x236   : > { %v1771_v46 = vadd.f32 %v1489_v56, %v1232_v2  ;;  %v5787_v6 = vsel %vm2219_vm13, %v2059_v1, -1e+30  ;;  %vm2211_vm13 = vcmp.gt.f32.partialorder %v5582_v16, 0.0  ;;  %v4776_v16 = vpack.i.bf16 %v5219_v52, %v5225_v55 }
 0x237   : > { %v2032_v38 = vsel %vm1944_vm6, %v1941_v9, 0.0  ;;  %v2382_v3 = vmul.f32 %v1736_v7, %v1232_v2 }
 0x238   : > { %v1803_v32 = vadd.f32 %v1771_v46, %v1736_v7  ;;  %2033 = vadd.xlane.f32.xlu2 %v2032_v38 }
 0x239   : > { %v5793_v12 = vmul.f32 %v2382_v3, %v1489_v56 }
 0x23a   : > { %v1874_v0 = vmul.f32 %v5427_v54, %v1803_v32  ;;  %vm1835_vm14 = vcmp.gt.f32.partialorder %v1803_v32, 0.0 }
 0x23b   : > { %v1992_v24 = vpop.xlane.xlu0 %1991 }
 0x23c   : > { %v5791_v22 = vpop.f32.mrf.mxu0  ;;  %v2060_v27 = vadd.f32 %v5701_v13, %v1992_v24  ;;  %v1906_v58 = vsel %vm1835_vm14, %v1803_v32, %v1874_v0  ;;  %v1738_v1 = vpop.f32.mrf.mxu2  ;;  %vm2226_vm14 = vcmp.gt.f32.partialorder %v5563_v30, 0.0 }
 0x23d   : > { %v5796_v20 = vpop.f32.mrf.mxu1  ;;  %v1942_v9 = vmul.f32 %v4885_v41, %v1906_v58  ;;  %v5801_v46 = vadd.f32 %v4884_v14, %v1738_v1  ;;  %v2045_v14 = vadd.f32 %v5701_v13, %v5723_v37 }
 0x23e   : > { %v1772_v2 = vadd.f32 %v5796_v20, %v5791_v22  ;;  %v5803_v57 = vsel %vm2220_vm15, %v2060_v27, -1e+30  ;;  %v2046_v27 = vadd.f32 %v5701_v13, %v5685_v59  ;;  %vm2227_vm15 = vcmp.gt.f32.partialorder %v5628_v19, 0.0 }
 0x23f   : > { %v2035_v56 = vsel %vm1944_vm6, %v1942_v9, 0.0  ;;  %v5812_v24 = vsel %vm2205_vm1, %v2045_v14, -1e+30  ;;  %v2048_v9 = vadd.f32 %v5701_v13, %v5715_v53  ;;  %vm2228_vm1 = vcmp.gt.f32.partialorder %v5608_v36, 0.0 }
 0x240   : > { %v1804_v7 = vadd.f32 %v1772_v2, %v5801_v46  ;;  %2036 = vadd.xlane.f32.xlu0 %v2035_v56  ;;  %7036 = vst [vmem:[#allocation80_spill] sm:$0xff] %v5812_v24  ;;  %v5820_v58 = vsel %vm2206_vm2, %v2046_v27, -1e+30  ;;  %v2049_v56 = vadd.f32 %v5701_v13, %v5692_v5  ;;  %v2050_v5 = vadd.f32 %v5701_v13, %v5725_v48 }
 0x241   : > { %7037 = vst [vmem:[#allocation81_spill] sm:$0xff] %v5820_v58  ;;  %v5844_v18 = vsel %vm2208_vm3, %v2048_v9, -1e+30  ;;  %v2051_v48 = vadd.f32 %v5701_v13, %v5733_v8  ;;  %vm2214_vm2 = vcmp.gt.f32.partialorder %v5618_v43, 0.0 }
 0x242   : > { %v1875_v15 = vmul.f32 %v5427_v54, %v1804_v7  ;;  %vm1836_vm0 = vcmp.gt.f32.partialorder %v1804_v7, 0.0 }
 0x243   : > { %v1995_v0 = vpop.xlane.xlu1 %1994  ;;  %v5883_v14 = vsel %vm2211_vm13, %v2051_v48, -1e+30  ;;  %v7054_v48 = vld [vmem:[#allocation75_spill] sm:$0xff] }
 0x244   : > { %v1907_v38 = vsel %vm1836_vm0, %v1804_v7, %v1875_v15  ;;  %v2061_v54 = vadd.f32 %v5701_v13, %v1995_v0  ;;  %v5857_v7 = vsel %vm2209_vm9, %v2049_v56, -1e+30  ;;  %vm2213_vm0 = vcmp.gt.f32.partialorder %v5623_v63, 0.0 }
 0x245   : > { %v1943_v3 = vmul.f32 %v4885_v41, %v1907_v38 }
 0x247   : > { %v2038_v32 = vsel %vm1944_vm6, %v1943_v3, 0.0  ;;  %vm2221_vm6 = vcmp.gt.f32.partialorder %v5493_v62, 0.0  ;;  %v5833_v62 = vsel %vm2207_vm5, %v2047_v26, -1e+30  ;;  %v5870_v3 = vsel %vm2210_vm11, %v2050_v5, -1e+30 }
 0x248   : > { %2039 = vadd.xlane.f32.xlu1 %v2038_v32  ;;  %v5822_v1 = vsel %vm2221_vm6, %v2061_v54, -1e+30  ;;  %7040 = vst [vmem:[#allocation84_spill] sm:$0xff] %v5833_v62  ;;  %v7051_v5 = vld [vmem:[#allocation19_spill] sm:$0xff] }
 0x249   : > { %7038 = vst [vmem:[#allocation82_spill] sm:$0xff] %v5822_v1 }
 0x24b   : > { %v1998_v41 = vpop.xlane.xlu1 %1997 }
 0x24c   : > { %v2062_v59 = vadd.f32 %v5701_v13, %v1998_v41  ;;  %v2053_v41 = vadd.f32 %v5701_v13, %v5735_v11  ;;  %v2054_v11 = vadd.f32 %v5701_v13, %v5747_v49 }
 0x24e   : > { %v5831_v37 = vsel %vm2222_vm7, %v2062_v59, -1e+30  ;;  %v4778_v59 = vpack.i.bf16 %v5308_v31, %v5236_v60 }
 0x24f   : > { %7039 = vst [vmem:[#allocation83_spill] sm:$0xff] %v5831_v37 }
 0x253   : > { %v2001_v42 = vpop.xlane.xlu1 %2000 }
 0x254   : > { %v2063_v34 = vadd.f32 %v5701_v13, %v2001_v42  ;;  %v5904_v42 = vsel %vm2213_vm0, %v2053_v41, -1e+30 }
 0x256   : > { %v5842_v33 = vsel %vm2223_vm8, %v2063_v34, -1e+30  ;;  %v7047_v34 = vld [vmem:[#allocation18_spill] sm:$0xff] }
 0x257   : > { %7041 = vst [vmem:[#allocation85_spill] sm:$0xff] %v5842_v33  ;;  %v4780_v36 = vpack.i.bf16 %v7047_v34, %v5337_v47 }
 0x25b   : > { %v2004_v2 = vpop.xlane.xlu1 %2003 }
 0x25c   : > { %v2064_v53 = vadd.f32 %v5701_v13, %v2004_v2  ;;  %v7048_v2 = vld [vmem:[#allocation54_spill] sm:$0xff] }
 0x25d   : > { %vm2229_vm6 = vcmp.gt.f32.partialorder %v7048_v2, 0.0 }
 0x25e   : > { %v5855_v29 = vsel %vm2224_vm10, %v2064_v53, -1e+30  ;;  %v5917_v53 = vsel %vm2214_vm2, %v2054_v11, -1e+30  ;;  %vm3060_vm2 = vcmask 7168  }
 0x25f   : > { %7042 = vst [vmem:[#allocation86_spill] sm:$0xff] %v5855_v29 }
 0x261   : > { %2269 = vxpose.xlu2.b32.start [1/16] (narrow) %v5812_v24, 8 }
 0x263   : > { %v2007_v15 = vpop.xlane.xlu2 %2006 }
 0x264   : > { %v2065_v28 = vadd.f32 %v5701_v13, %v2007_v15  ;;  %v7050_v15 = vld [vmem:[#allocation20_spill] sm:$0xff] }
 0x265   : > { %v4782_v43 = vpack.i.bf16 %v7051_v5, %v7050_v15 }
 0x266   : > { %v5868_v38 = vsel %vm2225_vm12, %v2065_v28, -1e+30  ;;  %v7052_v28 = vld [vmem:[#allocation62_spill] sm:$0xff]  ;;  %vm2336_vm12 = vcmask 1040384  }
 0x267   : > { %7043 = vst [vmem:[#allocation87_spill] sm:$0xff] %v5868_v38  ;;  %vm2230_vm5 = vcmp.gt.f32.partialorder %v7052_v28, 0.0 }
 0x269   : > { %2270 = vxpose.xlu2.b32.cont [2/16] (narrow) %v5820_v58, 8  ;;  %2301 = vxpose.xlu0.b32.start [1/16] (narrow) %v5822_v1, 8  ;;  %v7070_v1 = vld [vmem:[#allocation65_spill] sm:$0xff] }
 0x26a   : > { %vm2234_vm9 = vcmp.gt.f32.partialorder %v7070_v1, 0.0 }
 0x26b   : > { %v2010_v32 = vpop.xlane.xlu0 %2009 }
 0x26c   : > { %v2066_v61 = vadd.f32 %v5701_v13, %v2010_v32 }
 0x26e   : > { %v5881_v0 = vsel %vm2226_vm14, %v2066_v61, -1e+30 }
 0x26f   : > { %7044 = vst [vmem:[#allocation88_spill] sm:$0xff] %v5881_v0 }
 0x271   : > { %2271 = vxpose.xlu2.b32.cont [3/16] (narrow) %v5833_v62, 8  ;;  %2302 = vxpose.xlu0.b32.cont [2/16] (narrow) %v5831_v37, 8 }
 0x273   : > { %v2013_v27 = vpop.xlane.xlu1 %2012 }
 0x274   : > { %v2067_v8 = vadd.f32 %v5701_v13, %v2013_v27  ;;  %v7056_v27 = vld [vmem:[#allocation28_spill] sm:$0xff] }
 0x276   : > { %v5891_v54 = vsel %vm2227_vm15, %v2067_v8, -1e+30 }
 0x277   : > { %7045 = vst [vmem:[#allocation89_spill] sm:$0xff] %v5891_v54 }
 0x279   : > { %2272 = vxpose.xlu2.b32.cont [4/16] (narrow) %v5844_v18, 8  ;;  %2303 = vxpose.xlu0.b32.cont [3/16] (narrow) %v5842_v33, 8  ;;  %v7073_v33 = vld [vmem:[#allocation26_spill] sm:$0xff] }
 0x27b   : > { %v2016_v30 = vpop.xlane.xlu2 %2015 }
 0x27c   : > { %v2068_v26 = vadd.f32 %v5701_v13, %v2016_v30 }
 0x27e   : > { %v5902_v19 = vsel %vm2228_vm1, %v2068_v26, -1e+30 }
 0x27f   : > { %7046 = vst [vmem:[#allocation90_spill] sm:$0xff] %v5902_v19 }
 0x281   : > { %2273 = vxpose.xlu2.b32.cont [5/16] (narrow) %v5857_v7, 8  ;;  %2304 = vxpose.xlu0.b32.cont [4/16] (narrow) %v5855_v29, 8  ;;  %v7074_v29 = vld [vmem:[#allocation63_spill] sm:$0xff] }
 0x282   : > { %4771 = vxpose.xlu1.b32.start [1/16] (narrow) %v4770_v45, 16  ;;  %vm2235_vm10 = vcmp.gt.f32.partialorder %v7074_v29, 0.0  ;;  %v7080_v29 = vld [vmem:[#allocation30_spill] sm:$0xff] }
 0x283   : > { %v2019_v9 = vpop.xlane.xlu0 %2018 }
 0x284   : > { %v2069_v63 = vadd.f32 %v5701_v13, %v2019_v9  ;;  %v7060_v9 = vld [vmem:[#allocation22_spill] sm:$0xff] }
 0x286   : > { %v5915_v56 = vsel %vm2229_vm6, %v2069_v63, -1e+30  ;;  %v7061_v63 = vld [vmem:[#allocation58_spill] sm:$0xff]  ;;  %vm2580_vm6 = vcmask 257024  }
 0x287   : > { %7049 = vst [vmem:[#allocation18_spill] sm:$0xff] %v5915_v56  ;;  %vm2232_vm3 = vcmp.gt.f32.partialorder %v7061_v63, 0.0  ;;  %v7069_v63 = vld [vmem:[#allocation35_spill] sm:$0xff] }
 0x289   : > { %2274 = vxpose.xlu2.b32.cont [6/16] (narrow) %v5870_v3, 8  ;;  %2305 = vxpose.xlu0.b32.cont [5/16] (narrow) %v5868_v38, 8 }
 0x28a   : > { %4773 = vxpose.xlu1.b32.cont [2/16] (narrow) %v4772_v51, 16 }
 0x28b   : > { %v2022_v45 = vpop.xlane.xlu1 %2021 }
 0x28c   : > { %v2070_v49 = vadd.f32 %v5701_v13, %v2022_v45 }
 0x28e   : > { %v5925_v51 = vsel %vm2230_vm5, %v2070_v49, -1e+30  ;;  %v7063_v49 = vld [vmem:[#allocation24_spill] sm:$0xff] }
 0x28f   : > { %7053 = vst [vmem:[#allocation54_spill] sm:$0xff] %v5925_v51 }
 0x291   : > { %2275 = vxpose.xlu2.b32.cont [7/16] (narrow) %v5883_v14, 8  ;;  %2306 = vxpose.xlu0.b32.cont [6/16] (narrow) %v5881_v0, 8  ;;  %v7078_v0 = vld [vmem:[#allocation71_spill] sm:$0xff] }
 0x292   : > { %4775 = vxpose.xlu1.b32.cont [3/16] (narrow) %v4774_v23, 16  ;;  %v7055_v23 = vld [vmem:[#allocation21_spill] sm:$0xff]  ;;  %vm2236_vm11 = vcmp.gt.f32.partialorder %v7078_v0, 0.0  ;;  %v2339_v0 = vlaneseq }
 0x293   : > { %v2025_v32 = vpop.xlane.xlu2 %2024  ;;  %v4784_v8 = vpack.i.bf16 %v7056_v27, %v7055_v23 }
 0x294   : > { %v2071_v61 = vadd.f32 %v5701_v13, %v2025_v32  ;;  %v7065_v32 = vld [vmem:[#allocation68_spill] sm:$0xff]  ;;  %vm2341_vm13 = vcmp.lt.s32.totalorder %v2339_v0, 256 }
 0x295   : > { %vm2233_vm8 = vcmp.gt.f32.partialorder %v7065_v32, 0.0  ;;  %v7072_v32 = vld [vmem:[#allocation36_spill] sm:$0xff] }
 0x299   : > { %2276 = vxpose.xlu2.b32.cont [8/16] (narrow) %v5710_v35, 8  ;;  %2307 = vxpose.xlu0.b32.cont [7/16] (narrow) %v5891_v54, 8 }
 0x29a   : > { %4777 = vxpose.xlu1.b32.cont [4/16] (narrow) %v4776_v16, 16  ;;  %v7057_v16 = vld [vmem:[#allocation60_spill] sm:$0xff] }
 0x29b   : > { %vm2231_vm7 = vcmp.gt.f32.partialorder %v7057_v16, 0.0  ;;  %v2028_v41 = vpop.xlane.xlu0 %2027  ;;  %v7067_v16 = vld [vmem:[#allocation79_spill] sm:$0xff] }
 0x29c   : > { %v5933_v30 = vsel %vm2231_vm7, %v2071_v61, -1e+30  ;;  %v2072_v26 = vadd.f32 %v5701_v13, %v2028_v41 }
 0x29d   : > { %7058 = vst [vmem:[#allocation20_spill] sm:$0xff] %v5933_v30 }
 0x2a1   : > { %2277 = vxpose.xlu2.b32.cont [9/16] (narrow) %v5904_v42, 8  ;;  %2308 = vxpose.xlu0.b32.cont [8/16] (narrow) %v5902_v19, 8 }
 0x2a2   : > { %4779 = vxpose.xlu1.b32.cont [5/16] (narrow) %v4778_v59, 16  ;;  %v7059_v59 = vld [vmem:[#allocation32_spill] sm:$0xff] }
 0x2a3   : > { %v4786_v11 = vpack.i.bf16 %v7060_v9, %v7059_v59  ;;  %v2031_v2 = vpop.xlane.xlu1 %2030 }
 0x2a4   : > { %v2073_v45 = vadd.f32 %v5701_v13, %v2031_v2 }
 0x2a6   : > { %v5949_v61 = vsel %vm2233_vm8, %v2073_v45, -1e+30 }
 0x2a7   : > { %7066 = vst [vmem:[#allocation62_spill] sm:$0xff] %v5949_v61 }
 0x2a9   : > { %2278 = vxpose.xlu2.b32.cont [10/16] (narrow) %v5917_v53, 8  ;;  %2309 = vxpose.xlu0.b32.cont [9/16] (narrow) %v5915_v56, 8  ;;  %v7082_v56 = vld [vmem:[#allocation38_spill] sm:$0xff] }
 0x2aa   : > { %4781 = vxpose.xlu1.b32.cont [6/16] (narrow) %v4780_v36, 16  ;;  %v5941_v36 = vsel %vm2232_vm3, %v2072_v26, -1e+30  ;;  %v7068_v26 = vld [vmem:[#allocation25_spill] sm:$0xff] }
 0x2ab   : > { %7062 = vst [vmem:[#allocation19_spill] sm:$0xff] %v5941_v36 }
 0x2b1   : > { %2279 = vxpose.xlu2.b32.cont [11/16] (narrow) %v7054_v48, 8  ;;  %2310 = vxpose.xlu0.b32.cont [10/16] (narrow) %v5925_v51, 8  ;;  %v7083_v51 = vld [vmem:[#allocation31_spill] sm:$0xff] }
 0x2b2   : > { %4783 = vxpose.xlu1.b32.cont [7/16] (narrow) %v4782_v43, 16  ;;  %v7064_v43 = vld [vmem:[#allocation23_spill] sm:$0xff] }
 0x2b3   : > { %v4788_v28 = vpack.i.bf16 %v7064_v43, %v7063_v49  ;;  %v2037_v37 = vpop.xlane.xlu0 %2036 }
 0x2b4   : > { %v2075_v45 = vadd.f32 %v5701_v13, %v2037_v37 }
 0x2b9   : > { %2280 = vxpose.xlu2.b32.cont [12/16] (narrow) %v5756_v17, 8  ;;  %2311 = vxpose.xlu0.b32.cont [11/16] (narrow) %v5933_v30, 8  ;;  %v4798_v30 = vpack.i.bf16 %v7083_v51, %v7082_v56 }
 0x2ba   : > { %4785 = vxpose.xlu1.b32.cont [8/16] (narrow) %v4784_v8, 16  ;;  %v2034_v8 = vpop.xlane.xlu2 %2033 }
 0x2bb   : > { %v2074_v41 = vadd.f32 %v5701_v13, %v2034_v8  ;;  %v5965_v8 = vsel %vm2235_vm10, %v2075_v45, -1e+30  ;;  %v2040_v38 = vpop.xlane.xlu1 %2039  ;;  %v7081_v45 = vld [vmem:[#allocation37_spill] sm:$0xff] }
 0x2bc   : > { %7075 = vst [vmem:[#allocation21_spill] sm:$0xff] %v5965_v8  ;;  %v2076_v1 = vadd.f32 %v5701_v13, %v2040_v38  ;;  %v4796_v19 = vpack.i.bf16 %v7081_v45, %v7080_v29  ;;  %v7085_v13 = vld [vmem:[#allocation33_spill] sm:$0xff] }
 0x2bd   : > { %v5957_v2 = vsel %vm2234_vm9, %v2074_v41, -1e+30  ;;  %v7076_v41 = vld [vmem:[#allocation29_spill] sm:$0xff] }
 0x2be   : > { %7071 = vst [vmem:[#allocation75_spill] sm:$0xff] %v5957_v2  ;;  %v5973_v54 = vsel %vm2236_vm11, %v2076_v1, -1e+30 }
 0x2bf   : > { %7079 = vst [vmem:[#allocation28_spill] sm:$0xff] %v5973_v54 }
 0x2c1   : > { %2281 = vxpose.xlu2.b32.cont [13/16] (narrow) %v5768_v21, 8  ;;  %2312 = vxpose.xlu0.b32.cont [12/16] (narrow) %v5941_v36, 8 }
 0x2c2   : > { %4787 = vxpose.xlu1.b32.cont [9/16] (narrow) %v4786_v11, 16  ;;  %v4790_v11 = vpack.i.bf16 %v7069_v63, %v7068_v26 }
 0x2c9   : > { %2282 = vxpose.xlu2.b32.cont [14/16] (narrow) %v7067_v16, 8  ;;  %2313 = vxpose.xlu0.b32.cont [13/16] (narrow) %v5949_v61, 8 }
 0x2ca   : > { %4789 = vxpose.xlu1.b32.cont [10/16] (narrow) %v4788_v28, 16  ;;  %v4792_v28 = vpack.i.bf16 %v7073_v33, %v7072_v32 }
 0x2d1   : > { %2283 = vxpose.xlu2.b32.cont [15/16] (narrow) %v5787_v6, 8  ;;  %2314 = vxpose.xlu0.b32.cont [14/16] (narrow) %v5957_v2, 8 }
 0x2d2   : > { %4791 = vxpose.xlu1.b32.cont [11/16] (narrow) %v4790_v11, 16  ;;  %v7077_v11 = vld [vmem:[#allocation27_spill] sm:$0xff] }
 0x2d3   : > { %v4794_v37 = vpack.i.bf16 %v7077_v11, %v7076_v41 }
 0x2d9   : > { %2284 = vxpose.xlu2.b32.end [16/16] (narrow) %v5803_v57, 8  ;;  %2315 = vxpose.xlu0.b32.cont [15/16] (narrow) %v5965_v8, 8 }
 0x2da   : > { %4793 = vxpose.xlu1.b32.cont [12/16] (narrow) %v4792_v28, 16  ;;  %v7084_v28 = vld [vmem:[#allocation34_spill] sm:$0xff] }
 0x2db   : > { %v4800_v38 = vpack.i.bf16 %v7085_v13, %v7084_v28 }
 0x2e1   : > { %2316 = vxpose.xlu0.b32.end [16/16] (narrow) %v5973_v54, 8 }
 0x2e2   : > { %4795 = vxpose.xlu1.b32.cont [13/16] (narrow) %v4794_v37, 16 }
 0x2ea   : > { %4797 = vxpose.xlu1.b32.cont [14/16] (narrow) %v4796_v19, 16 }
 0x2f2   : > { %4799 = vxpose.xlu1.b32.cont [15/16] (narrow) %v4798_v30, 16 }
 0x2fa   : > { %4801 = vxpose.xlu1.b32.end [16/16] (narrow) %v4800_v38, 16  ;;  %v2285_v36 = vpop.trf.xlu2 }
 0x2fb   : > { %v2681_v0 = vperm.slane %v2285_v36, 0 }
 0x30d   : > { %v2317_v1 = vpop.trf.xlu0 }
 0x30e   : > { %v2335_v37 = vrot.slane %v2317_v1, 7  ;;  %v2682_v2 = vperm.slane %v2317_v1, 0 }
 0x310   : > { %v2337_v61 = vsel %vm2336_vm12, %v2285_v36, %v2335_v37  ;;  %v7088_v36 = vld [vmem:[#allocation39_spill] sm:$0xff] }
 0x311   : > { %2351 = vst.msk [vmem:[%s2350_s7] ss:$2 sm:$0x3] %vm2341_vm13, %v2337_v61  ;;  %v2416_v1 = vpack.c.bf16 %v7088_v36, %v7088_v36  ;;  %v7095_v36 = vld [vmem:[#allocation48_spill] sm:$0xff] }
 0x326   : > { %v5984_v19 = vpop.trf.xlu1 }
 0x327   : > { %7086 = vst [vmem:[#allocation60_spill] sm:$0xff] %v5984_v19  ;;  %v6940_v61 = vunpack.i.h.bf16 %v5984_v19  ;;  %v4803_v58 = vunpack.i.l.bf16 %v5984_v19  ;;  %v7092_v19 = vld [vmem:[#allocation41_spill] sm:$0xff] }
 0x329   : > { %vm2678_vm0 = vcmp.gt.f32.partialorder %v6940_v61, 0.0  ;;  %vm2677_vm1 = vcmp.gt.f32.partialorder %v4803_v58, 0.0  ;;  %v7091_v61 = vld [vmem:[#allocation49_spill] sm:$0xff] }
 0x32a   : > { %v2683_v62 = vsel %vm2677_vm1, %v2681_v0, -1e+30 }
 0x32e   : > { %v5986_v30 = vpop.trf.xlu1 }
 0x32f   : > { %7087 = vst [vmem:[#allocation32_spill] sm:$0xff] %v5986_v30  ;;  %v6936_v54 = vunpack.i.h.bf16 %v5986_v30  ;;  %v6941_v38 = vunpack.i.l.bf16 %v5986_v30 }
 0x331   : > { %vm2680_vm14 = vcmp.gt.f32.partialorder %v6936_v54, 0.0  ;;  %vm2679_vm15 = vcmp.gt.f32.partialorder %v6941_v38, 0.0  ;;  %v2684_v54 = vsel %vm2678_vm0, %v2682_v2, -1e+30 }
 0x332   : > { %v2686_v8 = vsel %vm2680_vm14, %v2682_v2, -1e+30  ;;  %v2685_v37 = vsel %vm2679_vm15, %v2681_v0, -1e+30  ;;  %v2689_v30 = vmax.f32 %v2683_v62, %v2684_v54  ;;  %v2418_v2 = vpack.c.bf16 %v7092_v19, %v7092_v19  ;;  %v7093_v62 = vld [vmem:[#allocation43_spill] sm:$0xff] }
 0x333   : > { %v2692_v24 = vmax.f32 %v2685_v37, %v2686_v8  ;;  %v7089_v8 = vld [vmem:[#allocation40_spill] sm:$0xff]  ;;  %v2420_v54 = vpack.c.bf16 %v7093_v62, %v7093_v62 }
 0x334   : > { %v2417_v37 = vpack.c.bf16 %v7089_v8, %v7089_v8 }
 0x34a   : > { %2693 = vmax.xlane.f32.xlu2 %v2692_v24  ;;  %v7090_v24 = vld [vmem:[#allocation46_spill] sm:$0xff] }
 0x34b   : > { %v2360_v38 = vmul.f32 %v7091_v61, %v7090_v24  ;;  %v7096_v61 = vld [vmem:[#allocation44_spill] sm:$0xff] }
 0x34c   : > { %v2421_v19 = vpack.c.bf16 %v7096_v61, %v7096_v61 }
 0x352   : > { %2690 = vmax.xlane.f32.xlu0 %v2689_v30  ;;  %v7094_v30 = vld [vmem:[#allocation42_spill] sm:$0xff] }
 0x353   : > { %v2419_v0 = vpack.c.bf16 %v7094_v30, %v7094_v30  ;;  %v7100_v30 = vld [vmem:[#allocation51_spill] sm:$0xff] }
 0x354   : > { %2480 = vrot.lane.b32.xlu1 %v2416_v1, %s4941_s3  ;;  %v2392_v1 = vmul.f32 %v2360_v38, %v7095_v36  ;;  %v7099_v38 = vld [vmem:[#allocation45_spill] sm:$0xff]  ;;  %v7101_v36 = vld [vmem:[#allocation56_spill] sm:$0xff] }
 0x356   : > { %v2424_v8 = vpack.c.bf16 %v2392_v1, %v2392_v1  ;;  %v2430_v1 = vpack.c.bf16 %v7101_v36, %v7101_v36 }
 0x35c   : > { %2482 = vrot.lane.b32.xlu1 %v2417_v37, %s4941_s3  ;;  %v7097_v37 = vld [vmem:[#allocation47_spill] sm:$0xff] }
 0x35d   : > { %v2423_v24 = vpack.c.bf16 %v7097_v37, %v7097_v37 }
 0x362   : > { %2484 = vrot.lane.b32.xlu2 %v2418_v2, %s4941_s3  ;;  %v7098_v2 = vld [vmem:[#allocation52_spill] sm:$0xff] }
 0x363   : > { %v2427_v62 = vpack.c.bf16 %v7098_v2, %v7098_v2 }
 0x364   : > { %2488 = vrot.lane.b32.xlu1 %v2420_v54, %s4941_s3  ;;  %v2422_v54 = vpack.c.bf16 %v7099_v38, %v7099_v38 }
 0x366   : > { %2486 = vrot.lane.b32.xlu0 %v2419_v0, %s4941_s3  ;;  %v2426_v0 = vpack.c.bf16 %v7100_v30, %v7100_v30 }
 0x36a   : > { %2496 = vrot.lane.b32.xlu2 %v2424_v8, %s4941_s3  ;;  %v7102_v8 = vld [vmem:[#allocation50_spill] sm:$0xff] }
 0x36b   : > { %v2425_v61 = vpack.c.bf16 %v7102_v8, %v7102_v8 }
 0x36c   : > { %2490 = vrot.lane.b32.xlu1 %v2421_v19, %s4941_s3  ;;  %v7103_v19 = vld [vmem:[#allocation55_spill] sm:$0xff] }
 0x36d   : > { %v2429_v37 = vpack.c.bf16 %v7103_v19, %v7103_v19 }
 0x36e   : > { %2494 = vrot.lane.b32.xlu0 %v2423_v24, %s4941_s3  ;;  %v7104_v24 = vld [vmem:[#allocation61_spill] sm:$0xff] }
 0x36f   : > { %v2433_v2 = vpack.c.bf16 %v7104_v24, %v7104_v24 }
 0x372   : > { %2502 = vrot.lane.b32.xlu2 %v2427_v62, %s4941_s3  ;;  %v7105_v62 = vld [vmem:[#allocation53_spill] sm:$0xff] }
 0x373   : > { %v2428_v38 = vpack.c.bf16 %v7105_v62, %v7105_v62 }
 0x374   : > { %2492 = vrot.lane.b32.xlu1 %v2422_v54, %s4941_s3  ;;  %v7106_v54 = vld [vmem:[#allocation59_spill] sm:$0xff] }
 0x375   : > { %v2432_v30 = vpack.c.bf16 %v7106_v54, %v7106_v54 }
 0x376   : > { %2500 = vrot.lane.b32.xlu0 %v2426_v0, %s4941_s3  ;;  %v7107_v0 = vld [vmem:[#allocation67_spill] sm:$0xff] }
 0x377   : > { %v2436_v36 = vpack.c.bf16 %v7107_v0, %v7107_v0 }
 0x37a   : > { %2508 = vrot.lane.b32.xlu2 %v2430_v1, %s4941_s3  ;;  %v7108_v1 = vld [vmem:[#allocation57_spill] sm:$0xff] }
 0x37b   : > { %v2431_v8 = vpack.c.bf16 %v7108_v1, %v7108_v1 }
 0x37c   : > { %2498 = vrot.lane.b32.xlu1 %v2425_v61, %s4941_s3  ;;  %v7109_v61 = vld [vmem:[#allocation66_spill] sm:$0xff] }
 0x37d   : > { %v2435_v19 = vpack.c.bf16 %v7109_v61, %v7109_v61 }
 0x37e   : > { %2506 = vrot.lane.b32.xlu0 %v2429_v37, %s4941_s3  ;;  %v7110_v37 = vld [vmem:[#allocation72_spill] sm:$0xff] }
 0x37f   : > { %v2439_v24 = vpack.c.bf16 %v7110_v37, %v7110_v37  ;;  %v7116_v37 = vld [vmem:[#allocation73_spill] sm:$0xff] }
 0x382   : > { %2514 = vrot.lane.b32.xlu2 %v2433_v2, %s4941_s3  ;;  %v7111_v2 = vld [vmem:[#allocation64_spill] sm:$0xff] }
 0x383   : > { %v2434_v62 = vpack.c.bf16 %v7111_v2, %v7111_v2  ;;  %v2383_v2 = vmul.f32 %v5801_v46, %v5791_v22  ;;  %v2446_v22 = vpack.c.bf16 %v5793_v12, %v5793_v12  ;;  %v6098_v46 = vld [vmem:[#allocation4 + $0x8] sm:$0xff]  ;;  %v6110_v12 = vld [vmem:[#allocation4] sm:$0xff] }
 0x384   : > { %2504 = vrot.lane.b32.xlu1 %v2428_v38, %s4941_s3  ;;  %v7112_v38 = vld [vmem:[#allocation70_spill] sm:$0xff] }
 0x385   : > { %v2438_v54 = vpack.c.bf16 %v7112_v38, %v7112_v38 }
 0x386   : > { %2512 = vrot.lane.b32.xlu0 %v2432_v30, %s4941_s3  ;;  %v7113_v30 = vld [vmem:[#allocation76_spill] sm:$0xff] }
 0x387   : > { %v2442_v0 = vpack.c.bf16 %v7113_v30, %v7113_v30  ;;  %v7118_v30 = vld [vmem:[#allocation77_spill] sm:$0xff] }
 0x38a   : > { %2520 = vrot.lane.b32.xlu2 %v2436_v36, %s4941_s3  ;;  %v7114_v36 = vld [vmem:[#allocation69_spill] sm:$0xff] }
 0x38b   : > { %v2437_v1 = vpack.c.bf16 %v7114_v36, %v7114_v36 }
 0x38c   : > { %2510 = vrot.lane.b32.xlu1 %v2431_v8, %s4941_s3  ;;  %v7115_v8 = vld [vmem:[#allocation74_spill] sm:$0xff] }
 0x38d   : > { %v2441_v61 = vpack.c.bf16 %v7115_v8, %v7115_v8 }
 0x38e   : > { %2518 = vrot.lane.b32.xlu0 %v2435_v19, %s4941_s3  ;;  %v2445_v19 = vpack.c.bf16 %v5783_v39, %v5783_v39  ;;  %v2443_v39 = vpack.c.bf16 %v7118_v30, %v7118_v30 }
 0x392   : > { %2526 = vrot.lane.b32.xlu2 %v2439_v24, %s4941_s3  ;;  %v2440_v24 = vpack.c.bf16 %v7116_v37, %v7116_v37 }
 0x394   : > { %2516 = vrot.lane.b32.xlu1 %v2434_v62, %s4941_s3  ;;  %v7117_v62 = vld [vmem:[#allocation78_spill] sm:$0xff] }
 0x395   : > { %v2444_v38 = vpack.c.bf16 %v7117_v62, %v7117_v62 }
 0x396   : > { %2524 = vrot.lane.b32.xlu0 %v2438_v54, %s4941_s3  ;;  %v2415_v54 = vmul.f32 %v2383_v2, %v5796_v20 }
 0x39a   : > { %2532 = vrot.lane.b32.xlu2 %v2442_v0, %s4941_s3  ;;  %v2447_v0 = vpack.c.bf16 %v2415_v54, %v2415_v54 }
 0x39c   : > { %2522 = vrot.lane.b32.xlu1 %v2437_v1, %s4941_s3 }
 0x39e   : > { %2530 = vrot.lane.b32.xlu0 %v2441_v61, %s4941_s3 }
 0x3a2   : > { %2538 = vrot.lane.b32.xlu2 %v2445_v19, %s4941_s3 }
 0x3a4   : > { %2528 = vrot.lane.b32.xlu1 %v2440_v24, %s4941_s3 }
 0x3a6   : > { %2536 = vrot.lane.b32.xlu0 %v2444_v38, %s4941_s3 }
 0x3ac   : > { %2534 = vrot.lane.b32.xlu1 %v2443_v39, %s4941_s3 }
 0x3ae   : > { %2542 = vrot.lane.b32.xlu0 %v2447_v0, %s4941_s3 }
 0x3b4   : > { %2540 = vrot.lane.b32.xlu1 %v2446_v22, %s4941_s3 }
 0x3bd   : > { %v2694_v36 = vpop.xlane.xlu2 %2693 }
 0x3be   : > { %v6103_v20 = vmax.f32 %v6098_v46, %v2694_v36 }
 0x3c0   : > { %v3005_v1 = vsub.f32 %v6098_v46, %v6103_v20  ;;  %3064 = vst.msk [vmem:[#allocation4 + $0x8] sm:$0xff] %vm3060_vm2, %v6103_v20  ;;  %2807 = vmatpush.msra.mxu3 %v6103_v20 }
 0x3c5   : > { %v2485_v8 = vpop.permute.xlu2 %2484  ;;  %v2691_v61 = vpop.xlane.xlu0 %2690 }
 0x3c6   : > { %2583 = vst.msk [vmem:[%s6112_s8 + $0x8] sm:$0xf] %vm2580_vm6, %v2485_v8  ;;  %v6117_v19 = vmax.f32 %v6110_v12, %v2691_v61  ;;  %v2481_v37 = vpop.permute.xlu1 %2480 }
 0x3c7   : > { %2581 = vst.msk [vmem:[%s6112_s8] sm:$0xf] %vm2580_vm6, %v2481_v37 }
 0x3c8   : > { %v3004_v24 = vsub.f32 %v6110_v12, %v6117_v19  ;;  %3063 = vst.msk [vmem:[#allocation4] sm:$0xff] %vm3060_vm2, %v6117_v19  ;;  %2808 = vmatpush.msra.mxu3 %v6117_v19 }
 0x3c9   : > { %4420 = vmatmul.msk.f32.vlgmr.msra.gmra.mxu3 %vm1099_vm4, %v5252_v4 }
 0x3cd   : > { %v2497_v2 = vpop.permute.xlu2 %2496 }
 0x3ce   : > { %2589 = vst.msk [vmem:[%s6112_s8 + $0x20] sm:$0xf] %vm2580_vm6, %v2497_v2  ;;  %v2483_v62 = vpop.permute.xlu1 %2482 }
 0x3cf   : > { %2582 = vst.msk [vmem:[%s6112_s8 + $0x4] sm:$0xf] %vm2580_vm6, %v2483_v62 }
 0x3d1   : > { %4421 = vmatmul.msk.f32.gmra.mxu3 %vm1099_vm4, %v5202_v44 }
 0x3d5   : > { %v2503_v38 = vpop.permute.xlu2 %2502 }
 0x3d6   : > { %2592 = vst.msk [vmem:[%s6112_s8 + $0x2c] sm:$0xf] %vm2580_vm6, %v2503_v38  ;;  %v2489_v54 = vpop.permute.xlu1 %2488 }
 0x3d7   : > { %2585 = vst.msk [vmem:[%s6112_s8 + $0x10] sm:$0xf] %vm2580_vm6, %v2489_v54 }
 0x3d8   : > { %v2487_v4 = vpop.permute.xlu0 %2486 }
 0x3d9   : > { %2584 = vst.msk [vmem:[%s6112_s8 + $0xc] sm:$0xf] %vm2580_vm6, %v2487_v4  ;;  %4422 = vmatmul.msk.f32.gmra.mxu3 %vm1099_vm4, %v5215_v50 }
 0x3dd   : > { %v2509_v30 = vpop.permute.xlu2 %2508 }
 0x3de   : > { %2595 = vst.msk [vmem:[%s6112_s8 + $0x38] sm:$0xf] %vm2580_vm6, %v2509_v30  ;;  %v2491_v44 = vpop.permute.xlu1 %2490 }
 0x3df   : > { %2586 = vst.msk [vmem:[%s6112_s8 + $0x14] sm:$0xf] %vm2580_vm6, %v2491_v44 }
 0x3e0   : > { %v2495_v39 = vpop.permute.xlu0 %2494 }
 0x3e1   : > { %2588 = vst.msk [vmem:[%s6112_s8 + $0x1c] sm:$0xf] %vm2580_vm6, %v2495_v39  ;;  %4423 = vmatmul.msk.f32.gmra.mxu3 %vm1099_vm4, %v5225_v55 }
 0x3e5   : > { %v2515_v0 = vpop.permute.xlu2 %2514 }
 0x3e6   : > { %2598 = vst.msk [vmem:[%s6112_s8 + $0x44] sm:$0xf] %vm2580_vm6, %v2515_v0  ;;  %v2493_v50 = vpop.permute.xlu1 %2492 }
 0x3e7   : > { %2587 = vst.msk [vmem:[%s6112_s8 + $0x18] sm:$0xf] %vm2580_vm6, %v2493_v50 }
 0x3e8   : > { %v2501_v22 = vpop.permute.xlu0 %2500 }
 0x3e9   : > { %2591 = vst.msk [vmem:[%s6112_s8 + $0x28] sm:$0xf] %vm2580_vm6, %v2501_v22  ;;  %4424 = vmatmul.msk.f32.gmra.mxu3 %vm1099_vm4, %v5236_v60 }
 0x3ed   : > { %v2521_v36 = vpop.permute.xlu2 %2520 }
 0x3ee   : > { %2601 = vst.msk [vmem:[%s6112_s8 + $0x50] sm:$0xf] %vm2580_vm6, %v2521_v36  ;;  %v2499_v55 = vpop.permute.xlu1 %2498 }
 0x3ef   : > { %2590 = vst.msk [vmem:[%s6112_s8 + $0x24] sm:$0xf] %vm2580_vm6, %v2499_v55 }
 0x3f0   : > { %v2507_v8 = vpop.permute.xlu0 %2506 }
 0x3f1   : > { %2594 = vst.msk [vmem:[%s6112_s8 + $0x34] sm:$0xf] %vm2580_vm6, %v2507_v8  ;;  %4425 = vmatmul.msk.f32.gmra.mxu3 %vm1099_vm4, %v5337_v47 }
 0x3f5   : > { %v2527_v61 = vpop.permute.xlu2 %2526 }
 0x3f6   : > { %2604 = vst.msk [vmem:[%s6112_s8 + $0x5c] sm:$0xf] %vm2580_vm6, %v2527_v61  ;;  %v2505_v60 = vpop.permute.xlu1 %2504 }
 0x3f7   : > { %2593 = vst.msk [vmem:[%s6112_s8 + $0x30] sm:$0xf] %vm2580_vm6, %v2505_v60 }
 0x3f8   : > { %v2513_v37 = vpop.permute.xlu0 %2512 }
 0x3f9   : > { %2597 = vst.msk [vmem:[%s6112_s8 + $0x40] sm:$0xf] %vm2580_vm6, %v2513_v37  ;;  %4426 = vmatmul.msk.f32.gmra.mxu3 %vm1099_vm4, %v7050_v15 }
 0x3fd   : > { %v2533_v2 = vpop.permute.xlu2 %2532 }
 0x3fe   : > { %2607 = vst.msk [vmem:[%s6112_s8 + $0x68] sm:$0xf] %vm2580_vm6, %v2533_v2  ;;  %v2511_v47 = vpop.permute.xlu1 %2510 }
 0x3ff   : > { %2596 = vst.msk [vmem:[%s6112_s8 + $0x3c] sm:$0xf] %vm2580_vm6, %v2511_v47 }
 0x400   : > { %v2519_v62 = vpop.permute.xlu0 %2518 }
 0x401   : > { %2600 = vst.msk [vmem:[%s6112_s8 + $0x4c] sm:$0xf] %vm2580_vm6, %v2519_v62  ;;  %4427 = vmatmul.msk.f32.gmra.mxu3 %vm1099_vm4, %v7055_v23 }
 0x405   : > { %v2539_v38 = vpop.permute.xlu2 %2538 }
 0x406   : > { %2610 = vst.msk [vmem:[%s6112_s8 + $0x74] sm:$0xf] %vm2580_vm6, %v2539_v38  ;;  %v2517_v15 = vpop.permute.xlu1 %2516 }
 0x407   : > { %2599 = vst.msk [vmem:[%s6112_s8 + $0x48] sm:$0xf] %vm2580_vm6, %v2517_v15 }
 0x408   : > { %v2525_v54 = vpop.permute.xlu0 %2524 }
 0x409   : > { %2603 = vst.msk [vmem:[%s6112_s8 + $0x58] sm:$0xf] %vm2580_vm6, %v2525_v54  ;;  %4428 = vmatmul.msk.f32.gmra.mxu3 %vm1099_vm4, %v7059_v59 }
 0x40e   : > { %v2523_v4 = vpop.permute.xlu1 %2522 }
 0x40f   : > { %2602 = vst.msk [vmem:[%s6112_s8 + $0x54] sm:$0xf] %vm2580_vm6, %v2523_v4 }
 0x410   : > { %v2531_v23 = vpop.permute.xlu0 %2530 }
 0x411   : > { %2606 = vst.msk [vmem:[%s6112_s8 + $0x64] sm:$0xf] %vm2580_vm6, %v2531_v23  ;;  %4429 = vmatmul.msk.f32.gmra.mxu3 %vm1099_vm4, %v7063_v49  ;;  %v7120_v23 = vld [vmem:[#allocation84_spill] sm:$0xff] }
 0x416   : > { %v2529_v30 = vpop.permute.xlu1 %2528 }
 0x417   : > { %2605 = vst.msk [vmem:[%s6112_s8 + $0x60] sm:$0xf] %vm2580_vm6, %v2529_v30 }
 0x418   : > { %v2537_v44 = vpop.permute.xlu0 %2536 }
 0x419   : > { %2609 = vst.msk [vmem:[%s6112_s8 + $0x70] sm:$0xf] %vm2580_vm6, %v2537_v44  ;;  %4430 = vmatmul.msk.f32.gmra.mxu3 %vm1099_vm4, %v7068_v26 }
 0x41e   : > { %v2535_v59 = vpop.permute.xlu1 %2534 }
 0x41f   : > { %2608 = vst.msk [vmem:[%s6112_s8 + $0x6c] sm:$0xf] %vm2580_vm6, %v2535_v59 }
 0x420   : > { %v2543_v39 = vpop.permute.xlu0 %2542 }
 0x421   : > { %2612 = vst.msk [vmem:[%s6112_s8 + $0x7c] sm:$0xf] %vm2580_vm6, %v2543_v39  ;;  %4431 = vmatmul.msk.f32.gmra.mxu3 %vm1099_vm4, %v7072_v32  ;;  %v7121_v39 = vld [vmem:[#allocation81_spill] sm:$0xff] }
 0x426   : > { %v2541_v0 = vpop.permute.xlu1 %2540 }
 0x427   : > { %2611 = vst.msk [vmem:[%s6112_s8 + $0x78] sm:$0xf] %vm2580_vm6, %v2541_v0 }
 0x429   : > { %4432 = vmatmul.msk.f32.gmra.mxu3 %vm1099_vm4, %v7076_v41 }
 0x431   : > { %4433 = vmatmul.msk.f32.gmra.mxu3 %vm1099_vm4, %v7080_v29 }
 0x439   : > { %4434 = vmatmul.msk.f32.gmra.mxu3 %vm1099_vm4, %v7082_v56 }
 0x441   : > { %4435 = vmatmul.msk.f32.gmra.mxu3 %vm1099_vm4, %v7084_v28 }
 0x449   : > { %4436 = vmatmul.msk.f32.gmra.mxu3 %vm1099_vm4, %v5195_v40 }
 0x44c   : > { %v6220_v49 = vpop.f32.mrf.mxu3 }
 0x451   : > { %4437 = vmatmul.msk.f32.gmra.mxu3 %vm1099_vm4, %v5264_v10 }
 0x454   : > { %v6224_v26 = vpop.f32.mrf.mxu3 }
 0x455   : > { %v2907_v0 = vsub.f32 %v7121_v39, %v6224_v26 }
 0x459   : > { %4438 = vmatmul.msk.f32.gmra.mxu3 %vm1099_vm4, %v5295_v25 }
 0x45c   : > { %v6228_v32 = vpop.f32.mrf.mxu3 }
 0x45d   : > { %v2908_v30 = vsub.f32 %v7120_v23, %v6228_v32 }
 0x461   : > { %4439 = vmatmul.msk.f32.gmra.mxu3 %vm1099_vm4, %v5219_v52 }
 0x464   : > { %v6232_v56 = vpop.f32.mrf.mxu3 }
 0x465   : > { %v2909_v54 = vsub.f32 %v5844_v18, %v6232_v56  ;;  %v7122_v56 = vld [vmem:[#allocation80_spill] sm:$0xff] }
 0x469   : > { %4440 = vmatmul.msk.f32.gmra.mxu3 %vm1099_vm4, %v5308_v31 }
 0x46c   : > { %v6236_v40 = vpop.f32.mrf.mxu3 }
 0x46d   : > { %v2910_v38 = vsub.f32 %v5857_v7, %v6236_v40  ;;  %v2944_v40 = vmul.f32 1.442695, %v2909_v54  ;;  %v7132_v54 = vld [vmem:[#allocation54_spill] sm:$0xff] }
 0x46f   : > { %v2946_v44 = vmul.f32 1.442695, %v2910_v38  ;;  %v7131_v38 = vld [vmem:[#allocation20_spill] sm:$0xff] }
 0x471   : > { %4441 = vmatmul.msk.f32.gmra.mxu3 %vm1099_vm4, %v7047_v34 }
 0x474   : > { %v6240_v10 = vpop.f32.mrf.mxu3 }
 0x475   : > { %v2911_v47 = vsub.f32 %v5870_v3, %v6240_v10  ;;  %v2906_v10 = vsub.f32 %v7122_v56, %v6220_v49 }
 0x477   : > { %v2948_v4 = vmul.f32 1.442695, %v2911_v47  ;;  %v7130_v47 = vld [vmem:[#allocation19_spill] sm:$0xff] }
 0x479   : > { %4442 = vmatmul.msk.f32.gmra.mxu3 %vm1099_vm4, %v7051_v5 }
 0x47c   : > { %v2828_v25 = vpop.f32.mrf.mxu3 }
 0x47d   : > { %v2912_v37 = vsub.f32 %v5883_v14, %v2828_v25  ;;  %v2942_v25 = vmul.f32 1.442695, %v2908_v30  ;;  %v7133_v30 = vld [vmem:[#allocation18_spill] sm:$0xff] }
 0x47f   : > { %v2950_v15 = vmul.f32 1.442695, %v2912_v37 }
 0x481   : > { %4443 = vmatmul.msk.f32.gmra.mxu3 %vm1099_vm4, %v7056_v27 }
 0x484   : > { %v2831_v52 = vpop.f32.mrf.mxu3 }
 0x485   : > { %v2913_v61 = vsub.f32 %v5710_v35, %v2831_v52  ;;  %v2940_v52 = vmul.f32 1.442695, %v2907_v0  ;;  %v7134_v0 = vld [vmem:[#allocation90_spill] sm:$0xff] }
 0x487   : > { %v2952_v62 = vmul.f32 1.442695, %v2913_v61 }
 0x489   : > { %4444 = vmatmul.msk.f32.gmra.mxu3 %vm1099_vm4, %v7060_v9 }
 0x48c   : > { %v2834_v41 = vpop.f32.mrf.mxu3 }
 0x491   : > { %4445 = vmatmul.msk.f32.gmra.mxu3 %vm1099_vm4, %v7064_v43 }
 0x494   : > { %v2837_v31 = vpop.f32.mrf.mxu3 }
 0x499   : > { %4446 = vmatmul.msk.f32.gmra.mxu3 %vm1099_vm4, %v7069_v63 }
 0x49c   : > { %v2840_v34 = vpop.f32.mrf.mxu3 }
 0x4a1   : > { %4447 = vmatmul.msk.f32.gmra.mxu3 %vm1099_vm4, %v7073_v33 }
 0x4a4   : > { %v2843_v5 = vpop.f32.mrf.mxu3 }
 0x4a9   : > { %4448 = vmatmul.msk.f32.gmra.mxu3 %vm1099_vm4, %v7077_v11 }
 0x4ac   : > { %v2846_v27 = vpop.f32.mrf.mxu3 }
 0x4ad   : > { %v2918_v11 = vsub.f32 %v5768_v21, %v2846_v27 }
 0x4af   : > { %v2962_v55 = vmul.f32 1.442695, %v2918_v11 }
 0x4b1   : > { %4449 = vmatmul.msk.f32.gmra.mxu3 %vm1099_vm4, %v7081_v45  ;;  %v2917_v45 = vsub.f32 %v5756_v17, %v2843_v5 }
 0x4b3   : > { %v2960_v8 = vmul.f32 1.442695, %v2917_v45 }
 0x4b4   : > { %v2849_v9 = vpop.f32.mrf.mxu3 }
 0x4b5   : > { %v2919_v33 = vsub.f32 %v7067_v16, %v2849_v9 }
 0x4b7   : > { %v2964_v36 = vmul.f32 1.442695, %v2919_v33 }
 0x4b9   : > { %4450 = vmatmul.msk.f32.gmra.mxu3 %vm1099_vm4, %v7083_v51  ;;  %v2916_v51 = vsub.f32 %v7054_v48, %v2840_v34 }
 0x4bb   : > { %v2958_v21 = vmul.f32 1.442695, %v2916_v51 }
 0x4bc   : > { %v2852_v43 = vpop.f32.mrf.mxu3 }
 0x4bd   : > { %v2920_v63 = vsub.f32 %v5787_v6, %v2852_v43  ;;  %v2915_v6 = vsub.f32 %v5917_v53, %v2837_v31  ;;  %v2938_v31 = vmul.f32 1.442695, %v2906_v10  ;;  %v7135_v10 = vld [vmem:[#allocation89_spill] sm:$0xff] }
 0x4bf   : > { %v2966_v50 = vmul.f32 1.442695, %v2920_v63  ;;  %v2956_v60 = vmul.f32 1.442695, %v2915_v6  ;;  %v7123_v63 = vld [vmem:[#allocation60_spill] sm:$0xff] }
 0x4c1   : > { %4451 = vmatmul.msk.f32.gmra.mxu3 %vm1099_vm4, %v7085_v13 }
 0x4c4   : > { %v2855_v29 = vpop.f32.mrf.mxu3 }
 0x4c5   : > { %v2921_v28 = vsub.f32 %v5803_v57, %v2855_v29  ;;  %v2914_v57 = vsub.f32 %v5904_v42, %v2834_v41  ;;  %v7124_v29 = vld [vmem:[#allocation32_spill] sm:$0xff] }
 0x4c6   : > { %v7125_v33 = vunpack.i.l.bf16 %v7124_v29 }
 0x4c7   : > { %v2968_v22 = vmul.f32 1.442695, %v2921_v28  ;;  %v2954_v53 = vmul.f32 1.442695, %v2914_v57 }
 0x4c9   : > { %4816 = vpow2.f32 %v2968_v22 }
 0x4ca   : > { %4818 = vpow2.f32 %v2966_v50 }
 0x4cb   : > { %4820 = vpow2.f32 %v2964_v36 }
 0x4cc   : > { %v6268_v13 = vpop.f32.mrf.mxu3  ;;  %4822 = vpow2.f32 %v2962_v55 }
 0x4cd   : > { %4824 = vpow2.f32 %v2960_v8 }
 0x4ce   : > { %4826 = vpow2.f32 %v2958_v21 }
 0x4cf   : > { %v4817_v16 = vpop.eup %4816  ;;  %4828 = vpow2.f32 %v2956_v60  ;;  %v7128_v60 = vld [vmem:[#allocation28_spill] sm:$0xff] }
 0x4d0   : > { %3012 = vmatpush.msrb.mxu2 %v4817_v16  ;;  %4686 = vmatpush.msrb.mxu3 %v4817_v16  ;;  %v4819_v17 = vpop.eup %4818  ;;  %4830 = vpow2.f32 %v2954_v53  ;;  %v7126_v16 = vld [vmem:[#allocation21_spill] sm:$0xff] }
 0x4d1   : > { %v4821_v48 = vpop.eup %4820  ;;  %4832 = vpow2.f32 %v2952_v62 }
 0x4d2   : > { %3013 = vmatpush.msrb.mxu2 %v4819_v17  ;;  %4687 = vmatpush.msrb.mxu3 %v4819_v17  ;;  %v4823_v42 = vpop.eup %4822  ;;  %4834 = vpow2.f32 %v2950_v15  ;;  %v7127_v17 = vld [vmem:[#allocation75_spill] sm:$0xff] }
 0x4d3   : > { %v4825_v35 = vpop.eup %4824  ;;  %4836 = vpow2.f32 %v2948_v4 }
 0x4d4   : > { %v6274_v2 = vpop.f32.mrf.mxu3  ;;  %3014 = vmatpush.msrb.mxu2 %v4821_v48  ;;  %4688 = vmatpush.msrb.mxu3 %v4821_v48  ;;  %v4827_v14 = vpop.eup %4826  ;;  %4838 = vpow2.f32 %v2946_v44  ;;  %v7129_v48 = vld [vmem:[#allocation62_spill] sm:$0xff] }
 0x4d5   : > { %v4829_v3 = vpop.eup %4828  ;;  %4840 = vpow2.f32 %v2944_v40 }
 0x4d6   : > { %3015 = vmatpush.msrb.mxu2 %v4823_v42  ;;  %4689 = vmatpush.msrb.mxu3 %v4823_v42  ;;  %v4831_v7 = vpop.eup %4830  ;;  %4842 = vpow2.f32 %v2942_v25 }
 0x4d7   : > { %v4833_v18 = vpop.eup %4832  ;;  %4844 = vpow2.f32 %v2940_v52 }
 0x4d8   : > { %3016 = vmatpush.msrb.mxu2 %v4825_v35  ;;  %4690 = vmatpush.msrb.mxu3 %v4825_v35  ;;  %v4835_v32 = vpop.eup %4834  ;;  %4846 = vpow2.f32 %v2938_v31 }
 0x4d9   : > { %v4837_v41 = vpop.eup %4836 }
 0x4da   : > { %3017 = vmatpush.msrb.mxu2 %v4827_v14  ;;  %4691 = vmatpush.msrb.mxu3 %v4827_v14  ;;  %v4839_v34 = vpop.eup %4838 }
 0x4db   : > { %v4841_v49 = vpop.eup %4840 }
 0x4dc   : > { %v6284_v59 = vpop.f32.mrf.mxu3  ;;  %3018 = vmatpush.msrb.mxu2 %v4829_v3  ;;  %4692 = vmatpush.msrb.mxu3 %v4829_v3  ;;  %v4843_v5 = vpop.eup %4842 }
 0x4dd   : > { %v4845_v27 = vpop.eup %4844 }
 0x4de   : > { %3019 = vmatpush.msrb.mxu2 %v4831_v7  ;;  %4693 = vmatpush.msrb.mxu3 %v4831_v7  ;;  %v4847_v43 = vpop.eup %4846 }
 0x4e0   : > { %3020 = vmatpush.msrb.mxu2 %v4833_v18  ;;  %4694 = vmatpush.msrb.mxu3 %v4833_v18 }
 0x4e2   : > { %3021 = vmatpush.msrb.mxu2 %v4835_v32  ;;  %4695 = vmatpush.msrb.mxu3 %v4835_v32 }
 0x4e4   : > { %v6290_v26 = vpop.f32.mrf.mxu3  ;;  %3022 = vmatpush.msrb.mxu2 %v4837_v41  ;;  %4696 = vmatpush.msrb.mxu3 %v4837_v41  ;;  %v7136_v41 = vld [vmem:[#allocation88_spill] sm:$0xff] }
 0x4e6   : > { %3023 = vmatpush.msrb.mxu2 %v4839_v34  ;;  %4697 = vmatpush.msrb.mxu3 %v4839_v34 }
 0x4e8   : > { %3024 = vmatpush.msrb.mxu2 %v4841_v49  ;;  %4698 = vmatpush.msrb.mxu3 %v4841_v49 }
 0x4ea   : > { %3025 = vmatpush.msrb.mxu2 %v4843_v5  ;;  %4699 = vmatpush.msrb.mxu3 %v4843_v5  ;;  %v7137_v5 = vld [vmem:[#allocation87_spill] sm:$0xff] }
 0x4ec   : > { %v6292_v9 = vpop.f32.mrf.mxu3  ;;  %3026 = vmatpush.msrb.mxu2 %v4845_v27  ;;  %4700 = vmatpush.msrb.mxu3 %v4845_v27 }
 0x4ed   : > { %v2926_v27 = vsub.f32 %v7137_v5, %v6292_v9 }
 0x4ee   : > { %3027 = vmatpush.msrb.mxu2 %v4847_v43  ;;  %4701 = vmatpush.msrb.mxu3 %v4847_v43 }
 0x4ef   : > { %3028 = vmatmul.f32.vlgmr.msrb.gmra.mxu2 %v4803_v58  ;;  %3031 = vmatmul.f32.vlgmr.msrb.gmra.mxu3 %v7125_v33 }
 0x4f4   : > { %v2873_v28 = vpop.f32.mrf.mxu3 }
 0x4f5   : > { %v2927_v31 = vsub.f32 %v7136_v41, %v2873_v28 }
 0x4fc   : > { %v2876_v11 = vpop.f32.mrf.mxu3 }
 0x4fd   : > { %v2928_v25 = vsub.f32 %v7135_v10, %v2876_v11  ;;  %v7138_v11 = vld [vmem:[#allocation86_spill] sm:$0xff] }
 0x4ff   : > { %v2982_v43 = vmul.f32 1.442695, %v2928_v25 }
 0x504   : > { %v2879_v50 = vpop.f32.mrf.mxu3 }
 0x505   : > { %v2929_v40 = vsub.f32 %v7134_v0, %v2879_v50  ;;  %v2925_v50 = vsub.f32 %v7138_v11, %v6290_v26 }
 0x507   : > { %v2984_v34 = vmul.f32 1.442695, %v2929_v40 }
 0x50c   : > { %v2882_v22 = vpop.f32.mrf.mxu3 }
 0x50d   : > { %v2930_v44 = vsub.f32 %v7133_v30, %v2882_v22  ;;  %v2980_v22 = vmul.f32 1.442695, %v2927_v31 }
 0x50f   : > { %v2986_v32 = vmul.f32 1.442695, %v2930_v44 }
 0x514   : > { %v2885_v45 = vpop.f32.mrf.mxu3 }
 0x515   : > { %v2931_v4 = vsub.f32 %v7132_v54, %v2885_v45  ;;  %v7139_v45 = vld [vmem:[#allocation85_spill] sm:$0xff] }
 0x517   : > { %v2988_v18 = vmul.f32 1.442695, %v2931_v4 }
 0x51c   : > { %v2888_v36 = vpop.f32.mrf.mxu3 }
 0x51d   : > { %v2932_v15 = vsub.f32 %v7131_v38, %v2888_v36  ;;  %v2924_v36 = vsub.f32 %v7139_v45, %v6284_v59 }
 0x51f   : > { %v2990_v7 = vmul.f32 1.442695, %v2932_v15  ;;  %v3002_v15 = vld [vmem:[#allocation5] sm:$0xff] }
 0x524   : > { %v2891_v51 = vpop.f32.mrf.mxu3 }
 0x525   : > { %v2933_v62 = vsub.f32 %v7130_v47, %v2891_v51  ;;  %v2978_v51 = vmul.f32 1.442695, %v2926_v27  ;;  %v3008_v47 = vmul.f32 1.442695, %v3005_v1 }
 0x527   : > { %v2992_v3 = vmul.f32 1.442695, %v2933_v62  ;;  %v3006_v62 = vmul.f32 1.442695, %v3004_v24 }
 0x52c   : > { %v2894_v55 = vpop.f32.mrf.mxu3 }
 0x52d   : > { %v2934_v37 = vsub.f32 %v7129_v48, %v2894_v55  ;;  %v7140_v55 = vld [vmem:[#allocation83_spill] sm:$0xff] }
 0x52f   : > { %v2994_v14 = vmul.f32 1.442695, %v2934_v37 }
 0x534   : > { %v2897_v6 = vpop.f32.mrf.mxu3 }
 0x535   : > { %v2935_v61 = vsub.f32 %v7127_v17, %v2897_v6  ;;  %v2923_v6 = vsub.f32 %v7140_v55, %v6274_v2 }
 0x537   : > { %v2996_v35 = vmul.f32 1.442695, %v2935_v61  ;;  %v2972_v17 = vmul.f32 1.442695, %v2923_v6 }
 0x53c   : > { %v2900_v8 = vpop.f32.mrf.mxu3 }
 0x53d   : > { %v2936_v57 = vsub.f32 %v7126_v16, %v2900_v8  ;;  %v2976_v8 = vmul.f32 1.442695, %v2925_v50  ;;  %v7141_v16 = vld [vmem:[#allocation82_spill] sm:$0xff] }
 0x53f   : > { %v2998_v53 = vmul.f32 1.442695, %v2936_v57  ;;  %v2922_v57 = vsub.f32 %v7141_v16, %v6268_v13 }
 0x544   : > { %v2903_v21 = vpop.f32.mrf.mxu3 }
 0x545   : > { %v2937_v58 = vsub.f32 %v7128_v60, %v2903_v21  ;;  %v2974_v21 = vmul.f32 1.442695, %v2924_v36  ;;  %v2970_v60 = vmul.f32 1.442695, %v2922_v57 }
 0x547   : > { %v3000_v42 = vmul.f32 1.442695, %v2937_v58 }
 0x549   : > { %4848 = vpow2.f32 %v3000_v42  ;;  %v7143_v42 = vunpack.i.h.bf16 %v7124_v29 }
 0x54a   : > { %4850 = vpow2.f32 %v2998_v53  ;;  %v7142_v53 = vunpack.i.h.bf16 %v7123_v63 }
 0x54b   : > { %4852 = vpow2.f32 %v2996_v35 }
 0x54c   : > { %4854 = vpow2.f32 %v2994_v14  ;;  %v3003_v14 = vld [vmem:[#allocation5 + $0x8] sm:$0xff] }
 0x54d   : > { %4856 = vpow2.f32 %v2992_v3 }
 0x54e   : > { %4858 = vpow2.f32 %v2990_v7 }
 0x54f   : > { %v4849_v23 = vpop.eup %4848  ;;  %4860 = vpow2.f32 %v2988_v18 }
 0x550   : > { %3035 = vmatpush.msrb.mxu0 %v4849_v23  ;;  %4702 = vmatpush.msrb.mxu1 %v4849_v23  ;;  %v4851_v39 = vpop.eup %4850  ;;  %4862 = vpow2.f32 %v2986_v32 }
 0x551   : > { %v4853_v56 = vpop.eup %4852  ;;  %4864 = vpow2.f32 %v2984_v34 }
 0x552   : > { %3036 = vmatpush.msrb.mxu0 %v4851_v39  ;;  %4703 = vmatpush.msrb.mxu1 %v4851_v39  ;;  %v4855_v52 = vpop.eup %4854  ;;  %4866 = vpow2.f32 %v2982_v43 }
 0x553   : > { %v4857_v49 = vpop.eup %4856  ;;  %4868 = vpow2.f32 %v2980_v22 }
 0x554   : > { %3037 = vmatpush.msrb.mxu0 %v4853_v56  ;;  %4704 = vmatpush.msrb.mxu1 %v4853_v56  ;;  %v4859_v33 = vpop.eup %4858  ;;  %4870 = vpow2.f32 %v2978_v51 }
 0x555   : > { %v4861_v28 = vpop.eup %4860  ;;  %4872 = vpow2.f32 %v2976_v8 }
 0x556   : > { %3038 = vmatpush.msrb.mxu0 %v4855_v52  ;;  %4705 = vmatpush.msrb.mxu1 %v4855_v52  ;;  %v4863_v9 = vpop.eup %4862  ;;  %4874 = vpow2.f32 %v2974_v21 }
 0x557   : > { %v4865_v26 = vpop.eup %4864  ;;  %4876 = vpow2.f32 %v2972_v17 }
 0x558   : > { %3039 = vmatpush.msrb.mxu0 %v4857_v49  ;;  %4706 = vmatpush.msrb.mxu1 %v4857_v49  ;;  %v4867_v59 = vpop.eup %4866  ;;  %4878 = vpow2.f32 %v2970_v60 }
 0x559   : > { %v4869_v61 = vpop.eup %4868  ;;  %4880 = vpow2.f32 %v3008_v47 }
 0x55a   : > { %3040 = vmatpush.msrb.mxu0 %v4859_v33  ;;  %4707 = vmatpush.msrb.mxu1 %v4859_v33  ;;  %v4871_v2 = vpop.eup %4870  ;;  %4882 = vpow2.f32 %v3006_v62 }
 0x55b   : > { %v4873_v58 = vpop.eup %4872 }
 0x55c   : > { %3041 = vmatpush.msrb.mxu0 %v4861_v28  ;;  %4708 = vmatpush.msrb.mxu1 %v4861_v28  ;;  %v4875_v13 = vpop.eup %4874 }
 0x55d   : > { %v4877_v48 = vpop.eup %4876 }
 0x55e   : > { %3042 = vmatpush.msrb.mxu0 %v4863_v9  ;;  %4709 = vmatpush.msrb.mxu1 %v4863_v9  ;;  %v4879_v37 = vpop.eup %4878 }
 0x55f   : > { %v4881_v35 = vpop.eup %4880 }
 0x560   : > { %3043 = vmatpush.msrb.mxu0 %v4865_v26  ;;  %4710 = vmatpush.msrb.mxu1 %v4865_v26  ;;  %v4883_v38 = vpop.eup %4882  ;;  %v3011_v30 = vmul.f32 %v4881_v35, %v3003_v14 }
 0x561   : > { %v3010_v29 = vmul.f32 %v4883_v38, %v3002_v15 }
 0x562   : > { %3044 = vmatpush.msrb.mxu0 %v4867_v59  ;;  %4711 = vmatpush.msrb.mxu1 %v4867_v59 }
 0x564   : > { %3045 = vmatpush.msrb.mxu0 %v4869_v61  ;;  %4712 = vmatpush.msrb.mxu1 %v4869_v61 }
 0x566   : > { %3046 = vmatpush.msrb.mxu0 %v4871_v2  ;;  %4713 = vmatpush.msrb.mxu1 %v4871_v2 }
 0x568   : > { %3047 = vmatpush.msrb.mxu0 %v4873_v58  ;;  %4714 = vmatpush.msrb.mxu1 %v4873_v58 }
 0x56a   : > { %3048 = vmatpush.msrb.mxu0 %v4875_v13  ;;  %4715 = vmatpush.msrb.mxu1 %v4875_v13 }
 0x56c   : > { %3049 = vmatpush.msrb.mxu0 %v4877_v48  ;;  %4716 = vmatpush.msrb.mxu1 %v4877_v48 }
 0x56e   : > { %3050 = vmatpush.msrb.mxu0 %v4879_v37  ;;  %4717 = vmatpush.msrb.mxu1 %v4879_v37 }
 0x56f   : > { %3051 = vmatmul.f32.vlgmr.msrb.gmra.mxu0 %v7142_v53  ;;  %3054 = vmatmul.f32.vlgmr.msrb.gmra.mxu1 %v7143_v42 }
 0x572   : > { %v3029_v54 = vpop.f32.mrf.mxu2  ;;  %v3032_v63 = vpop.f32.mrf.mxu3 }
 0x5ec   : > { %v3052_v4 = vpop.f32.mrf.mxu0  ;;  %v3055_v3 = vpop.f32.mrf.mxu1 }
 0x5ed   : > { %v3053_v23 = vadd.f32 %v3052_v4, %v3029_v54  ;;  %v3056_v44 = vadd.f32 %v3055_v3, %v3032_v63 }
 0x5ef   : > { %v3058_v46 = vadd.f32 %v3053_v23, %v3010_v29  ;;  %v3059_v20 = vadd.f32 %v3056_v44, %v3011_v30 }
 0x5f1   : > { %3061 = vst.msk [vmem:[#allocation5] sm:$0xff] %vm3060_vm2, %v3058_v46 }
 0x5f2   : > { %3062 = vst.msk [vmem:[#allocation5 + $0x8] sm:$0xff] %vm3060_vm2, %v3059_v20 }
 0x5f3 PF: > { %p4452_p10 = scmp.ne.s32.totalorder %s4924_s1, 1 }
 0x5f4   : > { %p4453_p11 = scmp.ne.s32.totalorder (!%p4452_p10), %s4920_s26, 0 }
 0x5f5   : > { %3068 = sbr.rel (%p4452_p10) target bundleno = 2721 (0xaa1), region = 132 }
 0x5fa   : > { %3072 = sbr.rel (%p4453_p11) target bundleno = 1681 (0x691), region = 136  ;;  %s4942_s1 = smov (!%p4453_p11), 1  }
 0x5ff   : > { %v3073_v1 = vld [vmem:[#allocation5] sm:$0xff]  ;;  %v3074_v12 = vld [vmem:[#allocation5 + $0x8] sm:$0xff]  ;;  %v3077_v39 = vld [vmem:[#allocation4] sm:$0xff]  ;;  %vm3111_vm7 = vcmask 254976   ;;  %v4943_v33 = vmov 0.0   ;;  %vm3103_vm3 = vcmask 7168  }
 0x600   : > { %vm3075_vm4 = vcmp.gt.f32.partialorder %v3073_v1, 0.0  ;;  %vm3076_vm5 = vcmp.gt.f32.partialorder %v3074_v12, 0.0  ;;  %v3078_v40 = vld [vmem:[#allocation4 + $0x8] sm:$0xff]  ;;  %3112 = vst.msk [vmem:[#allocation9] sm:$0x3] %vm3111_vm7, %v4943_v33  ;;  %vm3108_vm8 = vcmask 11264  }
 0x601   : > { %v3079_v19 = vsel %vm3075_vm4, %v3073_v1, 1.0  ;;  %v3080_v24 = vsel %vm3076_vm5, %v3074_v12, 1.0 }
 0x602   : > { %4891 = vlog2.f32 %v3079_v19 }
 0x603   : > { %4893 = vlog2.f32 %v3080_v24 }
 0x608   : > { %v4892_v7 = vpop.eup %4891 }
 0x609   : > { %v4894_v0 = vpop.eup %4893  ;;  %v3082_v18 = vmul.f32 0.6931472, %v4892_v7 }
 0x60a   : > { %v3084_v56 = vmul.f32 0.6931472, %v4894_v0 }
 0x60b   : > { %v3085_v10 = vadd.f32 %v3082_v18, %v3077_v39 }
 0x60c   : > { %v3086_v25 = vadd.f32 %v3084_v56, %v3078_v40 }
 0x60d   : > { %v3087_v32 = vsel %vm3075_vm4, %v3085_v10, 0.0 }
 0x60e   : > { %v3088_v52 = vsel %vm3076_vm5, %v3086_v25, 0.0  ;;  %v3089_v41 = vpack.c.bf16 %v3087_v32, %v3087_v32 }
 0x60f   : > { %v3090_v31 = vpack.c.bf16 %v3088_v52, %v3088_v52 }
 0x610   : > { %v3091_v34 = vunpack.c.l.bf16 %v3089_v41 }
 0x611   : > { %v3092_v49 = vunpack.c.l.bf16 %v3090_v31 }
 0x612   : > { %v3093_v5 = vsub.f32 %v3087_v32, %v3091_v34 }
 0x613   : > { %v3094_v27 = vsub.f32 %v3088_v52, %v3092_v49 }
 0x615   : > { %v4886_v43 = vpack.i.bf16 %v3094_v27, %v3093_v5 }
 0x617   : > { %4887 = vrot.lane.b32.xlu0 %v4886_v43, %s4942_s1 }
 0x689   : > { %v4888_v11 = vpop.permute.xlu0 %4887 }
 0x68a   : > { %v4890_v50 = vunpack.i.h.bf16 %v4888_v11  ;;  %v4889_v22 = vunpack.i.l.bf16 %v4888_v11 }
 0x68c   : > { %v3105_v28 = vsel %vm3103_vm3, %v3092_v49, %v4890_v50  ;;  %v3104_v45 = vsel %vm3103_vm3, %v3091_v34, %v4889_v22 }
 0x68d   : > { %v3107_v36 = vpack.c.bf16 %v3105_v28, %v3105_v28  ;;  %v3106_v51 = vpack.c.bf16 %v3104_v45, %v3104_v45 }
 0x68f   : > { %3110 = vst.msk [vmem:[#allocation8 + $0x4] sm:$0xf] %vm3108_vm8, %v3107_v36 }
 0x690   : > { %3109 = vst.msk [vmem:[#allocation8] sm:$0xf] %vm3108_vm8, %v3106_v51 }
 0x691 PF: > { %v4648_v55 = vld [vmem:[%s5138_s22] sm:$0xff]  ;;  %v4654_v6 = vld [vmem:[%s5138_s22 + $0x30] sm:$0xff]  ;;  %vm3233_vm9 = vcmask 130048   ;;  %v4659_v8 = vld [vmem:[%s5138_s22 + $0x58] sm:$0xff]  ;;  %s4944_s12 = smov 127   ;;  %s3531_s5 = sshra.s32 %s4920_s26, 1 }
 0x692   : > { %v4655_v26 = vld [vmem:[%s5138_s22 + $0x38] sm:$0xff]  ;;  %v4649_v16 = vld [vmem:[%s5138_s22 + $0x8] sm:$0xff]  ;;  %v4660_v57 = vld [vmem:[%s5138_s22 + $0x60] sm:$0xff]  ;;  %s3534_s2 = sand.u32 1, %s4920_s26  ;;  %s4665_s30 = sshll.u32 %s3531_s5, 2  ;;  %vm3607_vm10 = vcmask 1040384  }
 0x693   : > { %v4656_v21 = vld [vmem:[%s5138_s22 + $0x40] sm:$0xff]  ;;  %v4650_v59 = vld [vmem:[%s5138_s22 + $0x10] sm:$0xff]  ;;  %v4661_v17 = vld [vmem:[%s5138_s22 + $0x68] sm:$0xff]  ;;  %s3537_s20 = sadd.s32 %s4665_s30, %s3534_s2  ;;  %vm3619_vm11 = vcmask 1041408   ;;  %vm3791_vm12 = vcmask 254976   ;;  %p4605_p12 = scmp.ne.s32.totalorder %s4920_s26, 1 }
 0x694   : > { %v4657_v61 = vld [vmem:[%s5138_s22 + $0x48] sm:$0xff]  ;;  %v4651_v60 = vld [vmem:[%s5138_s22 + $0x18] sm:$0xff]  ;;  %v4662_v2 = vld [vmem:[%s5138_s22 + $0x70] sm:$0xff]  ;;  %s3538_s21 = scalar_lea.vmem [#allocation6], %s3537_s20  ;;  %s7146_s0 = sld [smem:[#allocation102_spill]] (!%p4605_p12) }
 0x695   : > { %v4658_v58 = vld [vmem:[%s5138_s22 + $0x50] sm:$0xff]  ;;  %v4652_v13 = vld [vmem:[%s5138_s22 + $0x20] sm:$0xff]  ;;  %v4663_v48 = vld [vmem:[%s5138_s22 + $0x78] sm:$0xff]  ;;  %s7147_s1 = sld [smem:[#allocation103_spill]] (!%p4605_p12) }
 0x696   : > { %v4653_v37 = vld [vmem:[%s5138_s22 + $0x28] sm:$0xff]  ;;  %s7144_s22 = sshll.u32 %s4920_s26, 8 }
 0x697   : > { %v4664_v9 = vld [vmem:[#allocation8] sm:$0xff]  ;;  %s3632_s25 = sshra.s32 %s7144_s22, 3  ;;  %s7148_s22 = sld [smem:[#allocation104_spill]] (!%p4605_p12) }
 0x698   : > { %3289 = vmatpush.bf16.msra.mxu0 %v4664_v9  ;;  %4718 = vmatpush.bf16.msra.mxu1 %v4664_v9  ;;  %s4540_s27 = sshll.u32 %s3632_s25, 2 }
 0x699   : > { %4719 = vmatpush.bf16.msra.mxu3 %v4664_v9  ;;  %s6517_s24 = scalar_lea.vmem [#allocation7], %s4540_s27 }
 0x69b   : > { %4522 = vmatmul.msk.bf16.vlgmr.msra.gmra.mxu0 %vm3233_vm9, %v4648_v55  ;;  %4528 = vmatmul.msk.bf16.vlgmr.msra.gmra.mxu1 %vm3233_vm9, %v4654_v6 }
 0x69c   : > { %4533 = vmatmul.msk.bf16.vlgmr.msra.gmra.mxu3 %vm3233_vm9, %v4659_v8 }
 0x6ab   : > { %4529 = vmatmul.msk.bf16.gmra.mxu1 %vm3233_vm9, %v4655_v26  ;;  %4523 = vmatmul.msk.bf16.gmra.mxu0 %vm3233_vm9, %v4649_v16 }
 0x6ac   : > { %4534 = vmatmul.msk.bf16.gmra.mxu3 %vm3233_vm9, %v4660_v57 }
 0x6bb   : > { %4530 = vmatmul.msk.bf16.gmra.mxu1 %vm3233_vm9, %v4656_v21  ;;  %4524 = vmatmul.msk.bf16.gmra.mxu0 %vm3233_vm9, %v4650_v59 }
 0x6bc   : > { %4535 = vmatmul.msk.bf16.gmra.mxu3 %vm3233_vm9, %v4661_v17 }
 0x6cb   : > { %4531 = vmatmul.msk.bf16.gmra.mxu1 %vm3233_vm9, %v4657_v61  ;;  %4525 = vmatmul.msk.bf16.gmra.mxu0 %vm3233_vm9, %v4651_v60 }
 0x6cc   : > { %4536 = vmatmul.msk.bf16.gmra.mxu3 %vm3233_vm9, %v4662_v2 }
 0x6db   : > { %4532 = vmatmul.msk.bf16.gmra.mxu1 %vm3233_vm9, %v4658_v58  ;;  %4526 = vmatmul.msk.bf16.gmra.mxu0 %vm3233_vm9, %v4652_v13 }
 0x6dc   : > { %4537 = vmatmul.msk.bf16.gmra.mxu3 %vm3233_vm9, %v4663_v48 }
 0x6eb   : > { %4527 = vmatmul.msk.bf16.gmra.mxu0 %vm3233_vm9, %v4653_v37 }
 0x718   : > { %v6365_v53 = vpop.f32.mrf.mxu0  ;;  %v6367_v42 = vpop.f32.mrf.mxu1 }
 0x719   : > { %3403 = vrot.lane.b32.xlu0 %v6365_v53, %s4944_s12 }
 0x71f   : > { %v6371_v47 = vpop.f32.mrf.mxu3 }
 0x720   : > { %v6373_v62 = vpop.f32.mrf.mxu0  ;;  %v6375_v35 = vpop.f32.mrf.mxu1 }
 0x721   : > { %3447 = vrot.lane.b32.xlu0 %v6371_v47, %s4944_s12  ;;  %3405 = vrot.lane.b32.xlu1 %v6373_v62, %s4944_s12 }
 0x727   : > { %v6381_v38 = vpop.f32.mrf.mxu3 }
 0x728   : > { %3449 = vrot.lane.b32.xlu2 %v6381_v38, %s4944_s12  ;;  %v6385_v15 = vpop.f32.mrf.mxu1  ;;  %v6387_v14 = vpop.f32.mrf.mxu0 }
 0x72f   : > { %v6389_v54 = vpop.f32.mrf.mxu3 }
 0x730   : > { %3451 = vrot.lane.b32.xlu1 %v6389_v54, %s4944_s12  ;;  %3407 = vrot.lane.b32.xlu2 %v6387_v14, %s4944_s12  ;;  %v6395_v63 = vpop.f32.mrf.mxu1  ;;  %v6397_v4 = vpop.f32.mrf.mxu0 }
 0x737   : > { %v6399_v3 = vpop.f32.mrf.mxu3 }
 0x738   : > { %3453 = vrot.lane.b32.xlu0 %v6399_v3, %s4944_s12  ;;  %3409 = vrot.lane.b32.xlu1 %v6397_v4, %s4944_s12  ;;  %v3331_v29 = vpop.f32.mrf.mxu1  ;;  %v6405_v23 = vpop.f32.mrf.mxu0 }
 0x73f   : > { %v6407_v30 = vpop.f32.mrf.mxu3 }
 0x740   : > { %3435 = vrot.lane.b32.xlu0 %v3331_v29, %s4944_s12  ;;  %3455 = vrot.lane.b32.xlu2 %v6407_v30, %s4944_s12  ;;  %v3333_v44 = vpop.f32.mrf.mxu1  ;;  %v6412_v46 = vpop.f32.mrf.mxu0 }
 0x741   : > { %3437 = vrot.lane.b32.xlu1 %v3333_v44, %s4944_s12 }
 0x747   : > { %v6415_v20 = vpop.f32.mrf.mxu3 }
 0x748   : > { %3411 = vrot.lane.b32.xlu0 %v6405_v23, %s4944_s12  ;;  %3413 = vrot.lane.b32.xlu2 %v6412_v46, %s4944_s12  ;;  %v6421_v1 = vpop.f32.mrf.mxu1  ;;  %v6423_v12 = vpop.f32.mrf.mxu0 }
 0x749   : > { %3457 = vrot.lane.b32.xlu1 %v6415_v20, %s4944_s12 }
 0x74f   : > { %v6427_v19 = vpop.f32.mrf.mxu3 }
 0x750   : > { %3459 = vrot.lane.b32.xlu0 %v6427_v19, %s4944_s12  ;;  %3439 = vrot.lane.b32.xlu2 %v6421_v1, %s4944_s12  ;;  %v6433_v24 = vpop.f32.mrf.mxu1  ;;  %v6435_v7 = vpop.f32.mrf.mxu0 }
 0x751   : > { %3415 = vrot.lane.b32.xlu1 %v6423_v12, %s4944_s12 }
 0x757   : > { %v6447_v40 = vpop.f32.mrf.mxu3 }
 0x758   : > { %3441 = vrot.lane.b32.xlu0 %v6433_v24, %s4944_s12  ;;  %v6441_v39 = vpop.f32.mrf.mxu1  ;;  %v6443_v0 = vpop.f32.mrf.mxu0 }
 0x759   : > { %3443 = vrot.lane.b32.xlu2 %v6441_v39, %s4944_s12 }
 0x75f   : > { %v6459_v10 = vpop.f32.mrf.mxu3 }
 0x760   : > { %3417 = vrot.lane.b32.xlu0 %v6435_v7, %s4944_s12  ;;  %v6451_v18 = vpop.f32.mrf.mxu1  ;;  %v6457_v56 = vpop.f32.mrf.mxu0 }
 0x761   : > { %3445 = vrot.lane.b32.xlu1 %v6451_v18, %s4944_s12  ;;  %3419 = vrot.lane.b32.xlu2 %v6443_v0, %s4944_s12 }
 0x767   : > { %v6469_v32 = vpop.f32.mrf.mxu3 }
 0x768   : > { %3429 = vrot.lane.b32.xlu0 %v6375_v35, %s4944_s12  ;;  %v6467_v25 = vpop.f32.mrf.mxu0 }
 0x769   : > { %3461 = vrot.lane.b32.xlu2 %v6447_v40, %s4944_s12  ;;  %3421 = vrot.lane.b32.xlu1 %v6457_v56, %s4944_s12 }
 0x770   : > { %3465 = vrot.lane.b32.xlu0 %v6469_v32, %s4944_s12  ;;  %v6477_v52 = vpop.f32.mrf.mxu0 }
 0x771   : > { %3431 = vrot.lane.b32.xlu2 %v6385_v15, %s4944_s12  ;;  %3427 = vrot.lane.b32.xlu1 %v6367_v42, %s4944_s12 }
 0x778   : > { %3423 = vrot.lane.b32.xlu0 %v6467_v25, %s4944_s12 }
 0x779   : > { %3463 = vrot.lane.b32.xlu1 %v6459_v10, %s4944_s12  ;;  %3425 = vrot.lane.b32.xlu2 %v6477_v52, %s4944_s12 }
 0x781   : > { %3433 = vrot.lane.b32.xlu1 %v6395_v63, %s4944_s12  ;;  %s7145_s12 = sld [smem:[#allocation101_spill]] (!%p4605_p12) }
 0x782   : > { %v3450_v34 = vpop.permute.xlu2 %3449 }
 0x78a   : > { %v3408_v33 = vpop.permute.xlu2 %3407 }
 0x78b   : > { %v3404_v41 = vpop.permute.xlu0 %3403  ;;  %v3501_v11 = vadd.f32 %v3408_v33, %v6387_v14  ;;  %v4670_v33 = vld [vmem:[%s6517_s24 + $0x20] sm:$0xff] }
 0x78c   : > { %v3499_v31 = vadd.f32 %v3404_v41, %v6365_v53  ;;  %v3522_v41 = vadd.f32 %v3450_v34, %v6381_v38 }
 0x793   : > { %v3406_v49 = vpop.permute.xlu1 %3405  ;;  %v3448_v27 = vpop.permute.xlu0 %3447 }
 0x794   : > { %v3500_v5 = vadd.f32 %v3406_v49, %v6373_v62 }
 0x79a   : > { %3540 = vxpose.xlu0.b32.start [1/16] (narrow) %v3499_v31, 8  ;;  %v6492_v22 = vpop.permute.xlu2 %3455 }
 0x7a2   : > { %v3452_v43 = vpop.permute.xlu1 %3451  ;;  %3541 = vxpose.xlu0.b32.cont [2/16] (narrow) %v3500_v5, 8  ;;  %v3414_v55 = vpop.permute.xlu2 %3413  ;;  %v4672_v5 = vld [vmem:[%s6517_s24 + $0x30] sm:$0xff] }
 0x7a3   : > { %v3504_v59 = vadd.f32 %v3414_v55, %v6412_v46  ;;  %v3523_v31 = vadd.f32 %v3452_v43, %v6389_v54  ;;  %v4673_v54 = vld [vmem:[%s6517_s24 + $0x38] sm:$0xff] }
 0x7a4   : > { %3764 = vmatpush.bf16.msrb.mxu1 %v4673_v54 }
 0x7a8   : > { %3765 = vmatpush.bf16.msrb.mxu1 %v4672_v5 }
 0x7aa   : > { %v6490_v50 = vpop.permute.xlu0 %3453  ;;  %3542 = vxpose.xlu0.b32.cont [3/16] (narrow) %v3501_v11, 8  ;;  %v3410_v28 = vpop.permute.xlu1 %3409  ;;  %v4681_v11 = vld [vmem:[%s6517_s24 + $0x78] sm:$0xff] }
 0x7ab   : > { %v3502_v45 = vadd.f32 %v3410_v28, %v6397_v4  ;;  %v3440_v57 = vpop.permute.xlu2 %3439  ;;  %3777 = vmatpush.bf16.msra.mxu2 %v4681_v11  ;;  %v4677_v28 = vld [vmem:[%s6517_s24 + $0x58] sm:$0xff] }
 0x7ac   : > { %v3517_v17 = vadd.f32 %v3440_v57, %v6421_v1 }
 0x7b2   : > { %v3436_v36 = vpop.permute.xlu0 %3435  ;;  %3543 = vxpose.xlu0.b32.cont [4/16] (narrow) %v3502_v45, 8  ;;  %v4676_v45 = vld [vmem:[%s6517_s24 + $0x50] sm:$0xff] }
 0x7b3   : > { %v3515_v51 = vadd.f32 %v3436_v36, %v3331_v29  ;;  %v3438_v9 = vpop.permute.xlu1 %3437  ;;  %v3444_v61 = vpop.permute.xlu2 %3443  ;;  %v4675_v36 = vld [vmem:[%s6517_s24 + $0x48] sm:$0xff] }
 0x7b4   : > { %v3516_v8 = vadd.f32 %v3438_v9, %v3333_v44  ;;  %v3519_v53 = vadd.f32 %v3444_v61, %v6441_v39  ;;  %v4674_v9 = vld [vmem:[%s6517_s24 + $0x40] sm:$0xff] }
 0x7b5   : > { %3572 = vxpose.xlu2.b32.start [1/16] (narrow) %v3515_v51, 8  ;;  %v4666_v51 = vld [vmem:[%s6517_s24] sm:$0xff] }
 0x7ba   : > { %v3412_v6 = vpop.permute.xlu0 %3411 }
 0x7bb   : > { %v3503_v26 = vadd.f32 %v3412_v6, %v6405_v23  ;;  %v3458_v16 = vpop.permute.xlu1 %3457  ;;  %v3420_v48 = vpop.permute.xlu2 %3419 }
 0x7bc   : > { %v3507_v29 = vadd.f32 %v3420_v48, %v6443_v0 }
 0x7bd   : > { %3544 = vxpose.xlu0.b32.cont [5/16] (narrow) %v3503_v26, 8  ;;  %3573 = vxpose.xlu2.b32.cont [2/16] (narrow) %v3516_v8, 8  ;;  %v3539_v26 = vld [vmem:[%s3538_s21] ss:$2 sm:$0x3] }
 0x7c2   : > { %v6496_v21 = vpop.permute.xlu0 %3459 }
 0x7c3   : > { %v3416_v60 = vpop.permute.xlu1 %3415  ;;  %v3462_v44 = vpop.permute.xlu2 %3461 }
 0x7c4   : > { %v3505_v58 = vadd.f32 %v3416_v60, %v6423_v12  ;;  %v3521_v12 = vadd.f32 %v3448_v27, %v6371_v47  ;;  %v4671_v27 = vld [vmem:[%s6517_s24 + $0x28] sm:$0xff] }
 0x7c5   : > { %3545 = vxpose.xlu0.b32.cont [6/16] (narrow) %v3504_v59, 8  ;;  %3574 = vxpose.xlu2.b32.cont [3/16] (narrow) %v3517_v17, 8  ;;  %v3613_v59 = vld [vmem:[%s5143_s18] sm:$0x3] }
 0x7c6   : > { %3766 = vmatpush.bf16.msrb.mxu1 %v4671_v27  ;;  %v3614_v60 = vunpack.c.l.bf16 %v3613_v59 }
 0x7ca   : > { %v3442_v2 = vpop.permute.xlu0 %3441  ;;  %3767 = vmatpush.bf16.msrb.mxu1 %v4670_v33 }
 0x7cb   : > { %v3518_v13 = vadd.f32 %v3442_v2, %v6433_v24 }
 0x7cd   : > { %3546 = vxpose.xlu0.b32.cont [7/16] (narrow) %v3505_v58, 8  ;;  %3575 = vxpose.xlu2.b32.cont [4/16] (narrow) %v3518_v13, 8 }
 0x7d2   : > { %v3418_v37 = vpop.permute.xlu0 %3417 }
 0x7d3   : > { %v3506_v62 = vadd.f32 %v3418_v37, %v6435_v7  ;;  %v3446_v14 = vpop.permute.xlu1 %3445  ;;  %v3432_v7 = vpop.permute.xlu2 %3431 }
 0x7d4   : > { %v3520_v23 = vadd.f32 %v3446_v14, %v6451_v18  ;;  %v3513_v34 = vadd.f32 %v3432_v7, %v6385_v15  ;;  %v4669_v15 = vld [vmem:[%s6517_s24 + $0x18] sm:$0xff] }
 0x7d5   : > { %3547 = vxpose.xlu0.b32.cont [8/16] (narrow) %v3506_v62, 8  ;;  %3576 = vxpose.xlu2.b32.cont [5/16] (narrow) %v3519_v53, 8 }
 0x7d6   : > { %3768 = vmatpush.bf16.msrb.mxu1 %v4669_v15 }
 0x7da   : > { %v3430_v4 = vpop.permute.xlu0 %3429 }
 0x7db   : > { %v3422_v46 = vpop.permute.xlu1 %3421  ;;  %v3426_v18 = vpop.permute.xlu2 %3425 }
 0x7dc   : > { %v3508_v24 = vadd.f32 %v3422_v46, %v6457_v56  ;;  %v3510_v49 = vadd.f32 %v3426_v18, %v6477_v52  ;;  %v3524_v56 = vadd.f32 %v6490_v50, %v6399_v3  ;;  %v3512_v52 = vadd.f32 %v3430_v4, %v6375_v35  ;;  %v4680_v50 = vld [vmem:[%s6517_s24 + $0x70] sm:$0xff] }
 0x7dd   : > { %3548 = vxpose.xlu0.b32.cont [9/16] (narrow) %v3507_v29, 8  ;;  %3577 = vxpose.xlu2.b32.cont [6/16] (narrow) %v3520_v23, 8  ;;  %v3631_v29 = vld [vmem:[#allocation9] sm:$0x3] }
 0x7de   : > { %3778 = vmatpush.bf16.msra.mxu2 %v4680_v50 }
 0x7e2   : > { %v3466_v1 = vpop.permute.xlu0 %3465 }
 0x7e3   : > { %v3428_v47 = vpop.permute.xlu1 %3427 }
 0x7e4   : > { %v3511_v38 = vadd.f32 %v3428_v47, %v6367_v42  ;;  %v3526_v42 = vadd.f32 %v3458_v16, %v6415_v20  ;;  %v3528_v20 = vadd.f32 %v3462_v44, %v6447_v40  ;;  %v4678_v40 = vld [vmem:[%s6517_s24 + $0x60] sm:$0xff] }
 0x7e5   : > { %3549 = vxpose.xlu0.b32.cont [10/16] (narrow) %v3508_v24, 8  ;;  %3578 = vxpose.xlu2.b32.cont [7/16] (narrow) %v3521_v12, 8 }
 0x7ea   : > { %v3424_v39 = vpop.permute.xlu0 %3423 }
 0x7eb   : > { %v3509_v0 = vadd.f32 %v3424_v39, %v6467_v25  ;;  %v3525_v25 = vadd.f32 %v6492_v22, %v6407_v30  ;;  %v3464_v3 = vpop.permute.xlu1 %3463  ;;  %v3527_v30 = vadd.f32 %v6496_v21, %v6427_v19  ;;  %v4679_v22 = vld [vmem:[%s6517_s24 + $0x68] sm:$0xff] }
 0x7ec   : > { %v3529_v19 = vadd.f32 %v3464_v3, %v6459_v10  ;;  %3779 = vmatpush.bf16.msra.mxu2 %v4679_v22  ;;  %v4668_v10 = vld [vmem:[%s6517_s24 + $0x10] sm:$0xff] }
 0x7ed   : > { %3550 = vxpose.xlu0.b32.cont [11/16] (narrow) %v3509_v0, 8  ;;  %3579 = vxpose.xlu2.b32.cont [8/16] (narrow) %v3522_v41, 8 }
 0x7ee   : > { %3769 = vmatpush.bf16.msrb.mxu1 %v4668_v10 }
 0x7f0   : > { %3780 = vmatpush.bf16.msra.mxu2 %v4678_v40 }
 0x7f3   : > { %v3434_v43 = vpop.permute.xlu1 %3433 }
 0x7f4   : > { %v3514_v35 = vadd.f32 %v3434_v43, %v6395_v63  ;;  %v3530_v63 = vadd.f32 %v3466_v1, %v6469_v32  ;;  %3781 = vmatpush.bf16.msra.mxu2 %v4677_v28  ;;  %v4667_v32 = vld [vmem:[%s6517_s24 + $0x8] sm:$0xff]  ;;  %s7149_s24 = sld [smem:[#allocation105_spill]] (!%p4605_p12) }
 0x7f5   : > { %3580 = vxpose.xlu2.b32.cont [9/16] (narrow) %v3523_v31, 8  ;;  %3551 = vxpose.xlu0.b32.cont [12/16] (narrow) %v3510_v49, 8 }
 0x7f6   : > { %3770 = vmatpush.bf16.msrb.mxu1 %v4667_v32 }
 0x7f8   : > { %3782 = vmatpush.bf16.msra.mxu2 %v4676_v45 }
 0x7fa   : > { %3771 = vmatpush.bf16.msrb.mxu1 %v4666_v51 }
 0x7fc   : > { %3783 = vmatpush.bf16.msra.mxu2 %v4675_v36 }
 0x7fd   : > { %3581 = vxpose.xlu2.b32.cont [10/16] (narrow) %v3524_v56, 8  ;;  %3552 = vxpose.xlu0.b32.cont [13/16] (narrow) %v3511_v38, 8 }
 0x800   : > { %3784 = vmatpush.bf16.msra.mxu2 %v4674_v9 }
 0x805   : > { %3582 = vxpose.xlu2.b32.cont [11/16] (narrow) %v3525_v25, 8  ;;  %3553 = vxpose.xlu0.b32.cont [14/16] (narrow) %v3512_v52, 8 }
 0x80d   : > { %3583 = vxpose.xlu2.b32.cont [12/16] (narrow) %v3526_v42, 8  ;;  %3554 = vxpose.xlu0.b32.cont [15/16] (narrow) %v3513_v34, 8 }
 0x815   : > { %3584 = vxpose.xlu2.b32.cont [13/16] (narrow) %v3527_v30, 8  ;;  %3555 = vxpose.xlu0.b32.end [16/16] (narrow) %v3514_v35, 8 }
 0x81d   : > { %3585 = vxpose.xlu2.b32.cont [14/16] (narrow) %v3528_v20, 8 }
 0x825   : > { %3586 = vxpose.xlu2.b32.cont [15/16] (narrow) %v3529_v19, 8 }
 0x82d   : > { %3587 = vxpose.xlu2.b32.end [16/16] (narrow) %v3530_v63, 8 }
 0x841   : > { %v3556_v6 = vpop.trf.xlu0 }
 0x84e   : > { %v3588_v55 = vpop.trf.xlu2 }
 0x84f   : > { %v3606_v8 = vrot.slane %v3588_v55, 7 }
 0x851   : > { %v3608_v16 = vsel %vm3607_vm10, %v3556_v6, %v3606_v8 }
 0x852   : > { %v3610_v57 = vsub.f32 %v3539_v26, %v3608_v16 }
 0x854   : > { %v3611_v21 = vmul.f32 1.442695, %v3610_v57 }
 0x856   : > { %4895 = vpow2.f32 %v3611_v21 }
 0x85c   : > { %v4896_v17 = vpop.eup %4895 }
 0x85d   : > { %v3617_v61 = vperm.slane %v4896_v17, 1  ;;  %v3616_v2 = vperm.slane %v4896_v17, 0 }
 0x85f   : > { %v3618_v58 = vrot.slane %v3617_v61, 6 }
 0x861   : > { %v3620_v13 = vsel %vm3619_vm11, %v3616_v2, %v3618_v58 }
 0x862   : > { %v3622_v48 = vmul.f32 %v3620_v13, %v3614_v60 }
 0x864   : > { %3624 = vst [vmem:[#allocation1] ss:$4 sm:$0xff] %v3622_v48 }
 0x86b   : > { %v3625_v37 = vld.sshfl [vmem:[#allocation1] sm:$0xff pattern:$0x73625140]  ;;  %v3626_v53 = vld.sshfl [vmem:[#allocation1 + $0x8] sm:$0xff pattern:$0x73625140] }
 0x86c   : > { %v3629_v62 = vpack.c.bf16 %v3625_v37, %v3625_v37  ;;  %v3630_v14 = vpack.c.bf16 %v3626_v53, %v3626_v53 }
 0x86e   : > { %3772 = vmatmul.bf16.vlgmr.msrb.gmra.mxu1 %v3629_v62  ;;  %3785 = vmatmul.bf16.vlgmr.msra.gmra.mxu2 %v3630_v14 }
 0x8eb   : > { %v3773_v4 = vpop.f32.mrf.mxu1 }
 0x8f1   : > { %v3786_v23 = vpop.f32.mrf.mxu2 }
 0x8f2   : > { %v3787_v44 = vadd.f32 %v3786_v23, %v3773_v4 }
 0x8f3   : > { %v3775_v46 = vpop.f32.mrf.mxu1 }
 0x8f4   : > { %v3790_v1 = vadd.f32 %v3787_v44, %v3631_v29 }
 0x8f5   : > { %3796 = sbr.rel (%p4605_p12) target bundleno = 2721 (0xaa1), region = 140 }
 0x8f6   : > { %3792 = vst.msk [vmem:[#allocation9] sm:$0x3] %vm3791_vm12, %v3790_v1 }
 0x8f9   : > { %v3788_v12 = vpop.f32.mrf.mxu2 }
 0x8fa   : > { %v3804_v24 = vld [vmem:[%s6852_s15 + $0x30] sm:$0xff]  ;;  %v3805_v7 = vld [vmem:[%s6852_s15 + $0x38] sm:$0xff]  ;;  %v3802_v39 = vld [vmem:[%s6852_s15 + $0x20] sm:$0xff]  ;;  %vm3812_vm13 = vcmask 261120   ;;  %vm3934_vm0 = vcmask 588800   ;;  %vm4112_vm6 = vcmask 1024  }
 0x8fb   : > { %3828 = vmatpush.msra.mxu0 %v3804_v24  ;;  %3848 = vmatpush.msra.mxu1 %v3805_v7  ;;  %v3803_v41 = vld [vmem:[%s6852_s15 + $0x28] sm:$0xff]  ;;  %v3800_v0 = vld [vmem:[%s6852_s15 + $0x10] sm:$0xff]  ;;  %v3801_v18 = vld [vmem:[%s6852_s15 + $0x18] sm:$0xff] }
 0x8fc   : > { %v3908_v31 = vld [vmem:[%s6856_s19 + $0xf0] sm:$0xff]  ;;  %v3906_v49 = vld [vmem:[%s6856_s19 + $0xe0] sm:$0xff]  ;;  %v3799_v56 = vld [vmem:[%s6852_s15 + $0x8] sm:$0xff] }
 0x8fd   : > { %3829 = vmatpush.msra.mxu0 %v3802_v39  ;;  %3849 = vmatpush.msra.mxu1 %v3803_v41  ;;  %v3798_v47 = vld [vmem:[%s6852_s15] sm:$0xff]  ;;  %v3909_v54 = vld [vmem:[%s6856_s19 + $0xf8] sm:$0xff]  ;;  %v3904_v25 = vld [vmem:[%s6856_s19 + $0xd0] sm:$0xff] }
 0x8fe   : > { %3938 = vmatpush.msra.mxu2 %v3908_v31  ;;  %v3797_v38 = vld [vmem:[#allocation9] sm:$0x3]  ;;  %v3907_v52 = vld [vmem:[%s6856_s19 + $0xe8] sm:$0xff]  ;;  %v3924_v5 = vld [vmem:[%s6856_s19 + $0x170] sm:$0xff] }
 0x8ff   : > { %3830 = vmatpush.msra.mxu0 %v3800_v0  ;;  %3850 = vmatpush.msra.mxu1 %v3801_v18  ;;  %v3902_v3 = vld [vmem:[%s6856_s19 + $0xc0] sm:$0xff]  ;;  %v3927_v34 = vld [vmem:[%s6856_s19 + $0x188] sm:$0xff]  ;;  %v3905_v27 = vld [vmem:[%s6856_s19 + $0xd8] sm:$0xff] }
 0x900   : > { %3939 = vmatpush.msra.mxu2 %v3906_v49  ;;  %v3926_v42 = vld [vmem:[%s6856_s19 + $0x180] sm:$0xff]  ;;  %v3900_v43 = vld [vmem:[%s6856_s19 + $0xb0] sm:$0xff]  ;;  %v3925_v30 = vld [vmem:[%s6856_s19 + $0x178] sm:$0xff] }
 0x901   : > { %3831 = vmatpush.msra.mxu0 %v3798_v47  ;;  %3851 = vmatpush.msra.mxu1 %v3799_v56  ;;  %v3922_v35 = vld [vmem:[%s6856_s19 + $0x160] sm:$0xff]  ;;  %v3923_v33 = vld [vmem:[%s6856_s19 + $0x168] sm:$0xff]  ;;  %v3920_v19 = vld [vmem:[%s6856_s19 + $0x150] sm:$0xff] }
 0x902   : > { %4606 = vmatmul.msk.f32.vlgmr.msra.gmra.mxu0 %vm3812_vm13, %v3797_v38  ;;  %4607 = vmatmul.msk.f32.vlgmr.msra.gmra.mxu1 %vm3812_vm13, %v3797_v38  ;;  %v3903_v15 = vld [vmem:[%s6856_s19 + $0xc8] sm:$0xff]  ;;  %v3898_v20 = vld [vmem:[%s6856_s19 + $0xa0] sm:$0xff]  ;;  %v3921_v63 = vld [vmem:[%s6856_s19 + $0x158] sm:$0xff] }
 0x903   : > { %3978 = vmatpush.msrb.mxu0 %v3909_v54  ;;  %3940 = vmatpush.msra.mxu2 %v3904_v25  ;;  %v3901_v11 = vld [vmem:[%s6856_s19 + $0xb8] sm:$0xff]  ;;  %v3896_v50 = vld [vmem:[%s6856_s19 + $0x90] sm:$0xff]  ;;  %v3899_v22 = vld [vmem:[%s6856_s19 + $0xa8] sm:$0xff] }
 0x904   : > { %3965 = vmatpush.msra.mxu3 %v3926_v42  ;;  %4005 = vmatpush.msrb.mxu1 %v3927_v34  ;;  %v3894_v40 = vld [vmem:[%s6856_s19 + $0x80] sm:$0xff]  ;;  %v3897_v28 = vld [vmem:[%s6856_s19 + $0x98] sm:$0xff]  ;;  %v3892_v10 = vld [vmem:[%s6856_s19 + $0x70] sm:$0xff] }
 0x905   : > { %3979 = vmatpush.msrb.mxu0 %v3907_v52  ;;  %3941 = vmatpush.msra.mxu2 %v3902_v3  ;;  %v3895_v45 = vld [vmem:[%s6856_s19 + $0x88] sm:$0xff]  ;;  %v3890_v32 = vld [vmem:[%s6856_s19 + $0x60] sm:$0xff]  ;;  %v3893_v36 = vld [vmem:[%s6856_s19 + $0x78] sm:$0xff] }
 0x906   : > { %3966 = vmatpush.msra.mxu3 %v3924_v5  ;;  %4006 = vmatpush.msrb.mxu1 %v3925_v30  ;;  %v3888_v51 = vld [vmem:[%s6856_s19 + $0x50] sm:$0xff]  ;;  %v3891_v9 = vld [vmem:[%s6856_s19 + $0x68] sm:$0xff]  ;;  %v3889_v55 = vld [vmem:[%s6856_s19 + $0x58] sm:$0xff] }
 0x907   : > { %3980 = vmatpush.msrb.mxu0 %v3905_v27  ;;  %3942 = vmatpush.msra.mxu2 %v3900_v43  ;;  %v3886_v6 = vld [vmem:[%s6856_s19 + $0x40] sm:$0xff]  ;;  %v3887_v26 = vld [vmem:[%s6856_s19 + $0x48] sm:$0xff]  ;;  %v3884_v57 = vld [vmem:[%s6856_s19 + $0x30] sm:$0xff] }
 0x908   : > { %3967 = vmatpush.msra.mxu3 %v3922_v35  ;;  %4007 = vmatpush.msrb.mxu1 %v3923_v33  ;;  %v3918_v8 = vld [vmem:[%s6856_s19 + $0x140] sm:$0xff]  ;;  %v3919_v16 = vld [vmem:[%s6856_s19 + $0x148] sm:$0xff]  ;;  %v3916_v21 = vld [vmem:[%s6856_s19 + $0x130] sm:$0xff] }
 0x909   : > { %3981 = vmatpush.msrb.mxu0 %v3903_v15  ;;  %3943 = vmatpush.msra.mxu2 %v3898_v20  ;;  %v3885_v59 = vld [vmem:[%s6856_s19 + $0x38] sm:$0xff]  ;;  %v3882_v61 = vld [vmem:[%s6856_s19 + $0x20] sm:$0xff]  ;;  %v3883_v2 = vld [vmem:[%s6856_s19 + $0x28] sm:$0xff] }
 0x90a   : > { %3968 = vmatpush.msra.mxu3 %v3920_v19  ;;  %4008 = vmatpush.msrb.mxu1 %v3921_v63  ;;  %v3917_v17 = vld [vmem:[%s6856_s19 + $0x138] sm:$0xff]  ;;  %v3914_v60 = vld [vmem:[%s6856_s19 + $0x120] sm:$0xff]  ;;  %v3915_v58 = vld [vmem:[%s6856_s19 + $0x128] sm:$0xff] }
 0x90b   : > { %3982 = vmatpush.msrb.mxu0 %v3901_v11  ;;  %3944 = vmatpush.msra.mxu2 %v3896_v50  ;;  %v3880_v13 = vld [vmem:[%s6856_s19 + $0x10] sm:$0xff]  ;;  %v3881_v37 = vld [vmem:[%s6856_s19 + $0x18] sm:$0xff]  ;;  %v3878_v62 = vld [vmem:[%s6856_s19] sm:$0xff] }
 0x90c   : > { %3969 = vmatpush.msra.mxu3 %v3918_v8  ;;  %4009 = vmatpush.msrb.mxu1 %v3919_v16  ;;  %v3912_v48 = vld [vmem:[%s6856_s19 + $0x110] sm:$0xff]  ;;  %v3913_v53 = vld [vmem:[%s6856_s19 + $0x118] sm:$0xff]  ;;  %v3910_v14 = vld [vmem:[%s6856_s19 + $0x100] sm:$0xff] }
 0x90d   : > { %3983 = vmatpush.msrb.mxu0 %v3899_v22  ;;  %3945 = vmatpush.msra.mxu2 %v3894_v40  ;;  %v3879_v4 = vld [vmem:[%s6856_s19 + $0x8] sm:$0xff]  ;;  %v4055_v23 = vld [vmem:[%s6860_s23 + $0x78] sm:$0xff]  ;;  %v4054_v44 = vld [vmem:[%s6860_s23 + $0x70] sm:$0xff] }
 0x90e   : > { %3970 = vmatpush.msra.mxu3 %v3916_v21  ;;  %4010 = vmatpush.msrb.mxu1 %v3917_v17  ;;  %v3911_v29 = vld [vmem:[%s6856_s19 + $0x108] sm:$0xff]  ;;  %v4064_v46 = vld [vmem:[%s6860_s23 + $0xc0] sm:$0xff]  ;;  %v4063_v12 = vld [vmem:[%s6860_s23 + $0xb8] sm:$0xff] }
 0x90f   : > { %3984 = vmatpush.msrb.mxu0 %v3897_v28  ;;  %3946 = vmatpush.msra.mxu2 %v3892_v10  ;;  %v4053_v1 = vld [vmem:[%s6860_s23 + $0x68] sm:$0xff]  ;;  %v4062_v24 = vld [vmem:[%s6860_s23 + $0xb0] sm:$0xff]  ;;  %v4052_v7 = vld [vmem:[%s6860_s23 + $0x60] sm:$0xff] }
 0x910   : > { %3971 = vmatpush.msra.mxu3 %v3914_v60  ;;  %4011 = vmatpush.msrb.mxu1 %v3915_v58  ;;  %v4051_v39 = vld [vmem:[%s6860_s23 + $0x58] sm:$0xff]  ;;  %v4050_v41 = vld [vmem:[%s6860_s23 + $0x50] sm:$0xff]  ;;  %v4049_v0 = vld [vmem:[%s6860_s23 + $0x48] sm:$0xff] }
 0x911   : > { %3985 = vmatpush.msrb.mxu0 %v3895_v45  ;;  %3947 = vmatpush.msra.mxu2 %v3890_v32  ;;  %v3806_v18 = vld [vmem:[%s6853_s16] sm:$0x3]  ;;  %v4061_v11 = vld [vmem:[%s6860_s23 + $0xa8] sm:$0xff]  ;;  %v4047_v50 = vld [vmem:[%s6860_s23 + $0x38] sm:$0xff] }
 0x912   : > { %3972 = vmatpush.msra.mxu3 %v3912_v48  ;;  %4012 = vmatpush.msrb.mxu1 %v3913_v53  ;;  %v3808_v31 = vperm.slane %v3806_v18, 0  ;;  %v3809_v49 = vperm.slane %v3806_v18, 1  ;;  %v3862_v47 = vld [vmem:[%s6854_s17] sm:$0x3]  ;;  %v4046_v40 = vld [vmem:[%s6860_s23 + $0x30] sm:$0xff]  ;;  %v4059_v28 = vld [vmem:[%s6860_s23 + $0x98] sm:$0xff] }
 0x913   : > { %3986 = vmatpush.msrb.mxu0 %v3893_v36  ;;  %3948 = vmatpush.msra.mxu2 %v3888_v51  ;;  %v3870_v52 = vld [vmem:[%s7145_s12] sm:$0x3]  ;;  %v3864_v3 = vperm.slane %v3862_v47, 0  ;;  %v3865_v42 = vperm.slane %v3862_v47, 1  ;;  %v4045_v10 = vld [vmem:[%s6860_s23 + $0x28] sm:$0xff]  ;;  %v4058_v45 = vld [vmem:[%s6860_s23 + $0x90] sm:$0xff] }
 0x914   : > { %3973 = vmatpush.msra.mxu3 %v3910_v14  ;;  %4013 = vmatpush.msrb.mxu1 %v3911_v29  ;;  %v3872_v27 = vperm.slane %v3870_v52, 0  ;;  %v3873_v43 = vperm.slane %v3870_v52, 1  ;;  %v4048_v63 = vld [vmem:[%s6860_s23 + $0x40] sm:$0xff]  ;;  %v4057_v36 = vld [vmem:[%s6860_s23 + $0x88] sm:$0xff]  ;;  %v4043_v51 = vld [vmem:[%s6860_s23 + $0x18] sm:$0xff] }
 0x915   : > { %3987 = vmatpush.msrb.mxu0 %v3891_v9  ;;  %3949 = vmatpush.msra.mxu2 %v3886_v6  ;;  %v4060_v22 = vld [vmem:[%s6860_s23 + $0xa0] sm:$0xff]  ;;  %v4041_v6 = vld [vmem:[%s6860_s23 + $0x8] sm:$0xff] }
 0x916   : > { %4072 = vmatpush.msrb.mxu3 %v4055_v23  ;;  %4099 = vmatpush.msra.mxu1 %v4064_v46  ;;  %v4044_v32 = vld [vmem:[%s6860_s23 + $0x20] sm:$0xff] }
 0x917   : > { %3988 = vmatpush.msrb.mxu0 %v3889_v55  ;;  %3950 = vmatpush.msra.mxu2 %v3884_v57  ;;  %v4056_v9 = vld [vmem:[%s6860_s23 + $0x80] sm:$0xff]  ;;  %v4042_v55 = vld [vmem:[%s6860_s23 + $0x10] sm:$0xff] }
 0x918   : > { %4073 = vmatpush.msrb.mxu3 %v4054_v44  ;;  %4100 = vmatpush.msra.mxu1 %v4063_v12  ;;  %v4040_v8 = vld [vmem:[%s6860_s23] sm:$0xff] }
 0x919   : > { %3989 = vmatpush.msrb.mxu0 %v3887_v26  ;;  %3951 = vmatpush.msra.mxu2 %v3882_v61  ;;  %v3928_v26 = vld [vmem:[%s7146_s0] sm:$0x3] }
 0x91a   : > { %4074 = vmatpush.msrb.mxu3 %v4053_v1  ;;  %4101 = vmatpush.msra.mxu1 %v4062_v24  ;;  %v3931_v16 = vperm.slane %v3928_v26, 1  ;;  %v3930_v61 = vperm.slane %v3928_v26, 0 }
 0x91b   : > { %3990 = vmatpush.msrb.mxu0 %v3885_v59  ;;  %3952 = vmatpush.msra.mxu2 %v3880_v13  ;;  %v4024_v59 = vld [vmem:[%s7147_s1] sm:$0x3] }
 0x91c   : > { %4075 = vmatpush.msrb.mxu3 %v4052_v7  ;;  %4102 = vmatpush.msra.mxu1 %v4061_v11  ;;  %v4027_v58 = vperm.slane %v4024_v59, 1  ;;  %v4026_v23 = vperm.slane %v4024_v59, 0 }
 0x91d   : > { %3991 = vmatpush.msrb.mxu0 %v3883_v2  ;;  %3953 = vmatpush.msra.mxu2 %v3878_v62  ;;  %v4032_v2 = vld [vmem:[%s7148_s22] sm:$0x3] }
 0x91e   : > { %4076 = vmatpush.msrb.mxu3 %v4051_v39  ;;  %4103 = vmatpush.msra.mxu1 %v4060_v22  ;;  %v4034_v1 = vperm.slane %v4032_v2, 0  ;;  %v4897_v39 = vld [vmem:[#allocation12] ss:$0 sm:$0xff] }
 0x91f   : > { %3992 = vmatpush.msrb.mxu0 %v3881_v37  ;;  %v4035_v37 = vperm.slane %v4032_v2, 1 }
 0x920   : > { %4077 = vmatpush.msrb.mxu3 %v4050_v41  ;;  %4104 = vmatpush.msra.mxu1 %v4059_v28 }
 0x921   : > { %3993 = vmatpush.msrb.mxu0 %v3879_v4 }
 0x922   : > { %4078 = vmatpush.msrb.mxu3 %v4049_v0  ;;  %4105 = vmatpush.msra.mxu1 %v4058_v45 }
 0x924   : > { %4079 = vmatpush.msrb.mxu3 %v4048_v63  ;;  %4106 = vmatpush.msra.mxu1 %v4057_v36 }
 0x926   : > { %4080 = vmatpush.msrb.mxu3 %v4047_v50  ;;  %4107 = vmatpush.msra.mxu1 %v4056_v9 }
 0x928   : > { %4081 = vmatpush.msrb.mxu3 %v4046_v40 }
 0x92a   : > { %4082 = vmatpush.msrb.mxu3 %v4045_v10 }
 0x92c   : > { %4083 = vmatpush.msrb.mxu3 %v4044_v32 }
 0x92e   : > { %4084 = vmatpush.msrb.mxu3 %v4043_v51 }
 0x930   : > { %4085 = vmatpush.msrb.mxu3 %v4042_v55 }
 0x932   : > { %4086 = vmatpush.msrb.mxu3 %v4041_v6 }
 0x934   : > { %4087 = vmatpush.msrb.mxu3 %v4040_v8 }
 0x97f   : > { %v3833_v56 = vpop.f32.mrf.mxu0  ;;  %v3853_v38 = vpop.f32.mrf.mxu1 }
 0x980   : > { %v3834_v54 = vadd.f32 %v3833_v56, %v3808_v31  ;;  %v3854_v25 = vadd.f32 %v3853_v38, %v3809_v49 }
 0x982   : > { %vm3856_vm14 = vcmp.gt.f32.partialorder %v3834_v54, 0.0  ;;  %v3858_v34 = vmul.f32 0.01, %v3834_v54  ;;  %vm3857_vm15 = vcmp.gt.f32.partialorder %v3854_v25, 0.0  ;;  %v3859_v5 = vmul.f32 0.01, %v3854_v25 }
 0x984   : > { %v3861_v30 = vsel %vm3857_vm15, %v3854_v25, %v3859_v5  ;;  %v3860_v35 = vsel %vm3856_vm14, %v3834_v54, %v3858_v34 }
 0x985   : > { %v3868_v33 = vmul.f32 %v3864_v3, %v3860_v35  ;;  %v3869_v15 = vmul.f32 %v3865_v42, %v3861_v30 }
 0x987   : > { %v3876_v20 = vadd.f32 %v3872_v27, %v3868_v33  ;;  %v3877_v19 = vadd.f32 %v3873_v43, %v3869_v15 }
 0x989   : > { %3954 = vmatmul.f32.vlgmr.msra.gmra.mxu2 %v3876_v20  ;;  %4608 = vmatmul.msk.f32.vlgmr.msra.gmra.mxu3 %vm3934_vm0, %v3877_v19 }
 0x98a   : > { %3994 = vmatmul.f32.vlgmr.msrb.gmra.mxu0 %v3876_v20  ;;  %4609 = vmatmul.msk.f32.vlgmr.msrb.gmra.mxu1 %vm3934_vm0, %v3877_v19 }
 0xa07   : > { %v3995_v57 = vpop.f32.mrf.mxu0  ;;  %v4015_v17 = vpop.f32.mrf.mxu1 }
 0xa08   : > { %v3996_v21 = vadd.f32 %v3995_v57, %v3931_v16 }
 0xa0a   : > { %v4016_v60 = vadd.f32 %v4015_v17, %v3996_v21 }
 0xa0c   : > { %vm4019_vm1 = vcmp.gt.f32.partialorder %v4016_v60, 0.0  ;;  %v4021_v13 = vmul.f32 0.01, %v4016_v60  ;;  %v3955_v48 = vpop.f32.mrf.mxu2  ;;  %v3975_v14 = vpop.f32.mrf.mxu3 }
 0xa0d   : > { %v3956_v53 = vadd.f32 %v3955_v48, %v3930_v61 }
 0xa0e   : > { %v4023_v62 = vsel %vm4019_vm1, %v4016_v60, %v4021_v13 }
 0xa0f   : > { %v4031_v4 = vmul.f32 %v4027_v58, %v4023_v62  ;;  %v3976_v29 = vadd.f32 %v3975_v14, %v3956_v53 }
 0xa11   : > { %v4039_v44 = vadd.f32 %v4035_v37, %v4031_v4  ;;  %vm4018_vm2 = vcmp.gt.f32.partialorder %v3976_v29, 0.0  ;;  %v4020_v46 = vmul.f32 0.01, %v3976_v29 }
 0xa13   : > { %v4022_v12 = vsel %vm4018_vm2, %v3976_v29, %v4020_v46  ;;  %4610 = vmatmul.msk.f32.vlgmr.msra.gmra.mxu1 %vm3934_vm0, %v4039_v44 }
 0xa14   : > { %v4030_v24 = vmul.f32 %v4026_v23, %v4022_v12 }
 0xa16   : > { %v4038_v7 = vadd.f32 %v4034_v1, %v4030_v24 }
 0xa18   : > { %4088 = vmatmul.f32.vlgmr.msrb.gmra.mxu3 %v4038_v7 }
 0xa90   : > { %v4109_v18 = vpop.f32.mrf.mxu1 }
 0xa9b   : > { %v4089_v41 = vpop.f32.mrf.mxu3 }
 0xa9c   : > { %v4090_v0 = vadd.f32 %v4897_v39, %v4089_v41 }
 0xa9e   : > { %v4110_v31 = vadd.f32 %v4109_v18, %v4090_v0 }
 0xaa0   : > { %4113 = vst.msk [vmem:[%s7149_s24] sm:$0x3] %vm4112_vm6, %v4110_v31 }
 0xaa1 PF: > { %s7150_s5 = sld [smem:[#allocation15_spill]] }
 0xaa2   : > { %s7151_s26 = sld [smem:[#allocation13_spill]] }
 0xaa3   : > { %s7152_s1 = sld [smem:[#allocation14_spill]] }
 0xaa4   : > { %s7153_s8 = sld [smem:[#allocation16_spill]] }
 0xaa5   : > { %s7154_s27 = sld [smem:[#allocation17_spill]] }
 0xaa7   : > { %s41_s12 = sadd.s32 1, %s7150_s5  }
 0xaa8   : > { %p38_p13 = scmp.ge.s32.totalorder %s41_s12, 6  }
 0xaaa   :  { %40 = sbr.rel (!%p38_p13) target bundleno = 16 (0x10), region = 179 }

</bundles_post_ra>
